<compile_context>
chip_gen: v6e
topology: v6e:2x2x1
jax: 0.10.0
libtpu: 0.0.40
codegen_flags: <defaults>
</compile_context>

<pallas_src>
import jax
import jax.numpy as jnp
import numpy as np
from jax.experimental import pallas as pl
from jax.experimental.pallas import tpu as pltpu

FEAT_C = 2560   # EfficientNet-b7 feature channels
HID = 256       # intermediate Linear width
OUT = 2         # final Linear width


def _round_up(x, m):
    return ((x + m - 1) // m) * m


def _tpu_defaults():
    """Per-TPU-generation defaults: (compute_dtype, hw_tile, n_feature_tiles, vmem_limit)."""
    gen = 0
    try:
        kind = jax.devices()[0].device_kind.lower()
        for g in (7, 6, 5, 4, 3, 2):
            if str(g) in kind:
                gen = g
                break
    except Exception:
        pass
    # bf16 VPU/EUP exists on v6e/v7x; keep f32 on v5e and older.
    compute_dtype = jnp.bfloat16 if gen >= 6 else jnp.float32
    # ~0.35us per grid step; 1024-row spatial tiles amortize it well.
    hw_tile = 1024
    # v7x has 2 TensorCores: a 'parallel' feature axis keeps both busy at B=1.
    n_feature_tiles = 2 if gen >= 7 else 1
    # v7x: 64 MiB physical VMEM -> 48 MiB scoped; v5e/v6e: 128 MiB -> 64 MiB.
    vmem_limit = 48 * 2**20 if gen >= 7 else 64 * 2**20
    try:
        phys = int(pltpu.get_tpu_info().vmem_capacity_bytes)
        vmem_limit = min(vmem_limit, phys * 3 // 4)
    except Exception:
        pass
    return compute_dtype, hw_tile, n_feature_tiles, int(vmem_limit)


# ----------------------------------------------------------------------------
# Kernel 1: stem (1x1 conv + swish, backbone stand-in) + global average pool.
# grid = (B, n_feature_tiles, n_hw_tiles); batch & feature axes are megacore-
# parallel, the spatial axis is the sequential reduction with an f32 scratch.
# ----------------------------------------------------------------------------
def _make_stem_pool_kernel(hw, hw_tile):
    inv_hw = 1.0 / float(hw)   # compile-time constant; no in-kernel divide

    def stem_pool_kernel(x_ref, ws_ref, pooled_ref, acc_ref):
        t = pl.program_id(2)

        @pl.when(t == 0)
        def _init():
            acc_ref[...] = jnp.zeros_like(acc_ref)

        x = x_ref[...]          # (hw_tile, cin_aug)  compute dtype
        ws = ws_ref[...]        # (cin_aug, f_tile)   compute dtype

        # Channel mix + bias on the MXU (K is tiny but the MXU slot is free;
        # the bias lives in an all-ones input channel, so zero-padded spatial
        # rows produce exactly 0 and need no mask).
        f = jnp.dot(x, ws, preferred_element_type=jnp.float32)
        f = f.astype(x.dtype)   # bf16 swish on v6e/v7x, f32 on v5e

        # swish with a single EUP push (tanh form of sigmoid).
        f = f * (0.5 * jnp.tanh(0.5 * f) + 0.5)

        # Partial pooled sum: VALU-only group adds into an (8, f_tile) f32
        # accumulator; the cross-sublane (XLU) reduce waits for _finalize.
        fs = f.astype(jnp.float32).reshape(hw_tile // 8, 8, -1)
        acc_ref[...] += jnp.sum(fs, axis=0)

        @pl.when(t == pl.num_programs(2) - 1)
        def _finalize():
            pooled_ref[...] = jnp.sum(acc_ref[...], axis=0, keepdims=True) * inv_hw

    return stem_pool_kernel


# ----------------------------------------------------------------------------
# Kernel 2: batched head.  Runs once per forward with M = B on the MXU:
#   Linear(2560, 256) -> ReLU -> Linear(256, 2)
# ----------------------------------------------------------------------------
def head_kernel(pooled_ref, w1_ref, b1_ref, w2_ref, b2_ref, o_ref):
    h = jnp.dot(pooled_ref[...], w1_ref[...],
                preferred_element_type=jnp.float32) + b1_ref[...]
    h = jnp.maximum(h, 0.0)                                   # ReLU
    y = jnp.dot(h, w2_ref[...],
                preferred_element_type=jnp.float32) + b2_ref[...]
    o_ref[...] = y.astype(o_ref.dtype)


# ----------------------------------------------------------------------------
# Wrapper
# ----------------------------------------------------------------------------
def df_forward(data, params, *, compute_dtype=None, hw_tile=None,
               n_feature_tiles=None, vmem_limit_bytes=None):
    """data: NCHW float32 image batch. Returns (B, 2) f32 logits.

    Defaults are auto-tuned per TPU generation; pooled accumulation and the
    head accumulation are always f32.
    """
    ws, bs, w1, b1, w2, b2 = params
    B, Cin, H, W = data.shape
    HW = H * W

    d_cdt, d_hw, d_nf, d_vmem = _tpu_defaults()
    compute_dtype = d_cdt if compute_dtype is None else compute_dtype
    hw_tile = d_hw if hw_tile is None else hw_tile
    n_f = d_nf if n_feature_tiles is None else n_feature_tiles
    vmem_limit_bytes = d_vmem if vmem_limit_bytes is None else vmem_limit_bytes

    assert FEAT_C % n_f == 0 and (FEAT_C // n_f) % 128 == 0, n_f
    f_tile = FEAT_C // n_f

    # Spatial tile: multiple of 8 sublanes, capped at the (padded) HW extent.
    hw_tile = _round_up(int(min(hw_tile, _round_up(HW, 8))), 8)
    n_t = pl.cdiv(HW, hw_tile)
    hw_pad = n_t * hw_tile

    # NCHW -> (B, HW, Cin) channels-last; append an all-ones "bias channel"
    # (bias folds into the MXU matmul) BEFORE zero-padding HW, so padded rows
    # are entirely zero and contribute nothing to the pooled sum.
    x = jnp.transpose(data, (0, 2, 3, 1)).reshape(B, HW, Cin)
    x = jnp.concatenate([x, jnp.ones((B, HW, 1), x.dtype)], axis=-1)
    cin_aug = _round_up(Cin + 1, 8)
    x = jnp.pad(x, ((0, 0), (0, hw_pad - HW), (0, cin_aug - (Cin + 1))))
    x = x.astype(compute_dtype)

    ws_aug = jnp.concatenate([ws, bs], axis=0)                    # bias = last row
    ws_aug = jnp.pad(ws_aug, ((0, cin_aug - (Cin + 1)), (0, 0)))
    ws_aug = ws_aug.astype(compute_dtype)

    stem_kernel = _make_stem_pool_kernel(HW, hw_tile)

    pooled = pl.pallas_call(
        stem_kernel,
        out_shape=jax.ShapeDtypeStruct((B, 1, FEAT_C), jnp.float32),
        grid=(B, n_f, n_t),
        in_specs=[
            pl.BlockSpec((pl.Squeezed(), hw_tile, cin_aug),
                         lambda b, fi, t: (b, t, 0)),
            pl.BlockSpec((cin_aug, f_tile), lambda b, fi, t: (0, fi)),
        ],
        # Per-(batch, feature-tile) output block: both parallel axes are free
        # to be sharded across v7x's two TensorCores.
        out_specs=pl.BlockSpec((pl.Squeezed(), 1, f_tile),
                               lambda b, fi, t: (b, 0, fi)),
        scratch_shapes=[pltpu.VMEM((8, f_tile), jnp.float32)],
        compiler_params=pltpu.CompilerParams(
            dimension_semantics=("parallel", "parallel", "arbitrary"),
            vmem_limit_bytes=vmem_limit_bytes,
        ),
    )(x, ws_aug)

    # Head runs once per forward with M = B.  Feeding pooled/w1 in the compute
    # dtype (bf16 on v6e/v7x) halves the dominant w1 DMA; accumulation stays f32.
    head_dtype = compute_dtype
    pooled2 = pooled.reshape(B, FEAT_C).astype(head_dtype)
    w1c = w1.astype(head_dtype)

    out = pl.pallas_call(
        head_kernel,
        out_shape=jax.ShapeDtypeStruct((B, OUT), jnp.float32),
        grid=(1,),
        in_specs=[
            pl.BlockSpec((B, FEAT_C), lambda i: (0, 0)),
            pl.BlockSpec((FEAT_C, HID), lambda i: (0, 0)),
            pl.BlockSpec((1, HID), lambda i: (0, 0)),
            pl.BlockSpec((HID, OUT), lambda i: (0, 0)),
            pl.BlockSpec((1, OUT), lambda i: (0, 0)),
        ],
        out_specs=pl.BlockSpec((B, OUT), lambda i: (0, 0)),
        compiler_params=pltpu.CompilerParams(
            dimension_semantics=("arbitrary",),
            vmem_limit_bytes=vmem_limit_bytes,
        ),
    )(pooled2, w1c, b1, w2, b2)

    return out


def make_params(key, cin):
    ks = jax.random.split(key, 6)
    ws = 0.05 * jax.random.normal(ks[0], (cin, FEAT_C), jnp.float32)
    bs = 0.01 * jax.random.normal(ks[1], (1, FEAT_C), jnp.float32)
    w1 = 0.02 * jax.random.normal(ks[2], (FEAT_C, HID), jnp.float32)
    b1 = 0.01 * jax.random.normal(ks[3], (1, HID), jnp.float32)
    w2 = 0.05 * jax.random.normal(ks[4], (HID, OUT), jnp.float32)
    b2 = 0.01 * jax.random.normal(ks[5], (1, OUT), jnp.float32)
    return ws, bs, w1, b1, w2, b2


def df_forward_ref(data, params, compute_dtype=jnp.float32):
    """Pure-JAX reference (same math / same compute dtype as the kernel)."""
    ws, bs, w1, b1, w2, b2 = params
    B, Cin, H, W = data.shape
    cdt = compute_dtype
    x = jnp.transpose(data, (0, 2, 3, 1)).reshape(B, H * W, Cin).astype(cdt)
    f = jnp.dot(x, ws.astype(cdt), preferred_element_type=jnp.float32) + bs
    f = f.astype(cdt)
    f = f * (0.5 * jnp.tanh(0.5 * f) + 0.5)            # swish (tanh form)
    pooled = jnp.mean(f.astype(jnp.float32), axis=1)   # (B, FEAT_C)
    h = jnp.dot(pooled.astype(cdt), w1.astype(cdt),
                preferred_element_type=jnp.float32) + b1
    h = jnp.maximum(h, 0.0)
    return jnp.dot(h, w2, preferred_element_type=jnp.float32) + b2


if __name__ == "__main__":
    key = jax.random.PRNGKey(0)
    k_data, k_params = jax.random.split(key)

    B, CIN, H, W = 2, 3, 16, 16
    data = jax.random.normal(k_data, (B, CIN, H, W), jnp.float32)   # NCHW like torch
    params = make_params(k_params, CIN)

    ref = jax.block_until_ready(df_forward_ref(data, params, jnp.float32))

    # 1) Portable f32 path, 2 spatial tiles (exercises accumulate/finalize).
    out = jax.block_until_ready(
        df_forward(data, params, compute_dtype=jnp.float32,
                   hw_tile=128, n_feature_tiles=1))
    assert out.shape == (B, OUT)
    np.testing.assert_allclose(np.asarray(out), np.asarray(ref),
                               rtol=1e-3, atol=2e-4)

    # 2) Spatial padding (HW=256, tile=96 -> pad to 288) + 2 feature tiles
    #    (the v7x two-core layout), still f32: padded rows must contribute 0.
    out_pad = jax.block_until_ready(
        df_forward(data, params, compute_dtype=jnp.float32,
                   hw_tile=96, n_feature_tiles=2))
    np.testing.assert_allclose(np.asarray(out_pad), np.asarray(ref),
                               rtol=1e-3, atol=2e-4)

    # 3) Generation-tuned defaults (bf16 stem/head operands on v6e/v7x,
    #    f32 on v5e and older).
    cdt, _, _, _ = _tpu_defaults()
    out_auto = jax.block_until_ready(df_forward(data, params))
    ref_auto = jax.block_until_ready(df_forward_ref(data, params, cdt))
    if cdt is jnp.float32:
        np.testing.assert_allclose(np.asarray(out_auto), np.asarray(ref_auto),
                                   rtol=1e-3, atol=2e-4)
    else:
        np.testing.assert_allclose(np.asarray(out_auto), np.asarray(ref_auto),
                                   rtol=5e-2, atol=5e-2)

    print("KERNEL_OK")
</pallas_src>

<mosaic_0001>
module attributes {stable_mosaic.version = 11 : i64} {
  func.func @stem_pool_kernel(%arg0: i32, %arg1: i32, %arg2: i32, %arg3: memref<1x128x8xf32, #tpu.memory_space<vmem>>, %arg4: memref<8x2560xf32, #tpu.memory_space<vmem>>, %arg5: memref<1x1x2560xf32, #tpu.memory_space<vmem>>, %arg6: memref<8x2560xf32, #tpu.memory_space<vmem>>) attributes {dimension_semantics = [#tpu.dimension_semantics<parallel>, #tpu.dimension_semantics<parallel>, #tpu.dimension_semantics<arbitrary>], iteration_bounds = array<i64: 2, 1, 2>, scalar_prefetch = 0 : i64, scratch_operands = 1 : i64, tpu.core_type = #tpu.core_type<tc>, window_params = [{transform_indices = @transform_0, window_bounds = array<i64: 1, 128, 8>}, {transform_indices = @transform_1, window_bounds = array<i64: 8, 2560>}, {transform_indices = @transform_2, window_bounds = array<i64: 1, 1, 2560>}]} {
    %c0_i32 = arith.constant 0 : i32
    %0 = arith.cmpi eq, %arg2, %c0_i32 : i32
    %1 = arith.extui %0 : i1 to i32
    %c0_i32_0 = arith.constant 0 : i32
    %2 = arith.cmpi ne, %1, %c0_i32_0 : i32
    scf.if %2 {
      %cst_14 = arith.constant 0.000000e+00 : f32
      %23 = vector.broadcast %cst_14 : f32 to vector<8x2560xf32>
      %c0_15 = arith.constant 0 : index
      %c0_16 = arith.constant 0 : index
      %24 = vector.load %arg6[%c0_15, %c0_16] : memref<8x2560xf32, #tpu.memory_space<vmem>>, vector<8x2560xf32>
      tpu.vector_store %arg6[%c0_15, %c0_16], %23 {strides = array<i32>} : memref<8x2560xf32, #tpu.memory_space<vmem>>, vector<8x2560xf32>,
    } else {
    }
    %c0 = arith.constant 0 : index
    %c0_1 = arith.constant 0 : index
    %c0_2 = arith.constant 0 : index
    %3 = vector.load %arg3[%c0, %c0_1, %c0_2] : memref<1x128x8xf32, #tpu.memory_space<vmem>>, vector<1x128x8xf32>
    %4 = vector.shape_cast %3 : vector<1x128x8xf32> to vector<128x8xf32>
    %c0_3 = arith.constant 0 : index
    %c0_4 = arith.constant 0 : index
    %5 = vector.load %arg4[%c0_3, %c0_4] : memref<8x2560xf32, #tpu.memory_space<vmem>>, vector<8x2560xf32>
    %cst = arith.constant dense<0.000000e+00> : vector<128x2560xf32>
    %6 = tpu.matmul %4, %5, %cst {dimension_numbers = #tpu.dot_dimension_numbers<[1], [0], [0], [1], [0, 0, 1, 1], [], []>} : vector<128x8xf32>, vector<8x2560xf32>, vector<128x2560xf32> -> vector<128x2560xf32>
    %cst_5 = arith.constant 5.000000e-01 : f32
    %7 = vector.broadcast %cst_5 : f32 to vector<128x2560xf32>
    %8 = arith.mulf %7, %6 : vector<128x2560xf32>
    %9 = math.tanh %8 : vector<128x2560xf32>
    %cst_6 = arith.constant 5.000000e-01 : f32
    %10 = vector.broadcast %cst_6 : f32 to vector<128x2560xf32>
    %11 = arith.mulf %10, %9 : vector<128x2560xf32>
    %cst_7 = arith.constant 5.000000e-01 : f32
    %12 = vector.broadcast %cst_7 : f32 to vector<128x2560xf32>
    %13 = arith.addf %11, %12 : vector<128x2560xf32>
    %14 = arith.mulf %6, %13 : vector<128x2560xf32>
    %15 = vector.shape_cast %14 : vector<128x2560xf32> to vector<16x8x2560xf32>
    %c0_8 = arith.constant 0 : index
    %c0_9 = arith.constant 0 : index
    %16 = vector.load %arg6[%c0_8, %c0_9] : memref<8x2560xf32, #tpu.memory_space<vmem>>, vector<8x2560xf32>
    %cst_10 = arith.constant dense<0.000000e+00> : vector<8x2560xf32>
    %17 = vector.multi_reduction <add>, %15, %cst_10 [0] : vector<16x8x2560xf32> to vector<8x2560xf32>
    %18 = arith.addf %16, %17 : vector<8x2560xf32>
    %c0_11 = arith.constant 0 : index
    %c0_12 = arith.constant 0 : index
    %19 = vector.load %arg6[%c0_11, %c0_12] : memref<8x2560xf32, #tpu.memory_space<vmem>>, vector<8x2560xf32>
    tpu.vector_store %arg6[%c0_11, %c0_12], %18 {strides = array<i32>} : memref<8x2560xf32, #tpu.memory_space<vmem>>, vector<8x2560xf32>,
    %c1_i32 = arith.constant 1 : i32
    %20 = arith.cmpi eq, %arg2, %c1_i32 : i32
    %21 = arith.extui %20 : i1 to i32
    %c0_i32_13 = arith.constant 0 : i32
    %22 = arith.cmpi ne, %21, %c0_i32_13 : i32
    scf.if %22 {
      %c0_14 = arith.constant 0 : index
      %c0_15 = arith.constant 0 : index
      %23 = vector.load %arg6[%c0_14, %c0_15] : memref<8x2560xf32, #tpu.memory_space<vmem>>, vector<8x2560xf32>
      %cst_16 = arith.constant dense<0.000000e+00> : vector<2560xf32>
      %24 = vector.multi_reduction <add>, %23, %cst_16 [0] : vector<8x2560xf32> to vector<2560xf32>
      %25 = vector.shape_cast %24 : vector<2560xf32> to vector<1x2560xf32>
      %cst_17 = arith.constant 3.906250e-03 : f32
      %26 = vector.broadcast %cst_17 : f32 to vector<1x2560xf32>
      %27 = arith.mulf %25, %26 : vector<1x2560xf32>
      %c0_18 = arith.constant 0 : index
      %c0_19 = arith.constant 0 : index
      %c0_20 = arith.constant 0 : index
      %28 = vector.load %arg5[%c0_18, %c0_19, %c0_20] : memref<1x1x2560xf32, #tpu.memory_space<vmem>>, vector<1x1x2560xf32>
      %29 = vector.shape_cast %28 : vector<1x1x2560xf32> to vector<1x2560xf32>
      %30 = vector.shape_cast %27 : vector<1x2560xf32> to vector<1x1x2560xf32>
      tpu.vector_store %arg5[%c0_18, %c0_19, %c0_20], %30 {strides = array<i32>} : memref<1x1x2560xf32, #tpu.memory_space<vmem>>, vector<1x1x2560xf32>,
    } else {
    }
    return
  }
  func.func @transform_0(%arg0: i32, %arg1: i32, %arg2: i32) -> (i32, i32, i32) {
    %c0_i32 = arith.constant 0 : i32
    %c0_i32_0 = arith.constant 0 : i32
    return %arg0, %arg2, %c0_i32 : i32, i32, i32
  }
  func.func @transform_1(%arg0: i32, %arg1: i32, %arg2: i32) -> (i32, i32) {
    %c0_i32 = arith.constant 0 : i32
    %c0_i32_0 = arith.constant 0 : i32
    return %c0_i32, %arg1 : i32, i32
  }
  func.func @transform_2(%arg0: i32, %arg1: i32, %arg2: i32) -> (i32, i32, i32) {
    %c0_i32 = arith.constant 0 : i32
    %c0_i32_0 = arith.constant 0 : i32
    return %arg0, %c0_i32, %arg1 : i32, i32, i32
  }
}

</mosaic_0001>

<bundles_post_ra>
// kernel: tpu_custom_call.1
= control target key start
LH: loop header
LB: loop body
LE: loop exit
PB: predicated region body
PF: predicated region fallthrough
CT: control target
= control target key end

     0   :  { %7 = vsyncpa [#allocation4], 0  ;;  %s7939_s0 = inlined_call_operand.vmem [shape: f32[2,256,8], index: 0, kind: input, shape index: {}]   ;;  %s7940_s1 = inlined_call_operand.vmem [shape: f32[8,2560], index: 1, kind: input, shape index: {}]   ;;  %s7941_s2 = inlined_call_operand.hbm [shape: f32[2,1,2560], index: 2, kind: output, shape index: {}]  }
   0x1   :  { %9 = vsyncpa [#allocation4 + $0x1], 0  ;;  %s5330_s9 = smov 0   ;;  %s5332_s10 = smov 0  }
   0x2   :  { %s5334_s11 = smov 0   ;;  %s5336_s12 = smov 0  }
   0x3   :  { %s5338_s13 = smov 0   ;;  %s5340_s14 = smov 0  }
   0x4   :  { %s5342_s15 = smov 0   ;;  %s5344_s16 = smov 0  }
   0x5 LB: > { %s4311_s17 = sadd.s32 4294967295, %s5309_s16   ;;  %s4312_s18 = sadd.s32 4294967294, %s5309_s16   ;;  %s5309_s16 = sphi %s5344_s16, %s15_s16   ;;  %s5305_s15 = sphi %s5342_s15, %s8886_s15   ;;  %s5301_s14 = sphi %s5340_s14, %s8885_s14   ;;  %s5297_s13 = sphi %s5338_s13, %s8884_s13   ;;  %s5293_s12 = sphi %s5336_s12, %s8883_s12   ;;  %s5289_s11 = sphi %s5334_s11, %s8882_s11   ;;  %s5285_s10 = sphi %s5332_s10, %s8881_s10   ;;  %s5281_s9 = sphi %s5330_s9, %s8880_s9  }
   0x6   : > { %s27_s19 = sadd.s32 1, %s5301_s14  ;;  %s34_s20 = sadd.s32 1, %s5305_s15 }
   0x7   : > { %p28_p0 = scmp.ge.s32.totalorder %s27_s19, 2  ;;  %p107_p1 = scmp.ne.s32.totalorder %s5289_s11, %s5285_s10 }
   0x8   : > { %p108_p2 = scmp.eq.s32.totalorder %s4311_s17, 3  ;;  %p113_p4 = scmp.ne.s32.totalorder %s5285_s10, %s5281_s9 }
   0x9   : > { %s8888_s19 = smov (%p28_p0, %s27_s19), 0  ;;  %s8890_s20 = smov (!%p28_p0, %s34_s20), %s5305_s15 }
   0xa   : > { %p5379_p3 = por %p108_p2, %p107_p1  ;;  %p36_p5 = scmp.ge.s32.totalorder %s8890_s20, 2 }
   0xb   : > { %p114_p6 = scmp.eq.s32.totalorder %s4312_s18, 3  ;;  %p4316_p7 = scmp.ge.s32.totalorder %s5309_s16, 1 }
   0xc   : > { %p154_p8 = scmp.lt.s32.totalorder %s5309_s16, 5  ;;  %s8892_s20 = smov (%p36_p5, %s8890_s20), 0 }
   0xd   : > { %p5389_p9 = por %p114_p6, %p113_p4  ;;  %s92_s23 = ssub.s32 %s5305_s15, %s8892_s20 }
   0xe   : > { %p155_p10 = pnand %p4316_p7, %p154_p8  ;;  %s97_s24 = sadd.s32 1, %s5289_s11 }
   0xf   : > { %p95_p11 = scmp.eq.s32.totalorder %s92_s23, 0 }
  0x10   : > { %158 = sbr.rel (%p155_p10) target bundleno = 823 (0x337), region = 28 }
  0x11   : > { %s5397_s25 = scalar_select %p95_p11, %s5289_s11, %s97_s24  }
  0x15   : > { %s182_s26 = sand.u32 1, %s5285_s10   ;;  %s4317_s27 = sshll.u32 %s5293_s12, 4 }
  0x16   : > { %s4485_s28 = smul.u32 20, %s182_s26  ;;  %p186_p12 = scmp.lt.s32.totalorder %s5297_s13, 1 }
  0x17   : > { %p188_p13 = scmp.lt.s32.totalorder %s4317_s27, 31  ;;  %p4320_p0 = scmp.ne.s32.totalorder %s5293_s12, 0 }
  0x18   : > { %s187_s29 = scalar_select %p186_p12, %s5297_s13, 1 }
  0x19   : > { %s8894_s27 = smov (!%p188_p13, %s4317_s27), 31  ;;  %s5410_s8 = scalar_lea.vmem [#allocation3], %s4485_s28 }
  0x1a   : > { %s4318_s30 = sshll.u32 %s187_s29, 5  ;;  %205 = sbr.rel (%p4320_p0) target bundleno = 42 (0x2a), region = 32 }
  0x1b   : > { %s191_s3 = sadd.s32 %s4318_s30, %s8894_s27 }
  0x1c   : > { %s4319_s4 = sshll.u32 %s191_s3, 3 }
  0x1d   : > { %s5408_s7 = scalar_lea.vmem %s7939_s0, %s4319_s4 }
  0x1f   : > { %v5311_v0 = vmov 0.0  }
  0x20   : > { %206 = vst [vmem:[#allocation2] sm:$0xff] %v5311_v0  ;;  %207 = vst [vmem:[#allocation2 + $0x38] sm:$0xff] %v5311_v0 }
  0x21   : > { %208 = vst [vmem:[#allocation2 + $0x50] sm:$0xff] %v5311_v0  ;;  %209 = vst [vmem:[#allocation2 + $0x18] sm:$0xff] %v5311_v0 }
  0x22   : > { %210 = vst [vmem:[#allocation2 + $0x30] sm:$0xff] %v5311_v0  ;;  %211 = vst [vmem:[#allocation2 + $0x68] sm:$0xff] %v5311_v0 }
  0x23   : > { %212 = vst [vmem:[#allocation2 + $0x78] sm:$0xff] %v5311_v0  ;;  %213 = vst [vmem:[#allocation2 + $0x80] sm:$0xff] %v5311_v0 }
  0x24   : > { %214 = vst [vmem:[#allocation2 + $0x8] sm:$0xff] %v5311_v0  ;;  %215 = vst [vmem:[#allocation2 + $0x88] sm:$0xff] %v5311_v0 }
  0x25   : > { %216 = vst [vmem:[#allocation2 + $0x28] sm:$0xff] %v5311_v0  ;;  %217 = vst [vmem:[#allocation2 + $0x40] sm:$0xff] %v5311_v0 }
  0x26   : > { %218 = vst [vmem:[#allocation2 + $0x58] sm:$0xff] %v5311_v0  ;;  %219 = vst [vmem:[#allocation2 + $0x10] sm:$0xff] %v5311_v0 }
  0x27   : > { %220 = vst [vmem:[#allocation2 + $0x98] sm:$0xff] %v5311_v0  ;;  %221 = vst [vmem:[#allocation2 + $0x60] sm:$0xff] %v5311_v0 }
  0x28   : > { %222 = vst [vmem:[#allocation2 + $0x20] sm:$0xff] %v5311_v0  ;;  %223 = vst [vmem:[#allocation2 + $0x48] sm:$0xff] %v5311_v0 }
  0x29   : > { %224 = vst [vmem:[#allocation2 + $0x70] sm:$0xff] %v5311_v0  ;;  %225 = vst [vmem:[#allocation2 + $0x90] sm:$0xff] %v5311_v0 }
  0x2a PF: > { %v243_v1 = vld [vmem:[%s7940_s1 + $0x8] sm:$0xff]  ;;  %v245_v2 = vld [vmem:[%s7940_s1 + $0x18] sm:$0xff]  ;;  %v242_v3 = vld [vmem:[%s7940_s1] sm:$0xff]  ;;  %vm262_vm0 = vcmask 64512   ;;  %v7947_v6 = vmov 0.0   ;;  %p4481_p1 = scmp.ne.s32.totalorder %s5293_s12, 1 }
  0x2b   : > { %341 = vmatprep.subr.mxu0 %v243_v1  ;;  %502 = vmatprep.subr.mxu1 %v245_v2  ;;  %v244_v4 = vld [vmem:[%s7940_s1 + $0x10] sm:$0xff]  ;;  %v5426_v5 = vld [vmem:[%s5408_s7] sm:$0xff]  ;;  %v247_v7 = vld [vmem:[%s7940_s1 + $0x28] sm:$0xff] }
  0x2c   : > { %342 = vmatpush1.msra.mxu0 %v242_v3  ;;  %375 = vmatprep.mubr.f32.mxu0 %v7947_v6  ;;  %v249_v8 = vld [vmem:[%s7940_s1 + $0x38] sm:$0xff]  ;;  %v246_v9 = vld [vmem:[%s7940_s1 + $0x20] sm:$0xff]  ;;  %v248_v10 = vld [vmem:[%s7940_s1 + $0x30] sm:$0xff] }
  0x2d   : > { %503 = vmatpush1.msra.mxu1 %v244_v4  ;;  %536 = vmatprep.mubr.f32.mxu1 %v7947_v6  ;;  %v5447_v11 = vld [vmem:[%s5408_s7 + $0x8] sm:$0xff]  ;;  %v253_v13 = vld [vmem:[%s7940_s1 + $0x58] sm:$0xff]  ;;  %v5464_v14 = vld [vmem:[%s5408_s7 + $0x10] sm:$0xff] }
  0x2e   : > { %4321 = vmatmul.mubr.msk.f32.vlgmr.msra.gmra.mxu0 %vm262_vm0, %v5426_v5  ;;  %4337 = vmatmul.mubr.msk.f32.vlgmr.msra.gmra.mxu1 %vm262_vm0, %v5426_v5  ;;  %v251_v12 = vld [vmem:[%s7940_s1 + $0x48] sm:$0xff]  ;;  %v5473_v15 = vld [vmem:[%s5408_s7 + $0x18] sm:$0xff]  ;;  %v5482_v16 = vld [vmem:[%s5408_s7 + $0x20] sm:$0xff] }
  0x2f   : > { %663 = vmatprep.subr.mxu0 %v247_v7  ;;  %824 = vmatprep.subr.mxu1 %v249_v8  ;;  %v5491_v17 = vld [vmem:[%s5408_s7 + $0x28] sm:$0xff]  ;;  %v5500_v18 = vld [vmem:[%s5408_s7 + $0x30] sm:$0xff]  ;;  %v5509_v19 = vld [vmem:[%s5408_s7 + $0x38] sm:$0xff] }
  0x30   : > { %664 = vmatpush1.msra.mxu0 %v246_v9  ;;  %825 = vmatpush1.msra.mxu1 %v248_v10  ;;  %v5518_v20 = vld [vmem:[%s5408_s7 + $0x40] sm:$0xff]  ;;  %v5527_v21 = vld [vmem:[%s5408_s7 + $0x48] sm:$0xff]  ;;  %v5536_v22 = vld [vmem:[%s5408_s7 + $0x50] sm:$0xff] }
  0x31   : > { %381 = vmatprep.mubr.f32.mxu0 %v7947_v6  ;;  %542 = vmatprep.mubr.f32.mxu1 %v7947_v6  ;;  %v5545_v23 = vld [vmem:[%s5408_s7 + $0x58] sm:$0xff]  ;;  %v5554_v24 = vld [vmem:[%s5408_s7 + $0x60] sm:$0xff]  ;;  %v5563_v25 = vld [vmem:[%s5408_s7 + $0x68] sm:$0xff] }
  0x32   : > { %4322 = vmatmul.mubr.msk.f32.gmra.mxu0 %vm262_vm0, %v5447_v11  ;;  %4338 = vmatmul.mubr.msk.f32.gmra.mxu1 %vm262_vm0, %v5447_v11  ;;  %v5572_v26 = vld [vmem:[%s5408_s7 + $0x70] sm:$0xff]  ;;  %v5581_v27 = vld [vmem:[%s5408_s7 + $0x78] sm:$0xff]  ;;  %v250_v28 = vld [vmem:[%s7940_s1 + $0x40] sm:$0xff] }
  0x33   : > { %387 = vmatprep.mubr.f32.mxu0 %v7947_v6  ;;  %548 = vmatprep.mubr.f32.mxu1 %v7947_v6  ;;  %8205 = vst [vmem:[#allocation6_spill] sm:$0xff] %v5572_v26  ;;  %8206 = vst [vmem:[#allocation7_spill] sm:$0xff] %v5581_v27  ;;  %v252_v29 = vld [vmem:[%s7940_s1 + $0x50] sm:$0xff]  ;;  %v255_v30 = vld [vmem:[%s7940_s1 + $0x68] sm:$0xff] }
  0x34   : > { %985 = vmatprep.subr.mxu0 %v251_v12  ;;  %1146 = vmatprep.subr.mxu1 %v253_v13  ;;  %v257_v31 = vld [vmem:[%s7940_s1 + $0x78] sm:$0xff]  ;;  %v254_v32 = vld [vmem:[%s7940_s1 + $0x60] sm:$0xff]  ;;  %v256_v33 = vld [vmem:[%s7940_s1 + $0x70] sm:$0xff] }
  0x35   : > { %v259_v34 = vld [vmem:[%s7940_s1 + $0x88] sm:$0xff]  ;;  %v261_v35 = vld [vmem:[%s7940_s1 + $0x98] sm:$0xff]  ;;  %v258_v36 = vld [vmem:[%s7940_s1 + $0x80] sm:$0xff] }
  0x36   : > { %4323 = vmatmul.mubr.msk.f32.gmra.mxu0 %vm262_vm0, %v5464_v14  ;;  %4339 = vmatmul.mubr.msk.f32.gmra.mxu1 %vm262_vm0, %v5464_v14  ;;  %v260_v37 = vld [vmem:[%s7940_s1 + $0x90] sm:$0xff] }
  0x37   : > { %393 = vmatprep.mubr.f32.mxu0 %v7947_v6  ;;  %554 = vmatprep.mubr.f32.mxu1 %v7947_v6 }
  0x3a   : > { %4324 = vmatmul.mubr.msk.f32.gmra.mxu0 %vm262_vm0, %v5473_v15  ;;  %4340 = vmatmul.mubr.msk.f32.gmra.mxu1 %vm262_vm0, %v5473_v15 }
  0x3b   : > { %399 = vmatprep.mubr.f32.mxu0 %v7947_v6  ;;  %560 = vmatprep.mubr.f32.mxu1 %v7947_v6 }
  0x3e   : > { %4325 = vmatmul.mubr.msk.f32.gmra.mxu0 %vm262_vm0, %v5482_v16  ;;  %4341 = vmatmul.mubr.msk.f32.gmra.mxu1 %vm262_vm0, %v5482_v16 }
  0x3f   : > { %405 = vmatprep.mubr.f32.mxu0 %v7947_v6  ;;  %566 = vmatprep.mubr.f32.mxu1 %v7947_v6 }
  0x42   : > { %4326 = vmatmul.mubr.msk.f32.gmra.mxu0 %vm262_vm0, %v5491_v17  ;;  %4342 = vmatmul.mubr.msk.f32.gmra.mxu1 %vm262_vm0, %v5491_v17 }
  0x43   : > { %411 = vmatprep.mubr.f32.mxu0 %v7947_v6  ;;  %572 = vmatprep.mubr.f32.mxu1 %v7947_v6 }
  0x46   : > { %4327 = vmatmul.mubr.msk.f32.gmra.mxu0 %vm262_vm0, %v5500_v18  ;;  %4343 = vmatmul.mubr.msk.f32.gmra.mxu1 %vm262_vm0, %v5500_v18 }
  0x47   : > { %417 = vmatprep.mubr.f32.mxu0 %v7947_v6  ;;  %578 = vmatprep.mubr.f32.mxu1 %v7947_v6 }
  0x4a   : > { %4328 = vmatmul.mubr.msk.f32.gmra.mxu0 %vm262_vm0, %v5509_v19  ;;  %4344 = vmatmul.mubr.msk.f32.gmra.mxu1 %vm262_vm0, %v5509_v19 }
  0x4b   : > { %423 = vmatprep.mubr.f32.mxu0 %v7947_v6  ;;  %584 = vmatprep.mubr.f32.mxu1 %v7947_v6 }
  0x4e   : > { %4329 = vmatmul.mubr.msk.f32.gmra.mxu0 %vm262_vm0, %v5518_v20  ;;  %4345 = vmatmul.mubr.msk.f32.gmra.mxu1 %vm262_vm0, %v5518_v20 }
  0x4f   : > { %429 = vmatprep.mubr.f32.mxu0 %v7947_v6  ;;  %590 = vmatprep.mubr.f32.mxu1 %v7947_v6 }
  0x52   : > { %4330 = vmatmul.mubr.msk.f32.gmra.mxu0 %vm262_vm0, %v5527_v21  ;;  %4346 = vmatmul.mubr.msk.f32.gmra.mxu1 %vm262_vm0, %v5527_v21 }
  0x53   : > { %435 = vmatprep.mubr.f32.mxu0 %v7947_v6  ;;  %596 = vmatprep.mubr.f32.mxu1 %v7947_v6 }
  0x56   : > { %4331 = vmatmul.mubr.msk.f32.gmra.mxu0 %vm262_vm0, %v5536_v22  ;;  %4347 = vmatmul.mubr.msk.f32.gmra.mxu1 %vm262_vm0, %v5536_v22 }
  0x57   : > { %441 = vmatprep.mubr.f32.mxu0 %v7947_v6  ;;  %602 = vmatprep.mubr.f32.mxu1 %v7947_v6 }
  0x5a   : > { %4332 = vmatmul.mubr.msk.f32.gmra.mxu0 %vm262_vm0, %v5545_v23  ;;  %4348 = vmatmul.mubr.msk.f32.gmra.mxu1 %vm262_vm0, %v5545_v23 }
  0x5b   : > { %447 = vmatprep.mubr.f32.mxu0 %v7947_v6  ;;  %608 = vmatprep.mubr.f32.mxu1 %v7947_v6 }
  0x5e   : > { %4333 = vmatmul.mubr.msk.f32.gmra.mxu0 %vm262_vm0, %v5554_v24  ;;  %4349 = vmatmul.mubr.msk.f32.gmra.mxu1 %vm262_vm0, %v5554_v24 }
  0x5f   : > { %453 = vmatprep.mubr.f32.mxu0 %v7947_v6  ;;  %614 = vmatprep.mubr.f32.mxu1 %v7947_v6 }
  0x62   : > { %4334 = vmatmul.mubr.msk.f32.gmra.mxu0 %vm262_vm0, %v5563_v25  ;;  %4350 = vmatmul.mubr.msk.f32.gmra.mxu1 %vm262_vm0, %v5563_v25 }
  0x63   : > { %459 = vmatprep.mubr.f32.mxu0 %v7947_v6  ;;  %620 = vmatprep.mubr.f32.mxu1 %v7947_v6 }
  0x66   : > { %4335 = vmatmul.mubr.msk.f32.gmra.mxu0 %vm262_vm0, %v5572_v26  ;;  %4351 = vmatmul.mubr.msk.f32.gmra.mxu1 %vm262_vm0, %v5572_v26 }
  0x67   : > { %465 = vmatprep.mubr.f32.mxu0 %v7947_v6  ;;  %626 = vmatprep.mubr.f32.mxu1 %v7947_v6 }
  0x6a   : > { %4336 = vmatmul.mubr.msk.f32.gmra.mxu0 %vm262_vm0, %v5581_v27  ;;  %4352 = vmatmul.mubr.msk.f32.gmra.mxu1 %vm262_vm0, %v5581_v27 }
  0x6b   : > { %697 = vmatprep.mubr.f32.mxu0 %v7947_v6  ;;  %858 = vmatprep.mubr.f32.mxu1 %v7947_v6 }
  0x6e   : > { %4353 = vmatmul.mubr.msk.f32.vlgmr.msra.gmra.mxu0 %vm262_vm0, %v5426_v5  ;;  %4369 = vmatmul.mubr.msk.f32.vlgmr.msra.gmra.mxu1 %vm262_vm0, %v5426_v5 }
  0x6f   : > { %986 = vmatpush1.msra.mxu0 %v250_v28  ;;  %1147 = vmatpush1.msra.mxu1 %v252_v29 }
  0x70   : > { %703 = vmatprep.mubr.f32.mxu0 %v7947_v6  ;;  %864 = vmatprep.mubr.f32.mxu1 %v7947_v6 }
  0x71   : > { %1307 = vmatprep.subr.mxu0 %v255_v30  ;;  %1468 = vmatprep.subr.mxu1 %v257_v31 }
  0x72   : > { %4354 = vmatmul.mubr.msk.f32.gmra.mxu0 %vm262_vm0, %v5447_v11  ;;  %4370 = vmatmul.mubr.msk.f32.gmra.mxu1 %vm262_vm0, %v5447_v11 }
  0x73   : > { %709 = vmatprep.mubr.f32.mxu0 %v7947_v6  ;;  %870 = vmatprep.mubr.f32.mxu1 %v7947_v6 }
  0x76   : > { %4355 = vmatmul.mubr.msk.f32.gmra.mxu0 %vm262_vm0, %v5464_v14  ;;  %4371 = vmatmul.mubr.msk.f32.gmra.mxu1 %vm262_vm0, %v5464_v14 }
  0x77   : > { %715 = vmatprep.mubr.f32.mxu0 %v7947_v6  ;;  %876 = vmatprep.mubr.f32.mxu1 %v7947_v6 }
  0x7a   : > { %4356 = vmatmul.mubr.msk.f32.gmra.mxu0 %vm262_vm0, %v5473_v15  ;;  %4372 = vmatmul.mubr.msk.f32.gmra.mxu1 %vm262_vm0, %v5473_v15 }
  0x7b   : > { %721 = vmatprep.mubr.f32.mxu0 %v7947_v6  ;;  %882 = vmatprep.mubr.f32.mxu1 %v7947_v6 }
  0x7e   : > { %4357 = vmatmul.mubr.msk.f32.gmra.mxu0 %vm262_vm0, %v5482_v16  ;;  %4373 = vmatmul.mubr.msk.f32.gmra.mxu1 %vm262_vm0, %v5482_v16 }
  0x7f   : > { %727 = vmatprep.mubr.f32.mxu0 %v7947_v6  ;;  %888 = vmatprep.mubr.f32.mxu1 %v7947_v6 }
  0x82   : > { %4358 = vmatmul.mubr.msk.f32.gmra.mxu0 %vm262_vm0, %v5491_v17  ;;  %4374 = vmatmul.mubr.msk.f32.gmra.mxu1 %vm262_vm0, %v5491_v17 }
  0x83   : > { %733 = vmatprep.mubr.f32.mxu0 %v7947_v6  ;;  %894 = vmatprep.mubr.f32.mxu1 %v7947_v6 }
  0x86   : > { %4359 = vmatmul.mubr.msk.f32.gmra.mxu0 %vm262_vm0, %v5500_v18  ;;  %4375 = vmatmul.mubr.msk.f32.gmra.mxu1 %vm262_vm0, %v5500_v18 }
  0x87   : > { %739 = vmatprep.mubr.f32.mxu0 %v7947_v6  ;;  %900 = vmatprep.mubr.f32.mxu1 %v7947_v6 }
  0x8a   : > { %4360 = vmatmul.mubr.msk.f32.gmra.mxu0 %vm262_vm0, %v5509_v19  ;;  %4376 = vmatmul.mubr.msk.f32.gmra.mxu1 %vm262_vm0, %v5509_v19 }
  0x8b   : > { %745 = vmatprep.mubr.f32.mxu0 %v7947_v6  ;;  %906 = vmatprep.mubr.f32.mxu1 %v7947_v6 }
  0x8e   : > { %4361 = vmatmul.mubr.msk.f32.gmra.mxu0 %vm262_vm0, %v5518_v20  ;;  %4377 = vmatmul.mubr.msk.f32.gmra.mxu1 %vm262_vm0, %v5518_v20 }
  0x8f   : > { %751 = vmatprep.mubr.f32.mxu0 %v7947_v6  ;;  %912 = vmatprep.mubr.f32.mxu1 %v7947_v6 }
  0x92   : > { %4362 = vmatmul.mubr.msk.f32.gmra.mxu0 %vm262_vm0, %v5527_v21  ;;  %4378 = vmatmul.mubr.msk.f32.gmra.mxu1 %vm262_vm0, %v5527_v21 }
  0x93   : > { %757 = vmatprep.mubr.f32.mxu0 %v7947_v6  ;;  %918 = vmatprep.mubr.f32.mxu1 %v7947_v6 }
  0x96   : > { %4363 = vmatmul.mubr.msk.f32.gmra.mxu0 %vm262_vm0, %v5536_v22  ;;  %4379 = vmatmul.mubr.msk.f32.gmra.mxu1 %vm262_vm0, %v5536_v22 }
  0x97   : > { %763 = vmatprep.mubr.f32.mxu0 %v7947_v6  ;;  %924 = vmatprep.mubr.f32.mxu1 %v7947_v6 }
  0x9a   : > { %4364 = vmatmul.mubr.msk.f32.gmra.mxu0 %vm262_vm0, %v5545_v23  ;;  %4380 = vmatmul.mubr.msk.f32.gmra.mxu1 %vm262_vm0, %v5545_v23 }
  0x9b   : > { %769 = vmatprep.mubr.f32.mxu0 %v7947_v6  ;;  %930 = vmatprep.mubr.f32.mxu1 %v7947_v6 }
  0x9e   : > { %4365 = vmatmul.mubr.msk.f32.gmra.mxu0 %vm262_vm0, %v5554_v24  ;;  %4381 = vmatmul.mubr.msk.f32.gmra.mxu1 %vm262_vm0, %v5554_v24 }
  0x9f   : > { %775 = vmatprep.mubr.f32.mxu0 %v7947_v6  ;;  %936 = vmatprep.mubr.f32.mxu1 %v7947_v6 }
  0xa2   : > { %4366 = vmatmul.mubr.msk.f32.gmra.mxu0 %vm262_vm0, %v5563_v25  ;;  %4382 = vmatmul.mubr.msk.f32.gmra.mxu1 %vm262_vm0, %v5563_v25 }
  0xa3   : > { %781 = vmatprep.mubr.f32.mxu0 %v7947_v6  ;;  %942 = vmatprep.mubr.f32.mxu1 %v7947_v6 }
  0xa6   : > { %4367 = vmatmul.mubr.msk.f32.gmra.mxu0 %vm262_vm0, %v5572_v26  ;;  %4383 = vmatmul.mubr.msk.f32.gmra.mxu1 %vm262_vm0, %v5572_v26 }
  0xa7   : > { %787 = vmatprep.mubr.f32.mxu0 %v7947_v6  ;;  %948 = vmatprep.mubr.f32.mxu1 %v7947_v6 }
  0xaa   : > { %4368 = vmatmul.mubr.msk.f32.gmra.mxu0 %vm262_vm0, %v5581_v27  ;;  %4384 = vmatmul.mubr.msk.f32.gmra.mxu1 %vm262_vm0, %v5581_v27 }
  0xab   : > { %1019 = vmatprep.mubr.f32.mxu0 %v7947_v6  ;;  %1180 = vmatprep.mubr.f32.mxu1 %v7947_v6 }
  0xae   : > { %4385 = vmatmul.mubr.msk.f32.vlgmr.msra.gmra.mxu0 %vm262_vm0, %v5426_v5  ;;  %4401 = vmatmul.mubr.msk.f32.vlgmr.msra.gmra.mxu1 %vm262_vm0, %v5426_v5 }
  0xaf   : > { %1308 = vmatpush1.msra.mxu0 %v254_v32  ;;  %1469 = vmatpush1.msra.mxu1 %v256_v33 }
  0xb0   : > { %1025 = vmatprep.mubr.f32.mxu0 %v7947_v6  ;;  %1186 = vmatprep.mubr.f32.mxu1 %v7947_v6 }
  0xb1   : > { %1629 = vmatprep.subr.mxu0 %v259_v34  ;;  %1790 = vmatprep.subr.mxu1 %v261_v35 }
  0xb2   : > { %4386 = vmatmul.mubr.msk.f32.gmra.mxu0 %vm262_vm0, %v5447_v11  ;;  %4402 = vmatmul.mubr.msk.f32.gmra.mxu1 %vm262_vm0, %v5447_v11 }
  0xb3   : > { %1031 = vmatprep.mubr.f32.mxu0 %v7947_v6  ;;  %1192 = vmatprep.mubr.f32.mxu1 %v7947_v6 }
  0xb6   : > { %4387 = vmatmul.mubr.msk.f32.gmra.mxu0 %vm262_vm0, %v5464_v14  ;;  %4403 = vmatmul.mubr.msk.f32.gmra.mxu1 %vm262_vm0, %v5464_v14 }
  0xb7   : > { %1037 = vmatprep.mubr.f32.mxu0 %v7947_v6  ;;  %1198 = vmatprep.mubr.f32.mxu1 %v7947_v6 }
  0xba   : > { %4388 = vmatmul.mubr.msk.f32.gmra.mxu0 %vm262_vm0, %v5473_v15  ;;  %4404 = vmatmul.mubr.msk.f32.gmra.mxu1 %vm262_vm0, %v5473_v15 }
  0xbb   : > { %1043 = vmatprep.mubr.f32.mxu0 %v7947_v6  ;;  %1204 = vmatprep.mubr.f32.mxu1 %v7947_v6 }
  0xbe   : > { %4389 = vmatmul.mubr.msk.f32.gmra.mxu0 %vm262_vm0, %v5482_v16  ;;  %4405 = vmatmul.mubr.msk.f32.gmra.mxu1 %vm262_vm0, %v5482_v16 }
  0xbf   : > { %1049 = vmatprep.mubr.f32.mxu0 %v7947_v6  ;;  %1210 = vmatprep.mubr.f32.mxu1 %v7947_v6 }
  0xc2   : > { %4390 = vmatmul.mubr.msk.f32.gmra.mxu0 %vm262_vm0, %v5491_v17  ;;  %4406 = vmatmul.mubr.msk.f32.gmra.mxu1 %vm262_vm0, %v5491_v17 }
  0xc3   : > { %1055 = vmatprep.mubr.f32.mxu0 %v7947_v6  ;;  %1216 = vmatprep.mubr.f32.mxu1 %v7947_v6 }
  0xc6   : > { %4391 = vmatmul.mubr.msk.f32.gmra.mxu0 %vm262_vm0, %v5500_v18  ;;  %4407 = vmatmul.mubr.msk.f32.gmra.mxu1 %vm262_vm0, %v5500_v18 }
  0xc7   : > { %1061 = vmatprep.mubr.f32.mxu0 %v7947_v6  ;;  %1222 = vmatprep.mubr.f32.mxu1 %v7947_v6 }
  0xca   : > { %4392 = vmatmul.mubr.msk.f32.gmra.mxu0 %vm262_vm0, %v5509_v19  ;;  %4408 = vmatmul.mubr.msk.f32.gmra.mxu1 %vm262_vm0, %v5509_v19 }
  0xcb   : > { %1067 = vmatprep.mubr.f32.mxu0 %v7947_v6  ;;  %1228 = vmatprep.mubr.f32.mxu1 %v7947_v6 }
  0xce   : > { %4393 = vmatmul.mubr.msk.f32.gmra.mxu0 %vm262_vm0, %v5518_v20  ;;  %4409 = vmatmul.mubr.msk.f32.gmra.mxu1 %vm262_vm0, %v5518_v20 }
  0xcf   : > { %1073 = vmatprep.mubr.f32.mxu0 %v7947_v6  ;;  %1234 = vmatprep.mubr.f32.mxu1 %v7947_v6 }
  0xd2   : > { %4394 = vmatmul.mubr.msk.f32.gmra.mxu0 %vm262_vm0, %v5527_v21  ;;  %4410 = vmatmul.mubr.msk.f32.gmra.mxu1 %vm262_vm0, %v5527_v21 }
  0xd3   : > { %1079 = vmatprep.mubr.f32.mxu0 %v7947_v6  ;;  %1240 = vmatprep.mubr.f32.mxu1 %v7947_v6 }
  0xd6   : > { %4395 = vmatmul.mubr.msk.f32.gmra.mxu0 %vm262_vm0, %v5536_v22  ;;  %4411 = vmatmul.mubr.msk.f32.gmra.mxu1 %vm262_vm0, %v5536_v22 }
  0xd7   : > { %1085 = vmatprep.mubr.f32.mxu0 %v7947_v6  ;;  %1246 = vmatprep.mubr.f32.mxu1 %v7947_v6 }
  0xda   : > { %4396 = vmatmul.mubr.msk.f32.gmra.mxu0 %vm262_vm0, %v5545_v23  ;;  %4412 = vmatmul.mubr.msk.f32.gmra.mxu1 %vm262_vm0, %v5545_v23 }
  0xdb   : > { %1091 = vmatprep.mubr.f32.mxu0 %v7947_v6  ;;  %1252 = vmatprep.mubr.f32.mxu1 %v7947_v6 }
  0xde   : > { %4397 = vmatmul.mubr.msk.f32.gmra.mxu0 %vm262_vm0, %v5554_v24  ;;  %4413 = vmatmul.mubr.msk.f32.gmra.mxu1 %vm262_vm0, %v5554_v24 }
  0xdf   : > { %1097 = vmatprep.mubr.f32.mxu0 %v7947_v6  ;;  %1258 = vmatprep.mubr.f32.mxu1 %v7947_v6 }
  0xe2   : > { %4398 = vmatmul.mubr.msk.f32.gmra.mxu0 %vm262_vm0, %v5563_v25  ;;  %4414 = vmatmul.mubr.msk.f32.gmra.mxu1 %vm262_vm0, %v5563_v25 }
  0xe3   : > { %1103 = vmatprep.mubr.f32.mxu0 %v7947_v6  ;;  %1264 = vmatprep.mubr.f32.mxu1 %v7947_v6 }
  0xe6   : > { %4399 = vmatmul.mubr.msk.f32.gmra.mxu0 %vm262_vm0, %v5572_v26  ;;  %4415 = vmatmul.mubr.msk.f32.gmra.mxu1 %vm262_vm0, %v5572_v26 }
  0xe7   : > { %1109 = vmatprep.mubr.f32.mxu0 %v7947_v6  ;;  %1270 = vmatprep.mubr.f32.mxu1 %v7947_v6 }
  0xea   : > { %4400 = vmatmul.mubr.msk.f32.gmra.mxu0 %vm262_vm0, %v5581_v27  ;;  %4416 = vmatmul.mubr.msk.f32.gmra.mxu1 %vm262_vm0, %v5581_v27 }
  0xeb   : > { %1341 = vmatprep.mubr.f32.mxu0 %v7947_v6  ;;  %1502 = vmatprep.mubr.f32.mxu1 %v7947_v6 }
  0xee   : > { %v5811_v38 = vpop.f32.mrf.mxu0  ;;  %v5813_v39 = vpop.f32.mrf.mxu1  ;;  %4417 = vmatmul.mubr.msk.f32.vlgmr.msra.gmra.mxu0 %vm262_vm0, %v5426_v5  ;;  %4433 = vmatmul.mubr.msk.f32.vlgmr.msra.gmra.mxu1 %vm262_vm0, %v5426_v5 }
  0xef   : > { %v1921_v40 = vmul.f32 0.5, %v5811_v38  ;;  %v1923_v41 = vmul.f32 0.5, %v5813_v39  ;;  %1630 = vmatpush1.msra.mxu0 %v258_v36  ;;  %1791 = vmatpush1.msra.mxu1 %v260_v37 }
  0xf0   : > { %v5821_v42 = vpop.f32.mrf.mxu0  ;;  %v5823_v43 = vpop.f32.mrf.mxu1  ;;  %1347 = vmatprep.mubr.f32.mxu0 %v7947_v6  ;;  %1508 = vmatprep.mubr.f32.mxu1 %v7947_v6 }
  0xf1   : > { %4561 = vtanh.f32 %v1921_v40  ;;  %v1922_v44 = vmul.f32 0.5, %v5821_v42  ;;  %v1924_v45 = vmul.f32 0.5, %v5823_v43 }
  0xf2   : > { %4563 = vtanh.f32 %v1923_v41  ;;  %v5829_v46 = vpop.f32.mrf.mxu0  ;;  %v5831_v47 = vpop.f32.mrf.mxu1  ;;  %4418 = vmatmul.mubr.msk.f32.gmra.mxu0 %vm262_vm0, %v5447_v11  ;;  %4434 = vmatmul.mubr.msk.f32.gmra.mxu1 %vm262_vm0, %v5447_v11 }
  0xf3   : > { %4565 = vtanh.f32 %v1922_v44  ;;  %v1941_v48 = vmul.f32 0.5, %v5829_v46  ;;  %v1943_v49 = vmul.f32 0.5, %v5831_v47  ;;  %1353 = vmatprep.mubr.f32.mxu0 %v7947_v6  ;;  %1514 = vmatprep.mubr.f32.mxu1 %v7947_v6 }
  0xf4   : > { %4567 = vtanh.f32 %v1924_v45  ;;  %v5841_v50 = vpop.f32.mrf.mxu0  ;;  %v5843_v51 = vpop.f32.mrf.mxu1 }
  0xf5   : > { %4569 = vtanh.f32 %v1941_v48  ;;  %v1942_v52 = vmul.f32 0.5, %v5841_v50  ;;  %v1944_v53 = vmul.f32 0.5, %v5843_v51 }
  0xf6   : > { %4571 = vtanh.f32 %v1943_v49  ;;  %v5847_v54 = vpop.f32.mrf.mxu0  ;;  %v5849_v55 = vpop.f32.mrf.mxu1  ;;  %4419 = vmatmul.mubr.msk.f32.gmra.mxu0 %vm262_vm0, %v5464_v14  ;;  %4435 = vmatmul.mubr.msk.f32.gmra.mxu1 %vm262_vm0, %v5464_v14 }
  0xf7   : > { %4573 = vtanh.f32 %v1942_v52  ;;  %v1961_v56 = vmul.f32 0.5, %v5847_v54  ;;  %v1963_v57 = vmul.f32 0.5, %v5849_v55  ;;  %1359 = vmatprep.mubr.f32.mxu0 %v7947_v6  ;;  %1520 = vmatprep.mubr.f32.mxu1 %v7947_v6 }
  0xf8   : > { %4575 = vtanh.f32 %v1944_v53  ;;  %v5859_v58 = vpop.f32.mrf.mxu0  ;;  %v5861_v59 = vpop.f32.mrf.mxu1 }
  0xf9   : > { %4577 = vtanh.f32 %v1961_v56  ;;  %v1962_v60 = vmul.f32 0.5, %v5859_v58  ;;  %v1964_v61 = vmul.f32 0.5, %v5861_v59 }
  0xfa   : > { %4579 = vtanh.f32 %v1963_v57  ;;  %v5865_v62 = vpop.f32.mrf.mxu0  ;;  %v5867_v63 = vpop.f32.mrf.mxu1  ;;  %4420 = vmatmul.mubr.msk.f32.gmra.mxu0 %vm262_vm0, %v5473_v15  ;;  %4436 = vmatmul.mubr.msk.f32.gmra.mxu1 %vm262_vm0, %v5473_v15 }
  0xfb   : > { %4581 = vtanh.f32 %v1962_v60  ;;  %1365 = vmatprep.mubr.f32.mxu0 %v7947_v6  ;;  %1526 = vmatprep.mubr.f32.mxu1 %v7947_v6  ;;  %v1981_v0 = vmul.f32 0.5, %v5865_v62  ;;  %v1983_v4 = vmul.f32 0.5, %v5867_v63 }
  0xfc   : > { %v5876_v1 = vpop.f32.mrf.mxu0  ;;  %v5878_v2 = vpop.f32.mrf.mxu1  ;;  %4583 = vtanh.f32 %v1964_v61 }
  0xfd   : > { %4585 = vtanh.f32 %v1981_v0  ;;  %v1982_v13 = vmul.f32 0.5, %v5876_v1  ;;  %v1984_v15 = vmul.f32 0.5, %v5878_v2 }
  0xfe   : > { %v4562_v3 = vpop.eup %4561  ;;  %v5881_v5 = vpop.f32.mrf.mxu0  ;;  %4421 = vmatmul.mubr.msk.f32.gmra.mxu0 %vm262_vm0, %v5482_v16  ;;  %4437 = vmatmul.mubr.msk.f32.gmra.mxu1 %vm262_vm0, %v5482_v16  ;;  %4587 = vtanh.f32 %v1983_v4 }
  0xff   : > { %v5883_v7 = vpop.f32.mrf.mxu1  ;;  %v4564_v8 = vpop.eup %4563  ;;  %1371 = vmatprep.mubr.f32.mxu0 %v7947_v6  ;;  %1532 = vmatprep.mubr.f32.mxu1 %v7947_v6  ;;  %v2001_v31 = vmul.f32 0.5, %v5881_v5  ;;  %4589 = vtanh.f32 %v1982_v13  ;;  %v2561_v41 = vmul.f32 0.5, %v4562_v3 }
 0x100   : > { %v4566_v9 = vpop.eup %4565  ;;  %v5891_v10 = vpop.f32.mrf.mxu0  ;;  %4591 = vtanh.f32 %v1984_v15  ;;  %v2003_v36 = vmul.f32 0.5, %v5883_v7  ;;  %v2563_v49 = vmul.f32 0.5, %v4564_v8 }
 0x101   : > { %v5893_v11 = vpop.f32.mrf.mxu1  ;;  %v4568_v12 = vpop.eup %4567  ;;  %v2002_v45 = vmul.f32 0.5, %v5891_v10  ;;  %4593 = vtanh.f32 %v2001_v31  ;;  %v2562_v3 = vmul.f32 0.5, %v4566_v9  ;;  %v2881_v9 = vadd.f32 0.5, %v2561_v41 }
 0x102   : > { %v4570_v14 = vpop.eup %4569  ;;  %v5897_v28 = vpop.f32.mrf.mxu0  ;;  %4422 = vmatmul.mubr.msk.f32.gmra.mxu0 %vm262_vm0, %v5491_v17  ;;  %4438 = vmatmul.mubr.msk.f32.gmra.mxu1 %vm262_vm0, %v5491_v17  ;;  %v2004_v53 = vmul.f32 0.5, %v5893_v11  ;;  %4595 = vtanh.f32 %v2003_v36 }
 0x103   : > { %v5899_v16 = vpop.f32.mrf.mxu1  ;;  %v4572_v29 = vpop.eup %4571  ;;  %1377 = vmatprep.mubr.f32.mxu0 %v7947_v6  ;;  %1538 = vmatprep.mubr.f32.mxu1 %v7947_v6  ;;  %v2581_v44 = vmul.f32 0.5, %v4570_v14  ;;  %v2021_v0 = vmul.f32 0.5, %v5897_v28  ;;  %4597 = vtanh.f32 %v2002_v45 }
 0x104   : > { %8207 = vst [vmem:[#allocation8_spill] sm:$0xff] %v5899_v16  ;;  %v4574_v30 = vpop.eup %4573  ;;  %v5908_v32 = vpop.f32.mrf.mxu0  ;;  %v2583_v52 = vmul.f32 0.5, %v4572_v29  ;;  %v2023_v13 = vmul.f32 0.5, %v5899_v16  ;;  %v2564_v29 = vmul.f32 0.5, %v4568_v12  ;;  %4599 = vtanh.f32 %v2004_v53 }
 0x105   : > { %v5910_v33 = vpop.f32.mrf.mxu1  ;;  %v4576_v34 = vpop.eup %4575  ;;  %4601 = vtanh.f32 %v2021_v0  ;;  %v2882_v12 = vadd.f32 0.5, %v2562_v3 }
 0x106   : > { %v4578_v35 = vpop.eup %4577  ;;  %v5913_v37 = vpop.f32.mrf.mxu0  ;;  %4423 = vmatmul.mubr.msk.f32.gmra.mxu0 %vm262_vm0, %v5500_v18  ;;  %4439 = vmatmul.mubr.msk.f32.gmra.mxu1 %vm262_vm0, %v5500_v18  ;;  %v2582_v18 = vmul.f32 0.5, %v4574_v30  ;;  %v2584_v60 = vmul.f32 0.5, %v4576_v34  ;;  %v2901_v30 = vadd.f32 0.5, %v2581_v44  ;;  %v2883_v34 = vadd.f32 0.5, %v2563_v49 }
 0x107   : > { %v5915_v17 = vpop.f32.mrf.mxu1  ;;  %v4580_v40 = vpop.eup %4579  ;;  %1383 = vmatprep.mubr.f32.mxu0 %v7947_v6  ;;  %1544 = vmatprep.mubr.f32.mxu1 %v7947_v6  ;;  %v2601_v61 = vmul.f32 0.5, %v4578_v35  ;;  %v2903_v35 = vadd.f32 0.5, %v2583_v52  ;;  %4603 = vtanh.f32 %v2023_v13  ;;  %v2884_v49 = vadd.f32 0.5, %v2564_v29 }
 0x108   : > { %v4582_v48 = vpop.eup %4581  ;;  %v5925_v56 = vpop.f32.mrf.mxu0  ;;  %v2603_v4 = vmul.f32 0.5, %v4580_v40  ;;  %v2902_v26 = vadd.f32 0.5, %v2582_v18  ;;  %v3221_v52 = vmul.f32 %v2901_v30, %v5829_v46  ;;  %v8208_v18 = vmov 0.0  }
 0x109   : > { %v5927_v57 = vpop.f32.mrf.mxu1  ;;  %v4584_v15 = vpop.eup %4583  ;;  %v2602_v31 = vmul.f32 0.5, %v4582_v48  ;;  %v2921_v16 = vadd.f32 0.5, %v2601_v61  ;;  %v3223_v61 = vmul.f32 %v2903_v35, %v5831_v47  ;;  %v3202_v30 = vmul.f32 %v2882_v12, %v5821_v42 }
 0x10a   : > { %v5931_v14 = vpop.f32.mrf.mxu0  ;;  %4424 = vmatmul.mubr.msk.f32.gmra.mxu0 %vm262_vm0, %v5509_v19  ;;  %4440 = vmatmul.mubr.msk.f32.gmra.mxu1 %vm262_vm0, %v5509_v19  ;;  %v4586_v27 = vpop.eup %4585  ;;  %v2904_v19 = vadd.f32 0.5, %v2584_v60  ;;  %v2923_v44 = vadd.f32 0.5, %v2603_v4  ;;  %v2604_v45 = vmul.f32 0.5, %v4584_v15  ;;  %v3201_v60 = vmul.f32 %v2881_v9, %v5811_v38 }
 0x10b   : > { %v5933_v8 = vpop.f32.mrf.mxu1  ;;  %1389 = vmatprep.mubr.f32.mxu0 %v7947_v6  ;;  %1550 = vmatprep.mubr.f32.mxu1 %v7947_v6  ;;  %v4588_v41 = vpop.eup %4587  ;;  %v2922_v53 = vadd.f32 0.5, %v2602_v31  ;;  %v2621_v0 = vmul.f32 0.5, %v4586_v27  ;;  %v3222_v13 = vmul.f32 %v2902_v26, %v5841_v50  ;;  %v3241_v15 = vmul.f32 %v2921_v16, %v5847_v54 }
 0x10c   : > { %v5941_v36 = vpop.f32.mrf.mxu0  ;;  %v3224_v46 = vmul.f32 %v2904_v19, %v5843_v51  ;;  %v4590_v29 = vpop.eup %4589  ;;  %v3243_v38 = vmul.f32 %v2923_v44, %v5849_v55  ;;  %v2924_v31 = vadd.f32 0.5, %v2604_v45  ;;  %v2623_v47 = vmul.f32 0.5, %v4588_v41 }
 0x10d   : > { %v5943_v40 = vpop.f32.mrf.mxu1  ;;  %v4592_v26 = vpop.eup %4591  ;;  %v3541_v50 = vadd.f32 %v3221_v52, %v3201_v60  ;;  %v3242_v42 = vmul.f32 %v2922_v53, %v5859_v58  ;;  %v2022_v51 = vmul.f32 0.5, %v5908_v32  ;;  %v2941_v55 = vadd.f32 0.5, %v2621_v0 }
 0x10e   : > { %v5945_v48 = vpop.f32.mrf.mxu0  ;;  %4425 = vmatmul.mubr.msk.f32.gmra.mxu0 %vm262_vm0, %v5518_v20  ;;  %4441 = vmatmul.mubr.msk.f32.gmra.mxu1 %vm262_vm0, %v5518_v20  ;;  %v3203_v20 = vmul.f32 %v2883_v34, %v5813_v39  ;;  %v3204_v39 = vmul.f32 %v2884_v49, %v5823_v43  ;;  %v2024_v16 = vmul.f32 0.5, %v5910_v33  ;;  %v3556_v19 = vadd.f32 %v3222_v13, %v3202_v30 }
 0x10f   : > { %v5947_v6 = vpop.f32.mrf.mxu1  ;;  %1395 = vmatprep.mubr.f32.mxu0 %v8208_v18  ;;  %1556 = vmatprep.mubr.f32.mxu1 %v8208_v18  ;;  %v3542_v12 = vadd.f32 %v3541_v50, %v3241_v15  ;;  %v2622_v44 = vmul.f32 0.5, %v4590_v29  ;;  %v3244_v45 = vmul.f32 %v2924_v31, %v5861_v59  ;;  %v2943_v41 = vadd.f32 0.5, %v2623_v47 }
 0x110   : > { %v5958_v3 = vpop.f32.mrf.mxu0  ;;  %v3571_v54 = vadd.f32 %v3223_v61, %v3203_v20  ;;  %v3586_v43 = vadd.f32 %v3224_v46, %v3204_v39  ;;  %v2624_v49 = vmul.f32 0.5, %v4592_v26  ;;  %v5997_v61 = vadd.f32 %v3556_v19, %v3242_v42 }
 0x111   : > { %v5960_v4 = vpop.f32.mrf.mxu1  ;;  %4605 = vtanh.f32 %v2022_v51  ;;  %v2041_v0 = vmul.f32 0.5, %v5913_v37  ;;  %v2043_v59 = vmul.f32 0.5, %v5915_v17  ;;  %v3261_v13 = vmul.f32 %v2941_v55, %v5865_v62 }
 0x112   : > { %v5968_v27 = vpop.f32.mrf.mxu0  ;;  %4426 = vmatmul.mubr.msk.f32.gmra.mxu0 %vm262_vm0, %v5527_v21  ;;  %4442 = vmatmul.mubr.msk.f32.gmra.mxu1 %vm262_vm0, %v5527_v21  ;;  %v4594_v21 = vpop.eup %4593  ;;  %v5986_v58 = vadd.f32 %v3571_v54, %v3243_v38  ;;  %4607 = vtanh.f32 %v2024_v16  ;;  %v2042_v46 = vmul.f32 0.5, %v5925_v56  ;;  %v2942_v38 = vadd.f32 0.5, %v2622_v44 }
 0x113   : > { %v5970_v9 = vpop.f32.mrf.mxu1  ;;  %1401 = vmatprep.mubr.f32.mxu0 %v8208_v18  ;;  %1562 = vmatprep.mubr.f32.mxu1 %v8208_v18  ;;  %v4596_v60 = vpop.eup %4595  ;;  %v2641_v31 = vmul.f32 0.5, %v4594_v21  ;;  %4609 = vtanh.f32 %v2041_v0  ;;  %v2061_v47 = vmul.f32 0.5, %v5931_v14  ;;  %v6011_v39 = vadd.f32 %v3586_v43, %v3244_v45 }
 0x114   : > { %v5982_v34 = vpop.f32.mrf.mxu0  ;;  %v4598_v20 = vpop.eup %4597  ;;  %v3263_v62 = vmul.f32 %v2943_v41, %v5867_v63  ;;  %4611 = vtanh.f32 %v2043_v59  ;;  %v2063_v50 = vmul.f32 0.5, %v5933_v8  ;;  %v2944_v55 = vadd.f32 0.5, %v2624_v49 }
 0x115   : > { %v5984_v35 = vpop.f32.mrf.mxu1  ;;  %v4600_v30 = vpop.eup %4599  ;;  %v2643_v16 = vmul.f32 0.5, %v4596_v60  ;;  %4613 = vtanh.f32 %v2042_v46  ;;  %v2062_v21 = vmul.f32 0.5, %v5941_v36  ;;  %v2642_v63 = vmul.f32 0.5, %v4598_v20 }
 0x116   : > { %8209 = vst [vmem:[#allocation9_spill] sm:$0xff] %v5984_v35  ;;  %v5989_v52 = vpop.f32.mrf.mxu0  ;;  %4427 = vmatmul.mubr.msk.f32.gmra.mxu0 %vm262_vm0, %v5536_v22  ;;  %4443 = vmatmul.mubr.msk.f32.gmra.mxu1 %vm262_vm0, %v5536_v22  ;;  %v2044_v22 = vmul.f32 0.5, %v5927_v57  ;;  %v4602_v26 = vpop.eup %4601  ;;  %v2644_v19 = vmul.f32 0.5, %v4600_v30  ;;  %v2064_v43 = vmul.f32 0.5, %v5943_v40  ;;  %v2081_v49 = vmul.f32 0.5, %v5945_v48 }
 0x117   : > { %v5991_v53 = vpop.f32.mrf.mxu1  ;;  %1407 = vmatprep.mubr.f32.mxu0 %v8208_v18  ;;  %1568 = vmatprep.mubr.f32.mxu1 %v8208_v18  ;;  %v4604_v54 = vpop.eup %4603  ;;  %v2661_v41 = vmul.f32 0.5, %v4602_v26  ;;  %v3262_v60 = vmul.f32 %v2942_v38, %v5876_v1  ;;  %v2083_v59 = vmul.f32 0.5, %v5947_v6  ;;  %v2962_v1 = vadd.f32 0.5, %v2642_v63 }
 0x118   : > { %v6006_v15 = vpop.f32.mrf.mxu0  ;;  %4615 = vtanh.f32 %v2044_v22  ;;  %v2663_v0 = vmul.f32 0.5, %v4604_v54  ;;  %v2082_v22 = vmul.f32 0.5, %v5958_v3  ;;  %v2964_v30 = vadd.f32 0.5, %v2644_v19 }
 0x119   : > { %v6008_v29 = vpop.f32.mrf.mxu1  ;;  %4617 = vtanh.f32 %v2061_v47  ;;  %v2084_v38 = vmul.f32 0.5, %v5960_v4  ;;  %v3264_v54 = vmul.f32 %v2944_v55, %v5878_v2  ;;  %v2102_v2 = vmul.f32 0.5, %v5982_v34 }
 0x11a   : > { %8210 = vst [vmem:[#allocation10_spill] sm:$0xff] %v6008_v29  ;;  %v6015_v42 = vpop.f32.mrf.mxu0  ;;  %4428 = vmatmul.mubr.msk.f32.gmra.mxu0 %vm262_vm0, %v5545_v23  ;;  %4444 = vmatmul.mubr.msk.f32.gmra.mxu1 %vm262_vm0, %v5545_v23  ;;  %v6031_v23 = vadd.f32 %v3542_v12, %v3261_v13  ;;  %4619 = vtanh.f32 %v2063_v50  ;;  %v2961_v12 = vadd.f32 0.5, %v2641_v31  ;;  %v2963_v13 = vadd.f32 0.5, %v2643_v16 }
 0x11b   : > { %8211 = vst [vmem:[#allocation11_spill] sm:$0xff] %v6015_v42  ;;  %v6017_v51 = vpop.f32.mrf.mxu1  ;;  %1413 = vmatprep.mubr.f32.mxu0 %v8208_v18  ;;  %1574 = vmatprep.mubr.f32.mxu1 %v8208_v18  ;;  %4621 = vtanh.f32 %v2062_v21  ;;  %v2981_v31 = vadd.f32 0.5, %v2661_v41  ;;  %v2101_v50 = vmul.f32 0.5, %v5968_v27  ;;  %v2983_v16 = vadd.f32 0.5, %v2663_v0 }
 0x11c   : > { %8212 = vst [vmem:[#allocation12_spill] sm:$0xff] %v6017_v51  ;;  %v6027_v44 = vpop.f32.mrf.mxu0  ;;  %4623 = vtanh.f32 %v2064_v43  ;;  %v2103_v21 = vmul.f32 0.5, %v5970_v9  ;;  %v3282_v43 = vmul.f32 %v2962_v1, %v5891_v10  ;;  %v3284_v41 = vmul.f32 %v2964_v30, %v5893_v11 }
 0x11d   : > { %8213 = vst [vmem:[#allocation13_spill] sm:$0xff] %v6027_v44  ;;  %v6029_v45 = vpop.f32.mrf.mxu1  ;;  %4625 = vtanh.f32 %v2081_v49  ;;  %v2104_v49 = vmul.f32 0.5, %v5984_v35  ;;  %v3558_v0 = vadd.f32 %v5997_v61, %v3262_v60  ;;  %v3588_v10 = vadd.f32 %v6011_v39, %v3264_v54  ;;  %v8226_v35 = vld [vmem:[#allocation6_spill] sm:$0xff] }
 0x11e   : > { %8214 = vst [vmem:[#allocation14_spill] sm:$0xff] %v6029_v45  ;;  %v6036_v20 = vpop.f32.mrf.mxu0  ;;  %4429 = vmatmul.mubr.msk.f32.gmra.mxu0 %vm262_vm0, %v5554_v24  ;;  %4445 = vmatmul.mubr.msk.f32.gmra.mxu1 %vm262_vm0, %v5554_v24  ;;  %v3573_v24 = vadd.f32 %v5986_v58, %v3263_v62  ;;  %4627 = vtanh.f32 %v2083_v59  ;;  %v3281_v58 = vmul.f32 %v2961_v12, %v5881_v5  ;;  %v4606_v55 = vpop.eup %4605  ;;  %v2121_v12 = vmul.f32 0.5, %v5989_v52 }
 0x11f   : > { %8215 = vst [vmem:[#allocation15_spill] sm:$0xff] %v6036_v20  ;;  %v6038_v46 = vpop.f32.mrf.mxu1  ;;  %1419 = vmatprep.mubr.f32.mxu0 %v8208_v18  ;;  %1580 = vmatprep.mubr.f32.mxu1 %v8208_v18  ;;  %v3283_v62 = vmul.f32 %v2963_v13, %v5883_v7  ;;  %4629 = vtanh.f32 %v2082_v22  ;;  %v4608_v7 = vpop.eup %4607  ;;  %v3301_v59 = vmul.f32 %v2981_v31, %v5897_v28  ;;  %v8223_v22 = vld [vmem:[#allocation8_spill] sm:$0xff]  ;;  %v2123_v1 = vmul.f32 0.5, %v5991_v53 }
 0x120   : > { %8216 = vst [vmem:[#allocation16_spill] sm:$0xff] %v6038_v46  ;;  %v6048_v47 = vpop.f32.mrf.mxu0  ;;  %4631 = vtanh.f32 %v2084_v38  ;;  %v4610_v13 = vpop.eup %4609  ;;  %v3303_v11 = vmul.f32 %v2983_v16, %v8223_v22  ;;  %v3544_v61 = vadd.f32 %v6031_v23, %v3281_v58  ;;  %v2122_v39 = vmul.f32 0.5, %v6006_v15 }
 0x121   : > { %8217 = vst [vmem:[#allocation17_spill] sm:$0xff] %v6048_v47  ;;  %v6050_v26 = vpop.f32.mrf.mxu1  ;;  %4633 = vtanh.f32 %v2101_v50  ;;  %v4612_v28 = vpop.eup %4611  ;;  %v3574_v60 = vadd.f32 %v3573_v24, %v3283_v62  ;;  %v6094_v50 = vadd.f32 %v3558_v0, %v3282_v43  ;;  %v6096_v54 = vadd.f32 %v3588_v10, %v3284_v41  ;;  %v8231_v10 = vld [vmem:[#allocation7_spill] sm:$0xff] }
 0x122   : > { %8218 = vst [vmem:[#allocation18_spill] sm:$0xff] %v6050_v26  ;;  %v6056_v63 = vpop.f32.mrf.mxu0  ;;  %4430 = vmatmul.mubr.msk.f32.gmra.mxu0 %vm262_vm0, %v5563_v25  ;;  %4446 = vmatmul.mubr.msk.f32.gmra.mxu1 %vm262_vm0, %v5563_v25  ;;  %4635 = vtanh.f32 %v2103_v21  ;;  %v4614_v31 = vpop.eup %4613  ;;  %v2124_v16 = vmul.f32 0.5, %v6008_v29  ;;  %v6103_v24 = vadd.f32 %v3544_v61, %v3301_v59  ;;  %v2662_v58 = vmul.f32 0.5, %v4606_v55 }
 0x123   : > { %8219 = vst [vmem:[#allocation19_spill] sm:$0xff] %v6056_v63  ;;  %v6058_v19 = vpop.f32.mrf.mxu1  ;;  %1425 = vmatprep.mubr.f32.mxu0 %v8208_v18  ;;  %1586 = vmatprep.mubr.f32.mxu1 %v8208_v18  ;;  %4637 = vtanh.f32 %v2102_v2  ;;  %v2664_v62 = vmul.f32 0.5, %v4608_v7  ;;  %v6105_v22 = vadd.f32 %v3574_v60, %v3303_v11  ;;  %v2681_v43 = vmul.f32 0.5, %v4610_v13 }
 0x124   : > { %8220 = vst [vmem:[#allocation20_spill] sm:$0xff] %v6058_v19  ;;  %v6072_v25 = vpop.f32.mrf.mxu0  ;;  %4639 = vtanh.f32 %v2104_v49  ;;  %v2683_v0 = vmul.f32 0.5, %v4612_v28  ;;  %v2682_v55 = vmul.f32 0.5, %v4614_v31  ;;  %v6121_v28 = vmul.f32 0.5, %v6017_v51 }
 0x125   : > { %8221 = vst [vmem:[#allocation21_spill] sm:$0xff] %v6072_v25  ;;  %v6074_v5 = vpop.f32.mrf.mxu1  ;;  %v4616_v23 = vpop.eup %4615  ;;  %4641 = vtanh.f32 %v2121_v12  ;;  %v6116_v12 = vmul.f32 0.5, %v6015_v42  ;;  %v2982_v31 = vadd.f32 0.5, %v2662_v58  ;;  %v6131_v42 = vmul.f32 0.5, %v6029_v45 }
 0x126   : > { %8222 = vst [vmem:[#allocation22_spill] sm:$0xff] %v6074_v5  ;;  %v6082_v30 = vpop.f32.mrf.mxu0  ;;  %4431 = vmatmul.mubr.msk.f32.gmra.mxu0 %vm262_vm0, %v8226_v35  ;;  %4447 = vmatmul.mubr.msk.f32.gmra.mxu1 %vm262_vm0, %v8226_v35  ;;  %v4618_v2 = vpop.eup %4617  ;;  %4643 = vtanh.f32 %v2123_v1  ;;  %v2684_v7 = vmul.f32 0.5, %v4616_v23  ;;  %v2984_v23 = vadd.f32 0.5, %v2664_v62  ;;  %v6134_v51 = vmul.f32 0.5, %v6036_v20 }
 0x127   : > { %8224 = vst [vmem:[#allocation8_spill] sm:$0xff] %v6082_v30  ;;  %v6084_v38 = vpop.f32.mrf.mxu1  ;;  %1431 = vmatprep.mubr.f32.mxu0 %v8208_v18  ;;  %1592 = vmatprep.mubr.f32.mxu1 %v8208_v18  ;;  %v4620_v59 = vpop.eup %4619  ;;  %4645 = vtanh.f32 %v2122_v39  ;;  %v2701_v11 = vmul.f32 0.5, %v4618_v2  ;;  %v3002_v62 = vadd.f32 0.5, %v2682_v55  ;;  %v6155_v55 = vmul.f32 0.5, %v6056_v63 }
 0x128   : > { %8225 = vst [vmem:[#allocation23_spill] sm:$0xff] %v6084_v38  ;;  %v6099_v35 = vpop.f32.mrf.mxu0  ;;  %v4622_v13 = vpop.eup %4621  ;;  %v2703_v1 = vmul.f32 0.5, %v4620_v59  ;;  %4647 = vtanh.f32 %v2124_v16  ;;  %v3001_v59 = vadd.f32 0.5, %v2681_v43  ;;  %v3003_v16 = vadd.f32 0.5, %v2683_v0 }
 0x129   : > { %8227 = vst [vmem:[#allocation6_spill] sm:$0xff] %v6099_v35  ;;  %v6101_v21 = vpop.f32.mrf.mxu1  ;;  %v4624_v39 = vpop.eup %4623  ;;  %v3004_v45 = vadd.f32 0.5, %v2684_v7  ;;  %v6147_v43 = vmul.f32 0.5, %v6048_v47  ;;  %8236 = vst [vmem:[#allocation30_spill] sm:$0xff] %v6155_v55  ;;  %4649 = vtanh.f32 %v6116_v12 }
 0x12a   : > { %8228 = vst [vmem:[#allocation24_spill] sm:$0xff] %v6101_v21  ;;  %v6107_v41 = vpop.f32.mrf.mxu0  ;;  %4432 = vmatmul.mubr.msk.f32.gmra.mxu0 %vm262_vm0, %v8231_v10  ;;  %4448 = vmatmul.mubr.msk.f32.gmra.mxu1 %vm262_vm0, %v8231_v10  ;;  %v6128_v10 = vmul.f32 0.5, %v6027_v44  ;;  %v4626_v2 = vpop.eup %4625  ;;  %v6144_v44 = vmul.f32 0.5, %v6038_v46  ;;  %v3023_v20 = vadd.f32 0.5, %v2703_v1  ;;  %v3302_v46 = vmul.f32 %v2982_v31, %v5908_v32 }
 0x12b   : > { %8229 = vst [vmem:[#allocation25_spill] sm:$0xff] %v6107_v41  ;;  %v6109_v49 = vpop.f32.mrf.mxu1  ;;  %1663 = vmatprep.mubr.f32.mxu0 %v8208_v18  ;;  %1824 = vmatprep.mubr.f32.mxu1 %v8208_v18  ;;  %v4628_v58 = vpop.eup %4627  ;;  %v2704_v21 = vmul.f32 0.5, %v4624_v39  ;;  %v3323_v35 = vmul.f32 %v3003_v16, %v5915_v17  ;;  %v2721_v29 = vmul.f32 0.5, %v4626_v2  ;;  %v3324_v39 = vmul.f32 %v3004_v45, %v5927_v57 }
 0x12c   : > { %8230 = vst [vmem:[#allocation26_spill] sm:$0xff] %v6109_v49  ;;  %v6123_v61 = vpop.f32.mrf.mxu0  ;;  %v2702_v49 = vmul.f32 0.5, %v4622_v13  ;;  %v4630_v0 = vpop.eup %4629  ;;  %v3021_v13 = vadd.f32 0.5, %v2701_v11  ;;  %v6164_v11 = vmul.f32 0.5, %v6058_v19  ;;  %v6181_v17 = vmul.f32 0.5, %v6074_v5  ;;  %v5203_v19 = vld [vmem:[%s5408_s7 + $0x10] sm:$0xff] }
 0x12d   : > { %8232 = vst [vmem:[#allocation7_spill] sm:$0xff] %v6123_v61  ;;  %v6125_v60 = vpop.f32.mrf.mxu1  ;;  %v4632_v47 = vpop.eup %4631  ;;  %v6188_v2 = vmul.f32 0.5, %v6082_v30  ;;  %v3560_v16 = vadd.f32 %v6094_v50, %v3302_v46  ;;  %4651 = vtanh.f32 %v6121_v28  ;;  %v5205_v28 = vld [vmem:[%s5408_s7 + $0x20] sm:$0xff] }
 0x12e   : > { %8233 = vst [vmem:[#allocation27_spill] sm:$0xff] %v6125_v60  ;;  %v6136_v41 = vpop.f32.mrf.mxu0  ;;  %v5201_v60 = vld [vmem:[%s5408_s7] sm:$0xff]  ;;  %v4634_v1 = vpop.eup %4633  ;;  %v3022_v63 = vadd.f32 0.5, %v2702_v49  ;;  %v3341_v31 = vmul.f32 %v3021_v13, %v5931_v14  ;;  %v2723_v14 = vmul.f32 0.5, %v4628_v58  ;;  %4653 = vtanh.f32 %v6128_v10 }
 0x12f   : > { %8234 = vst [vmem:[#allocation28_spill] sm:$0xff] %v6136_v41  ;;  %v6138_v61 = vpop.f32.mrf.mxu1  ;;  %4449 = vmatmul.mubr.msk.f32.vlgmr.msra.gmra.mxu0 %vm262_vm0, %v5201_v60  ;;  %4465 = vmatmul.mubr.msk.f32.vlgmr.msra.gmra.mxu1 %vm262_vm0, %v5201_v60  ;;  %v3304_v41 = vmul.f32 %v2984_v23, %v5910_v33  ;;  %v4636_v32 = vpop.eup %4635  ;;  %v3322_v33 = vmul.f32 %v3002_v62, %v5925_v56  ;;  %v6191_v56 = vmul.f32 0.5, %v6084_v38  ;;  %v3041_v38 = vadd.f32 0.5, %v2721_v29 }
 0x130   : > { %8235 = vst [vmem:[#allocation29_spill] sm:$0xff] %v6138_v61  ;;  %1669 = vmatprep.mubr.f32.mxu0 %v8208_v18  ;;  %1830 = vmatprep.mubr.f32.mxu1 %v8208_v18  ;;  %v6152_v61 = vmul.f32 0.5, %v6050_v26  ;;  %v6157_v7 = vpop.f32.mrf.mxu0  ;;  %v3321_v26 = vmul.f32 %v3001_v59, %v5913_v37  ;;  %v6178_v37 = vmul.f32 0.5, %v6072_v25  ;;  %v4638_v49 = vpop.eup %4637  ;;  %v3343_v23 = vmul.f32 %v3023_v20, %v5933_v8 }
 0x131   : > { %8237 = vst [vmem:[#allocation31_spill] sm:$0xff] %v6157_v7  ;;  %v6159_v60 = vpop.f32.mrf.mxu1  ;;  %v4640_v59 = vpop.eup %4639  ;;  %v3590_v62 = vadd.f32 %v6096_v54, %v3304_v41  ;;  %v3576_v20 = vadd.f32 %v6105_v22, %v3323_v35  ;;  %v3342_v30 = vmul.f32 %v3022_v63, %v5941_v36  ;;  %v3561_v50 = vadd.f32 %v3560_v16, %v3322_v33 }
 0x132   : > { %8238 = vst [vmem:[#allocation32_spill] sm:$0xff] %v6159_v60  ;;  %v6168_v55 = vpop.f32.mrf.mxu0  ;;  %v5202_v60 = vld [vmem:[%s5408_s7 + $0x8] sm:$0xff]  ;;  %v4642_v13 = vpop.eup %4641  ;;  %v3546_v8 = vadd.f32 %v6103_v24, %v3321_v26  ;;  %v2724_v41 = vmul.f32 0.5, %v4632_v47  ;;  %v2741_v63 = vmul.f32 0.5, %v4634_v1  ;;  %v2743_v35 = vmul.f32 0.5, %v4636_v32  ;;  %v5204_v1 = vld [vmem:[%s5408_s7 + $0x18] sm:$0xff] }
 0x133   : > { %8239 = vst [vmem:[#allocation33_spill] sm:$0xff] %v6168_v55  ;;  %v6170_v7 = vpop.f32.mrf.mxu1  ;;  %4450 = vmatmul.mubr.msk.f32.gmra.mxu0 %vm262_vm0, %v5202_v60  ;;  %4466 = vmatmul.mubr.msk.f32.gmra.mxu1 %vm262_vm0, %v5202_v60  ;;  %v3024_v60 = vadd.f32 0.5, %v2704_v21  ;;  %v4644_v46 = vpop.eup %4643  ;;  %v3591_v54 = vadd.f32 %v3590_v62, %v3324_v39  ;;  %v2722_v21 = vmul.f32 0.5, %v4630_v0  ;;  %v3577_v26 = vadd.f32 %v3576_v20, %v3343_v23 }
 0x134   : > { %8240 = vst [vmem:[#allocation34_spill] sm:$0xff] %v6170_v7  ;;  %1675 = vmatprep.mubr.f32.mxu0 %v8208_v18  ;;  %1836 = vmatprep.mubr.f32.mxu1 %v8208_v18  ;;  %v6193_v57 = vpop.f32.mrf.mxu0  ;;  %v4646_v36 = vpop.eup %4645  ;;  %v3547_v29 = vadd.f32 %v3546_v8, %v3341_v31  ;;  %v3043_v33 = vadd.f32 0.5, %v2723_v14  ;;  %v2742_v0 = vmul.f32 0.5, %v4638_v49  ;;  %v2744_v47 = vmul.f32 0.5, %v4640_v59 }
 0x135   : > { %8241 = vst [vmem:[#allocation35_spill] sm:$0xff] %v6193_v57  ;;  %v6195_v45 = vpop.f32.mrf.mxu1  ;;  %v3344_v58 = vmul.f32 %v3024_v60, %v5943_v40  ;;  %v3562_v39 = vadd.f32 %v3561_v50, %v3342_v30  ;;  %v3361_v16 = vmul.f32 %v3041_v38, %v5945_v48  ;;  %v2761_v62 = vmul.f32 0.5, %v4642_v13 }
 0x136   : > { %8242 = vst [vmem:[#allocation36_spill] sm:$0xff] %v6195_v45  ;;  %v6202_v5 = vpop.f32.mrf.mxu0  ;;  %v3042_v32 = vadd.f32 0.5, %v2722_v21  ;;  %v3044_v8 = vadd.f32 0.5, %v2724_v41  ;;  %v2762_v40 = vmul.f32 0.5, %v4646_v36  ;;  %v3061_v48 = vadd.f32 0.5, %v2741_v63 }
 0x137   : > { %v6204_v25 = vpop.f32.mrf.mxu1  ;;  %4451 = vmatmul.mubr.msk.f32.gmra.mxu0 %vm262_vm0, %v5203_v19  ;;  %4467 = vmatmul.mubr.msk.f32.gmra.mxu1 %vm262_vm0, %v5203_v19  ;;  %v4648_v19 = vpop.eup %4647  ;;  %v3063_v30 = vadd.f32 0.5, %v2743_v35  ;;  %v3592_v60 = vadd.f32 %v3591_v54, %v3344_v58  ;;  %v3062_v14 = vadd.f32 0.5, %v2742_v0  ;;  %v3064_v13 = vadd.f32 0.5, %v2744_v47 }
 0x138   : > { %8243 = vst [vmem:[#allocation37_spill] sm:$0xff] %v6204_v25  ;;  %1681 = vmatprep.mubr.f32.mxu0 %v8208_v18  ;;  %1842 = vmatprep.mubr.f32.mxu1 %v8208_v18  ;;  %v6211_v24 = vpop.f32.mrf.mxu0  ;;  %v2763_v25 = vmul.f32 0.5, %v4644_v46  ;;  %v2764_v38 = vmul.f32 0.5, %v4648_v19  ;;  %v3363_v12 = vmul.f32 %v3043_v33, %v5947_v6  ;;  %v3081_v20 = vadd.f32 0.5, %v2761_v62  ;;  %v5206_v33 = vld [vmem:[%s5408_s7 + $0x28] sm:$0xff] }
 0x139   : > { %v6213_v22 = vpop.f32.mrf.mxu1  ;;  %4655 = vtanh.f32 %v6131_v42  ;;  %v3362_v54 = vmul.f32 %v3042_v32, %v5958_v3  ;;  %v3364_v41 = vmul.f32 %v3044_v8, %v5960_v4  ;;  %v3082_v10 = vadd.f32 0.5, %v2762_v40  ;;  %v8248_v40 = vld [vmem:[#allocation24_spill] sm:$0xff] }
 0x13a   : > { %v6217_v31 = vpop.f32.mrf.mxu0  ;;  %v3083_v46 = vadd.f32 0.5, %v2763_v25  ;;  %4657 = vtanh.f32 %v6134_v51  ;;  %v3381_v6 = vmul.f32 %v3061_v48, %v5968_v27  ;;  %v3383_v42 = vmul.f32 %v3063_v30, %v5970_v9  ;;  %v8244_v51 = vld [vmem:[#allocation9_spill] sm:$0xff] }
 0x13b   : > { %v6219_v23 = vpop.f32.mrf.mxu1  ;;  %4452 = vmatmul.mubr.msk.f32.gmra.mxu0 %vm262_vm0, %v5204_v1  ;;  %4468 = vmatmul.mubr.msk.f32.gmra.mxu1 %vm262_vm0, %v5204_v1  ;;  %v3084_v25 = vadd.f32 0.5, %v2764_v38  ;;  %4659 = vtanh.f32 %v6144_v44  ;;  %v3548_v4 = vadd.f32 %v3547_v29, %v3361_v16  ;;  %v3382_v63 = vmul.f32 %v3062_v14, %v5982_v34  ;;  %v5207_v38 = vld [vmem:[%s5408_s7 + $0x30] sm:$0xff] }
 0x13c   : > { %1687 = vmatprep.mubr.f32.mxu0 %v8208_v18  ;;  %1848 = vmatprep.mubr.f32.mxu1 %v8208_v18  ;;  %v6228_v49 = vpop.f32.mrf.mxu0  ;;  %v3384_v35 = vmul.f32 %v3064_v13, %v8244_v51  ;;  %4661 = vtanh.f32 %v6147_v43  ;;  %v3578_v19 = vadd.f32 %v3577_v26, %v3363_v12  ;;  %v3401_v27 = vmul.f32 %v3081_v20, %v5989_v52  ;;  %v8245_v26 = vld [vmem:[#allocation30_spill] sm:$0xff] }
 0x13d   : > { %v6230_v59 = vpop.f32.mrf.mxu1  ;;  %v3403_v58 = vmul.f32 %v3083_v46, %v5991_v53  ;;  %4663 = vtanh.f32 %v6152_v61  ;;  %v3563_v34 = vadd.f32 %v3562_v39, %v3362_v54  ;;  %v3593_v29 = vadd.f32 %v3592_v60, %v3364_v41  ;;  %v8246_v61 = vld [vmem:[#allocation10_spill] sm:$0xff]  ;;  %v8250_v60 = vld [vmem:[#allocation25_spill] sm:$0xff]  ;;  %v8252_v46 = vld [vmem:[#allocation7_spill] sm:$0xff] }
 0x13e   : > { %v6235_v50 = vpop.f32.mrf.mxu0  ;;  %v3402_v43 = vmul.f32 %v3082_v10, %v6006_v15  ;;  %4665 = vtanh.f32 %v8245_v26  ;;  %v3549_v52 = vadd.f32 %v3548_v4, %v3381_v6  ;;  %v3579_v53 = vadd.f32 %v3578_v19, %v3383_v42  ;;  %v8247_v15 = vld [vmem:[#allocation6_spill] sm:$0xff]  ;;  %v8253_v54 = vld [vmem:[#allocation27_spill] sm:$0xff] }
 0x13f   : > { %v6237_v21 = vpop.f32.mrf.mxu1  ;;  %4453 = vmatmul.mubr.msk.f32.gmra.mxu0 %vm262_vm0, %v5205_v28  ;;  %4469 = vmatmul.mubr.msk.f32.gmra.mxu1 %vm262_vm0, %v5205_v28  ;;  %v3404_v0 = vmul.f32 %v3084_v25, %v8246_v61  ;;  %4667 = vtanh.f32 %v6164_v11  ;;  %v3564_v39 = vadd.f32 %v3563_v34, %v3382_v63  ;;  %v3594_v62 = vadd.f32 %v3593_v29, %v3384_v35  ;;  %v8251_v13 = vld [vmem:[#allocation26_spill] sm:$0xff]  ;;  %v8256_v25 = vld [vmem:[#allocation28_spill] sm:$0xff]  ;;  %v8257_v63 = vld [vmem:[#allocation29_spill] sm:$0xff] }
 0x140   : > { %1693 = vmatprep.mubr.f32.mxu0 %v8208_v18  ;;  %1854 = vmatprep.mubr.f32.mxu1 %v8208_v18  ;;  %v6250_v36 = vpop.f32.mrf.mxu0  ;;  %4669 = vtanh.f32 %v6178_v37  ;;  %v2202_v1 = vmul.f32 0.5, %v8247_v15  ;;  %v6279_v32 = vadd.f32 %v3549_v52, %v3401_v27  ;;  %v6281_v8 = vadd.f32 %v3579_v53, %v3403_v58  ;;  %v8258_v19 = vld [vmem:[#allocation31_spill] sm:$0xff]  ;;  %v8259_v58 = vld [vmem:[#allocation32_spill] sm:$0xff] }
 0x141   : > { %v6252_v3 = vpop.f32.mrf.mxu1  ;;  %4671 = vtanh.f32 %v6181_v17  ;;  %v2204_v48 = vmul.f32 0.5, %v8248_v40  ;;  %v6292_v37 = vadd.f32 %v3564_v39, %v3402_v43  ;;  %v2221_v14 = vmul.f32 0.5, %v8250_v60  ;;  %v4650_v17 = vpop.eup %4649  ;;  %v5208_v43 = vld [vmem:[%s5408_s7 + $0x38] sm:$0xff] }
 0x142   : > { %v6260_v9 = vpop.f32.mrf.mxu0  ;;  %4673 = vtanh.f32 %v6188_v2  ;;  %v2223_v12 = vmul.f32 0.5, %v8251_v13  ;;  %v6299_v20 = vadd.f32 %v3594_v62, %v3404_v0  ;;  %v2222_v28 = vmul.f32 0.5, %v8252_v46  ;;  %v4652_v6 = vpop.eup %4651 }
 0x143   : > { %v6262_v44 = vpop.f32.mrf.mxu1  ;;  %4454 = vmatmul.mubr.msk.f32.gmra.mxu0 %vm262_vm0, %v5206_v33  ;;  %4470 = vmatmul.mubr.msk.f32.gmra.mxu1 %vm262_vm0, %v5206_v33  ;;  %4675 = vtanh.f32 %v6191_v56  ;;  %v2224_v41 = vmul.f32 0.5, %v8253_v54  ;;  %v2781_v42 = vmul.f32 0.5, %v4650_v17  ;;  %v6309_v4 = vmul.f32 0.5, %v8256_v25  ;;  %v4654_v35 = vpop.eup %4653  ;;  %v8264_v17 = vld [vmem:[#allocation11_spill] sm:$0xff] }
 0x144   : > { %1699 = vmatprep.mubr.f32.mxu0 %v8208_v18  ;;  %1860 = vmatprep.mubr.f32.mxu1 %v8208_v18  ;;  %v6273_v47 = vpop.f32.mrf.mxu0  ;;  %4677 = vtanh.f32 %v2202_v1  ;;  %v6312_v51 = vmul.f32 0.5, %v8257_v63  ;;  %v2783_v56 = vmul.f32 0.5, %v4652_v6  ;;  %v6315_v27 = vmul.f32 0.5, %v8258_v19  ;;  %v8281_v19 = vld [vmem:[#allocation20_spill] sm:$0xff] }
 0x145   : > { %v6275_v16 = vpop.f32.mrf.mxu1  ;;  %4679 = vtanh.f32 %v2204_v48  ;;  %v6318_v33 = vmul.f32 0.5, %v8259_v58  ;;  %v3101_v52 = vadd.f32 0.5, %v2781_v42  ;;  %v2782_v53 = vmul.f32 0.5, %v4654_v35 }
 0x146   : > { %v6285_v30 = vpop.f32.mrf.mxu0  ;;  %v4656_v26 = vpop.eup %4655  ;;  %4681 = vtanh.f32 %v2221_v14  ;;  %v6328_v61 = vmul.f32 0.5, %v6168_v55  ;;  %v3103_v39 = vadd.f32 0.5, %v2783_v56  ;;  %v6333_v1 = vmul.f32 0.5, %v6170_v7 }
 0x147   : > { %v6287_v11 = vpop.f32.mrf.mxu1  ;;  %4455 = vmatmul.mubr.msk.f32.gmra.mxu0 %vm262_vm0, %v5207_v38  ;;  %4471 = vmatmul.mubr.msk.f32.gmra.mxu1 %vm262_vm0, %v5207_v38  ;;  %v4658_v0 = vpop.eup %4657  ;;  %v2784_v62 = vmul.f32 0.5, %v4656_v26  ;;  %4683 = vtanh.f32 %v2223_v12  ;;  %v3421_v6 = vmul.f32 %v3101_v52, %v8264_v17  ;;  %v3102_v42 = vadd.f32 0.5, %v2782_v53  ;;  %v8268_v52 = vld [vmem:[#allocation13_spill] sm:$0xff] }
 0x148   : > { %8249 = vst [vmem:[#allocation9_spill] sm:$0xff] %v6287_v11  ;;  %1705 = vmatprep.mubr.f32.mxu0 %v8208_v18  ;;  %1866 = vmatprep.mubr.f32.mxu1 %v8208_v18  ;;  %v6304_v10 = vpop.f32.mrf.mxu0  ;;  %v4660_v14 = vpop.eup %4659  ;;  %v2801_v35 = vmul.f32 0.5, %v4658_v0  ;;  %4685 = vtanh.f32 %v2222_v28  ;;  %v6350_v17 = vmul.f32 0.5, %v6193_v57 }
 0x149   : > { %8254 = vst [vmem:[#allocation30_spill] sm:$0xff] %v6304_v10  ;;  %v6306_v2 = vpop.f32.mrf.mxu1  ;;  %v3104_v56 = vadd.f32 0.5, %v2784_v62  ;;  %v2803_v26 = vmul.f32 0.5, %v4660_v14  ;;  %4687 = vtanh.f32 %v2224_v41  ;;  %v5209_v10 = vld [vmem:[%s5408_s7 + $0x40] sm:$0xff]  ;;  %v3422_v53 = vmul.f32 %v3102_v42, %v8268_v52  ;;  %v8272_v52 = vld [vmem:[#allocation15_spill] sm:$0xff] }
 0x14a   : > { %8255 = vst [vmem:[#allocation10_spill] sm:$0xff] %v6306_v2  ;;  %v6320_v34 = vpop.f32.mrf.mxu0  ;;  %v3121_v0 = vadd.f32 0.5, %v2801_v35  ;;  %4689 = vtanh.f32 %v6309_v4 }
 0x14b   : > { %8260 = vst [vmem:[#allocation6_spill] sm:$0xff] %v6320_v34  ;;  %v6322_v29 = vpop.f32.mrf.mxu1  ;;  %4456 = vmatmul.mubr.msk.f32.gmra.mxu0 %vm262_vm0, %v5208_v43  ;;  %4472 = vmatmul.mubr.msk.f32.gmra.mxu1 %vm262_vm0, %v5208_v43  ;;  %v4662_v43 = vpop.eup %4661  ;;  %v3123_v62 = vadd.f32 0.5, %v2803_v26  ;;  %v8273_v26 = vld [vmem:[#allocation16_spill] sm:$0xff]  ;;  %4691 = vtanh.f32 %v6312_v51 }
 0x14c   : > { %8261 = vst [vmem:[#allocation24_spill] sm:$0xff] %v6322_v29  ;;  %1711 = vmatprep.mubr.f32.mxu0 %v8208_v18  ;;  %1872 = vmatprep.mubr.f32.mxu1 %v8208_v18  ;;  %v6335_v48 = vpop.f32.mrf.mxu0  ;;  %v8265_v29 = vld [vmem:[#allocation12_spill] sm:$0xff]  ;;  %v2802_v28 = vmul.f32 0.5, %v4662_v43  ;;  %v3551_v43 = vadd.f32 %v6279_v32, %v3421_v6  ;;  %v3566_v6 = vadd.f32 %v6292_v37, %v3422_v53  ;;  %4693 = vtanh.f32 %v6315_v27 }
 0x14d   : > { %8262 = vst [vmem:[#allocation25_spill] sm:$0xff] %v6335_v48  ;;  %v6337_v38 = vpop.f32.mrf.mxu1  ;;  %v3423_v34 = vmul.f32 %v3103_v39, %v8265_v29  ;;  %v8269_v29 = vld [vmem:[#allocation14_spill] sm:$0xff]  ;;  %v1965_v27 = vmul.f32 0.5, %v6202_v5 }
 0x14e   : > { %8263 = vst [vmem:[#allocation26_spill] sm:$0xff] %v6337_v38  ;;  %v6341_v12 = vpop.f32.mrf.mxu0  ;;  %v4664_v38 = vpop.eup %4663  ;;  %v3424_v39 = vmul.f32 %v3104_v56, %v8269_v29  ;;  %v3122_v48 = vadd.f32 0.5, %v2802_v28  ;;  %4695 = vtanh.f32 %v6318_v33 }
 0x14f   : > { %8266 = vst [vmem:[#allocation7_spill] sm:$0xff] %v6341_v12  ;;  %v6343_v2 = vpop.f32.mrf.mxu1  ;;  %4457 = vmatmul.mubr.msk.f32.gmra.mxu0 %vm262_vm0, %v5209_v10  ;;  %4473 = vmatmul.mubr.msk.f32.gmra.mxu1 %vm262_vm0, %v5209_v10  ;;  %v4666_v41 = vpop.eup %4665  ;;  %v2804_v14 = vmul.f32 0.5, %v4664_v38  ;;  %v6356_v10 = vmul.f32 0.5, %v6195_v45  ;;  %v3441_v12 = vmul.f32 %v3121_v0, %v8272_v52  ;;  %v3581_v56 = vadd.f32 %v6281_v8, %v3423_v34  ;;  %v8276_v0 = vld [vmem:[#allocation17_spill] sm:$0xff] }
 0x150   : > { %8267 = vst [vmem:[#allocation27_spill] sm:$0xff] %v6343_v2  ;;  %1717 = vmatprep.mubr.f32.mxu0 %v8208_v18  ;;  %1878 = vmatprep.mubr.f32.mxu1 %v8208_v18  ;;  %v6358_v2 = vpop.f32.mrf.mxu0  ;;  %v4668_v35 = vpop.eup %4667  ;;  %v2821_v57 = vmul.f32 0.5, %v4666_v41  ;;  %v3443_v38 = vmul.f32 %v3123_v62, %v8273_v26  ;;  %v3442_v28 = vmul.f32 %v3122_v48, %v8276_v0  ;;  %4697 = vtanh.f32 %v6328_v61 }
 0x151   : > { %8270 = vst [vmem:[#allocation28_spill] sm:$0xff] %v6358_v2  ;;  %v6360_v42 = vpop.f32.mrf.mxu1  ;;  %v4670_v7 = vpop.eup %4669  ;;  %v3124_v29 = vadd.f32 0.5, %v2804_v14  ;;  %v2823_v55 = vmul.f32 0.5, %v4668_v35  ;;  %v5210_v2 = vld [vmem:[%s5408_s7 + $0x48] sm:$0xff]  ;;  %v3596_v62 = vadd.f32 %v6299_v20, %v3424_v39  ;;  %v3552_v48 = vadd.f32 %v3551_v43, %v3441_v12 }
 0x152   : > { %8271 = vst [vmem:[#allocation11_spill] sm:$0xff] %v6360_v42  ;;  %v6366_v45 = vpop.f32.mrf.mxu0  ;;  %v4672_v32 = vpop.eup %4671  ;;  %v3141_v41 = vadd.f32 0.5, %v2821_v57  ;;  %v2822_v8 = vmul.f32 0.5, %v4670_v7  ;;  %v8277_v14 = vld [vmem:[#allocation18_spill] sm:$0xff]  ;;  %v8280_v57 = vld [vmem:[#allocation19_spill] sm:$0xff]  ;;  %v3582_v42 = vadd.f32 %v3581_v56, %v3443_v38  ;;  %v3567_v43 = vadd.f32 %v3566_v6, %v3442_v28 }
 0x153   : > { %8274 = vst [vmem:[#allocation12_spill] sm:$0xff] %v6366_v45  ;;  %v6368_v58 = vpop.f32.mrf.mxu1  ;;  %4458 = vmatmul.mubr.msk.f32.gmra.mxu0 %vm262_vm0, %v5210_v2  ;;  %4474 = vmatmul.mubr.msk.f32.gmra.mxu1 %vm262_vm0, %v5210_v2  ;;  %v4674_v34 = vpop.eup %4673  ;;  %v3444_v35 = vmul.f32 %v3124_v29, %v8277_v14  ;;  %v3143_v52 = vadd.f32 0.5, %v2823_v55  ;;  %v2824_v26 = vmul.f32 0.5, %v4672_v32  ;;  %v5211_v32 = vld [vmem:[%s5408_s7 + $0x50] sm:$0xff]  ;;  %v8285_v38 = vld [vmem:[#allocation22_spill] sm:$0xff]  ;;  %4699 = vtanh.f32 %v6333_v1 }
 0x154   : > { %8275 = vst [vmem:[#allocation13_spill] sm:$0xff] %v6368_v58  ;;  %1723 = vmatprep.mubr.f32.mxu0 %v8208_v18  ;;  %1884 = vmatprep.mubr.f32.mxu1 %v8208_v18  ;;  %v6379_v2 = vpop.f32.mrf.mxu0  ;;  %v4676_v37 = vpop.eup %4675  ;;  %v3461_v7 = vmul.f32 %v3141_v41, %v8280_v57  ;;  %v3142_v53 = vadd.f32 0.5, %v2822_v8  ;;  %v2841_v0 = vmul.f32 0.5, %v4674_v34  ;;  %v8284_v41 = vld [vmem:[#allocation21_spill] sm:$0xff]  ;;  %4701 = vtanh.f32 %v6350_v17 }
 0x155   : > { %8278 = vst [vmem:[#allocation14_spill] sm:$0xff] %v6379_v2  ;;  %v6381_v58 = vpop.f32.mrf.mxu1  ;;  %v4678_v45 = vpop.eup %4677  ;;  %v3463_v63 = vmul.f32 %v3143_v52, %v8281_v19  ;;  %v3144_v20 = vadd.f32 0.5, %v2824_v26  ;;  %v2843_v39 = vmul.f32 0.5, %v4676_v37  ;;  %v3597_v56 = vadd.f32 %v3596_v62, %v3444_v35 }
 0x156   : > { %8279 = vst [vmem:[#allocation15_spill] sm:$0xff] %v6381_v58  ;;  %v6385_v29 = vpop.f32.mrf.mxu0  ;;  %v4680_v12 = vpop.eup %4679  ;;  %v3462_v8 = vmul.f32 %v3142_v53, %v8284_v41  ;;  %v3161_v34 = vadd.f32 0.5, %v2841_v0  ;;  %v2842_v14 = vmul.f32 0.5, %v4678_v45  ;;  %v3553_v28 = vadd.f32 %v3552_v48, %v3461_v7  ;;  %v8286_v53 = vld [vmem:[#allocation8_spill] sm:$0xff]  ;;  %v8287_v58 = vld [vmem:[#allocation23_spill] sm:$0xff] }
 0x157   : > { %8282 = vst [vmem:[#allocation16_spill] sm:$0xff] %v6385_v29  ;;  %v6387_v55 = vpop.f32.mrf.mxu1  ;;  %4459 = vmatmul.mubr.msk.f32.gmra.mxu0 %vm262_vm0, %v5211_v32  ;;  %4475 = vmatmul.mubr.msk.f32.gmra.mxu1 %vm262_vm0, %v5211_v32  ;;  %v4682_v19 = vpop.eup %4681  ;;  %v3464_v52 = vmul.f32 %v3144_v20, %v8285_v38  ;;  %v3163_v26 = vadd.f32 0.5, %v2843_v39  ;;  %v2844_v37 = vmul.f32 0.5, %v4680_v12  ;;  %v3583_v29 = vadd.f32 %v3582_v42, %v3463_v63  ;;  %v5212_v12 = vld [vmem:[%s5408_s7 + $0x58] sm:$0xff] }
 0x158   : > { %8283 = vst [vmem:[#allocation17_spill] sm:$0xff] %v6387_v55  ;;  %1729 = vmatprep.mubr.f32.mxu0 %v8208_v18  ;;  %1890 = vmatprep.mubr.f32.mxu1 %v8208_v18  ;;  %v6396_v57 = vpop.f32.mrf.mxu0  ;;  %v4684_v6 = vpop.eup %4683  ;;  %v3481_v0 = vmul.f32 %v3161_v34, %v8286_v53  ;;  %v3162_v45 = vadd.f32 0.5, %v2842_v14  ;;  %v2861_v41 = vmul.f32 0.5, %v4682_v19  ;;  %v3568_v7 = vadd.f32 %v3567_v43, %v3462_v8  ;;  %v3521_v8 = vld [vmem:[#allocation2] sm:$0xff] }
 0x159   : > { %v6398_v32 = vpop.f32.mrf.mxu1  ;;  %v4686_v55 = vpop.eup %4685  ;;  %v3483_v2 = vmul.f32 %v3163_v26, %v8287_v58  ;;  %v3164_v62 = vadd.f32 0.5, %v2844_v37  ;;  %v2863_v35 = vmul.f32 0.5, %v4684_v6  ;;  %v3598_v63 = vadd.f32 %v3597_v56, %v3464_v52 }
 0x15a   : > { %v6402_v20 = vpop.f32.mrf.mxu0  ;;  %v4688_v48 = vpop.eup %4687  ;;  %v3482_v34 = vmul.f32 %v3162_v45, %v8247_v15  ;;  %v3181_v14 = vadd.f32 0.5, %v2861_v41  ;;  %v2862_v19 = vmul.f32 0.5, %v4686_v55  ;;  %v3554_v6 = vadd.f32 %v3553_v28, %v3481_v0  ;;  %v5213_v45 = vld [vmem:[%s5408_s7 + $0x60] sm:$0xff]  ;;  %v3523_v0 = vld [vmem:[#allocation2 + $0x50] sm:$0xff] }
 0x15b   : > { %8288 = vst [vmem:[#allocation18_spill] sm:$0xff] %v6402_v20  ;;  %v6404_v39 = vpop.f32.mrf.mxu1  ;;  %4460 = vmatmul.mubr.msk.f32.gmra.mxu0 %vm262_vm0, %v5212_v12  ;;  %4476 = vmatmul.mubr.msk.f32.gmra.mxu1 %vm262_vm0, %v5212_v12  ;;  %v3484_v58 = vmul.f32 %v3164_v62, %v8248_v40  ;;  %v3183_v42 = vadd.f32 0.5, %v2863_v35  ;;  %v2864_v38 = vmul.f32 0.5, %v4688_v48  ;;  %v3584_v55 = vadd.f32 %v3583_v29, %v3483_v2  ;;  %v3522_v2 = vld [vmem:[#allocation2 + $0x38] sm:$0xff] }
 0x15c   : > { %8289 = vst [vmem:[#allocation19_spill] sm:$0xff] %v6404_v39  ;;  %1735 = vmatprep.mubr.f32.mxu0 %v8208_v18  ;;  %1896 = vmatprep.mubr.f32.mxu1 %v8208_v18  ;;  %v6413_v26 = vpop.f32.mrf.mxu0  ;;  %v3501_v43 = vmul.f32 %v3181_v14, %v8250_v60  ;;  %v3182_v15 = vadd.f32 0.5, %v2862_v19  ;;  %v3569_v60 = vadd.f32 %v3568_v7, %v3482_v34  ;;  %v3524_v12 = vld [vmem:[#allocation2 + $0x18] sm:$0xff]  ;;  %v8296_v34 = vld [vmem:[#allocation37_spill] sm:$0xff]  ;;  %v5214_v19 = vld [vmem:[%s5408_s7 + $0x68] sm:$0xff]  ;;  %v1966_v61 = vmul.f32 0.5, %v6211_v24 }
 0x15d   : > { %8290 = vst [vmem:[#allocation20_spill] sm:$0xff] %v6413_v26  ;;  %v6415_v37 = vpop.f32.mrf.mxu1  ;;  %v3503_v53 = vmul.f32 %v3183_v42, %v8251_v13  ;;  %v3184_v56 = vadd.f32 0.5, %v2864_v38  ;;  %v3599_v13 = vadd.f32 %v3598_v63, %v3484_v58  ;;  %v1967_v14 = vmul.f32 0.5, %v8296_v34 }
 0x15e   : > { %8291 = vst [vmem:[#allocation21_spill] sm:$0xff] %v6415_v37  ;;  %v6421_v40 = vpop.f32.mrf.mxu0  ;;  %v3555_v28 = vadd.f32 %v3554_v6, %v3501_v43  ;;  %v3502_v4 = vmul.f32 %v3182_v15, %v8252_v46  ;;  %4703 = vtanh.f32 %v6356_v10  ;;  %v1968_v58 = vmul.f32 0.5, %v6213_v22 }
 0x15f   : > { %8292 = vst [vmem:[#allocation22_spill] sm:$0xff] %v6421_v40  ;;  %v6423_v52 = vpop.f32.mrf.mxu1  ;;  %4461 = vmatmul.mubr.msk.f32.gmra.mxu0 %vm262_vm0, %v5213_v45  ;;  %4477 = vmatmul.mubr.msk.f32.gmra.mxu1 %vm262_vm0, %v5213_v45  ;;  %v3585_v51 = vadd.f32 %v3584_v55, %v3503_v53  ;;  %v3504_v29 = vmul.f32 %v3184_v56, %v8253_v54  ;;  %4705 = vtanh.f32 %v1965_v27  ;;  %v1985_v17 = vmul.f32 0.5, %v6217_v31  ;;  %v5215_v55 = vld [vmem:[%s5408_s7 + $0x70] sm:$0xff] }
 0x160   : > { %8293 = vst [vmem:[#allocation8_spill] sm:$0xff] %v6423_v52  ;;  %1741 = vmatprep.mubr.f32.mxu0 %v8208_v18  ;;  %1902 = vmatprep.mubr.f32.mxu1 %v8208_v18  ;;  %v6434_v41 = vpop.f32.mrf.mxu0  ;;  %v3841_v35 = vadd.f32 %v3555_v28, %v3521_v8  ;;  %v3570_v46 = vadd.f32 %v3569_v60, %v3502_v4  ;;  %4707 = vtanh.f32 %v1967_v14  ;;  %v1987_v6 = vmul.f32 0.5, %v6219_v23  ;;  %v4690_v60 = vpop.eup %4689 }
 0x161   : > { %8294 = vst [vmem:[#allocation23_spill] sm:$0xff] %v6434_v41  ;;  %v6436_v62 = vpop.f32.mrf.mxu1  ;;  %v3843_v48 = vadd.f32 %v3585_v51, %v3523_v0  ;;  %v3600_v7 = vadd.f32 %v3599_v13, %v3504_v29  ;;  %4709 = vtanh.f32 %v1966_v61  ;;  %v1986_v10 = vmul.f32 0.5, %v6228_v49  ;;  %v5216_v51 = vld [vmem:[%s5408_s7 + $0x78] sm:$0xff] }
 0x162   : > { %8295 = vst [vmem:[#allocation38_spill] sm:$0xff] %v6436_v62  ;;  %v6442_v54 = vpop.f32.mrf.mxu0  ;;  %3861 = vst [vmem:[#allocation2] sm:$0xff] %v3841_v35  ;;  %v3842_v63 = vadd.f32 %v3570_v46, %v3522_v2  ;;  %4711 = vtanh.f32 %v1968_v58  ;;  %v1988_v8 = vmul.f32 0.5, %v6230_v59  ;;  %v2005_v45 = vmul.f32 0.5, %v6235_v50  ;;  %v4692_v2 = vpop.eup %4691 }
 0x163   : > { %8297 = vst [vmem:[#allocation37_spill] sm:$0xff] %v6442_v54  ;;  %v6444_v33 = vpop.f32.mrf.mxu1  ;;  %4462 = vmatmul.mubr.msk.f32.gmra.mxu0 %vm262_vm0, %v5214_v19  ;;  %4478 = vmatmul.mubr.msk.f32.gmra.mxu1 %vm262_vm0, %v5214_v19  ;;  %3863 = vst [vmem:[#allocation2 + $0x50] sm:$0xff] %v3843_v48  ;;  %v3844_v1 = vadd.f32 %v3600_v7, %v3524_v12  ;;  %4713 = vtanh.f32 %v1985_v17  ;;  %v2007_v28 = vmul.f32 0.5, %v6237_v21  ;;  %v2006_v0 = vmul.f32 0.5, %v6250_v36  ;;  %v4694_v12 = vpop.eup %4693 }
 0x164   : > { %8298 = vst [vmem:[#allocation39_spill] sm:$0xff] %v6444_v33  ;;  %1747 = vmatprep.mubr.f32.mxu0 %v8208_v18  ;;  %1908 = vmatprep.mubr.f32.mxu1 %v8208_v18  ;;  %v6455_v42 = vpop.f32.mrf.mxu0  ;;  %3862 = vst [vmem:[#allocation2 + $0x38] sm:$0xff] %v3842_v63  ;;  %4715 = vtanh.f32 %v1987_v6  ;;  %v2008_v4 = vmul.f32 0.5, %v6252_v3  ;;  %v2565_v29 = vmul.f32 0.5, %v4690_v60  ;;  %v2025_v35 = vmul.f32 0.5, %v6260_v9  ;;  %v4696_v63 = vpop.eup %4695 }
 0x165   : > { %8299 = vst [vmem:[#allocation40_spill] sm:$0xff] %v6455_v42  ;;  %v6457_v38 = vpop.f32.mrf.mxu1  ;;  %3864 = vst [vmem:[#allocation2 + $0x18] sm:$0xff] %v3844_v1  ;;  %4717 = vtanh.f32 %v1986_v10  ;;  %v2027_v46 = vmul.f32 0.5, %v6262_v44  ;;  %v2567_v27 = vmul.f32 0.5, %v4692_v2  ;;  %v2026_v48 = vmul.f32 0.5, %v6273_v47  ;;  %v4698_v17 = vpop.eup %4697 }
 0x166   : > { %8300 = vst [vmem:[#allocation41_spill] sm:$0xff] %v6457_v38  ;;  %v6461_v43 = vpop.f32.mrf.mxu0  ;;  %4719 = vtanh.f32 %v1988_v8  ;;  %v2028_v7 = vmul.f32 0.5, %v6275_v16  ;;  %v2885_v61 = vadd.f32 0.5, %v2565_v29  ;;  %v2566_v1 = vmul.f32 0.5, %v4694_v12 }
 0x167   : > { %8301 = vst [vmem:[#allocation42_spill] sm:$0xff] %v6461_v43  ;;  %v6463_v15 = vpop.f32.mrf.mxu1  ;;  %4463 = vmatmul.mubr.msk.f32.gmra.mxu0 %vm262_vm0, %v5215_v55  ;;  %4479 = vmatmul.mubr.msk.f32.gmra.mxu1 %vm262_vm0, %v5215_v55  ;;  %4721 = vtanh.f32 %v2005_v45  ;;  %v6496_v58 = vmul.f32 0.5, %v6285_v30  ;;  %v2887_v6 = vadd.f32 0.5, %v2567_v27  ;;  %v2568_v55 = vmul.f32 0.5, %v4696_v63 }
 0x168   : > { %8302 = vst [vmem:[#allocation43_spill] sm:$0xff] %v6463_v15  ;;  %1753 = vmatprep.mubr.f32.mxu0 %v8208_v18  ;;  %1914 = vmatprep.mubr.f32.mxu1 %v8208_v18  ;;  %v6472_v53 = vpop.f32.mrf.mxu0  ;;  %4723 = vtanh.f32 %v2007_v28  ;;  %v6499_v10 = vmul.f32 0.5, %v6287_v11  ;;  %v3205_v2 = vmul.f32 %v2885_v61, %v8256_v25  ;;  %v2886_v29 = vadd.f32 0.5, %v2566_v1  ;;  %v8315_v61 = vld [vmem:[#allocation32_spill] sm:$0xff] }
 0x169   : > { %8303 = vst [vmem:[#allocation44_spill] sm:$0xff] %v6472_v53  ;;  %v6474_v56 = vpop.f32.mrf.mxu1  ;;  %v2585_v12 = vmul.f32 0.5, %v4698_v17  ;;  %4725 = vtanh.f32 %v2006_v0 }
 0x16a   : > { %8304 = vst [vmem:[#allocation45_spill] sm:$0xff] %v6474_v56  ;;  %v6480_v13 = vpop.f32.mrf.mxu0  ;;  %4727 = vtanh.f32 %v2008_v4 }
 0x16b   : > { %8305 = vst [vmem:[#allocation46_spill] sm:$0xff] %v6480_v13  ;;  %v6482_v18 = vpop.f32.mrf.mxu1  ;;  %4464 = vmatmul.mubr.msk.f32.gmra.mxu0 %vm262_vm0, %v5216_v51  ;;  %4480 = vmatmul.mubr.msk.f32.gmra.mxu1 %vm262_vm0, %v5216_v51  ;;  %v4700_v51 = vpop.eup %4699  ;;  %4729 = vtanh.f32 %v2025_v35 }
 0x16c   : > { %8306 = vst [vmem:[#allocation47_spill] sm:$0xff] %v6482_v18  ;;  %v6491_v14 = vpop.f32.mrf.mxu0  ;;  %v4702_v45 = vpop.eup %4701  ;;  %v2888_v18 = vadd.f32 0.5, %v2568_v55  ;;  %v2587_v27 = vmul.f32 0.5, %v4700_v51  ;;  %4731 = vtanh.f32 %v2027_v46  ;;  %v8318_v55 = vld [vmem:[#allocation33_spill] sm:$0xff] }
 0x16d   : > { %8307 = vst [vmem:[#allocation48_spill] sm:$0xff] %v6491_v14  ;;  %v6493_v19 = vpop.f32.mrf.mxu1  ;;  %v4704_v13 = vpop.eup %4703  ;;  %v2586_v53 = vmul.f32 0.5, %v4702_v45  ;;  %4733 = vtanh.f32 %v2026_v48 }
 0x16e   : > { %8308 = vst [vmem:[#allocation49_spill] sm:$0xff] %v6493_v19  ;;  %v6501_v8 = vpop.f32.mrf.mxu0  ;;  %v8311_v19 = vld [vmem:[#allocation29_spill] sm:$0xff]  ;;  %v4706_v25 = vpop.eup %4705  ;;  %v3208_v1 = vmul.f32 %v2888_v18, %v8315_v61  ;;  %v2907_v0 = vadd.f32 0.5, %v2587_v27  ;;  %v2588_v17 = vmul.f32 0.5, %v4704_v13  ;;  %4735 = vtanh.f32 %v2028_v7  ;;  %v8322_v61 = vld [vmem:[#allocation35_spill] sm:$0xff] }
 0x16f   : > { %8309 = vst [vmem:[#allocation50_spill] sm:$0xff] %v6501_v8  ;;  %v6503_v60 = vpop.f32.mrf.mxu1  ;;  %v3207_v14 = vmul.f32 %v2887_v6, %v8311_v19  ;;  %v8314_v8 = vld [vmem:[#allocation31_spill] sm:$0xff]  ;;  %v4708_v4 = vpop.eup %4707  ;;  %4737 = vtanh.f32 %v6496_v58 }
 0x170   : > { %8310 = vst [vmem:[#allocation51_spill] sm:$0xff] %v6503_v60  ;;  %v6507_v28 = vpop.f32.mrf.mxu0  ;;  %v3206_v56 = vmul.f32 %v2886_v29, %v8314_v8  ;;  %v2905_v60 = vadd.f32 0.5, %v2585_v12  ;;  %v4710_v8 = vpop.eup %4709  ;;  %v8319_v29 = vld [vmem:[#allocation34_spill] sm:$0xff]  ;;  %v2908_v35 = vadd.f32 0.5, %v2588_v17  ;;  %v2607_v45 = vmul.f32 0.5, %v4708_v4 }
 0x171   : > { %8312 = vst [vmem:[#allocation29_spill] sm:$0xff] %v6507_v28  ;;  %v6509_v63 = vpop.f32.mrf.mxu1  ;;  %v2605_v28 = vmul.f32 0.5, %v4706_v25  ;;  %v3227_v12 = vmul.f32 %v2907_v0, %v8319_v29  ;;  %v4712_v46 = vpop.eup %4711  ;;  %v2606_v15 = vmul.f32 0.5, %v4710_v8  ;;  %v8323_v25 = vld [vmem:[#allocation36_spill] sm:$0xff]  ;;  %4739 = vtanh.f32 %v6499_v10 }
 0x172   : > { %8313 = vst [vmem:[#allocation52_spill] sm:$0xff] %v6509_v63  ;;  %v6513_v19 = vpop.f32.mrf.mxu0  ;;  %v3225_v51 = vmul.f32 %v2905_v60, %v8318_v55  ;;  %v2906_v63 = vadd.f32 0.5, %v2586_v53  ;;  %v4714_v60 = vpop.eup %4713  ;;  %v3228_v48 = vmul.f32 %v2908_v35, %v8323_v25  ;;  %v2927_v55 = vadd.f32 0.5, %v2607_v45 }
 0x173   : > { %8316 = vst [vmem:[#allocation31_spill] sm:$0xff] %v6513_v19  ;;  %v6515_v6 = vpop.f32.mrf.mxu1  ;;  %v2925_v19 = vadd.f32 0.5, %v2605_v28  ;;  %v3631_v53 = vadd.f32 %v3227_v12, %v3207_v14  ;;  %v2608_v11 = vmul.f32 0.5, %v4712_v46  ;;  %v4716_v7 = vpop.eup %4715 }
 0x174   : > { %8317 = vst [vmem:[#allocation32_spill] sm:$0xff] %v6515_v6  ;;  %v6519_v18 = vpop.f32.mrf.mxu0  ;;  %v3601_v27 = vadd.f32 %v3225_v51, %v3205_v2  ;;  %v3226_v6 = vmul.f32 %v2906_v63, %v8322_v61  ;;  %v2625_v2 = vmul.f32 0.5, %v4714_v60  ;;  %v4718_v51 = vpop.eup %4717  ;;  %v3646_v63 = vadd.f32 %v3228_v48, %v3208_v1 }
 0x175   : > { %8320 = vst [vmem:[#allocation33_spill] sm:$0xff] %v6519_v18  ;;  %v6521_v13 = vpop.f32.mrf.mxu1  ;;  %v3245_v29 = vmul.f32 %v2925_v19, %v6202_v5  ;;  %v3247_v28 = vmul.f32 %v2927_v55, %v8296_v34  ;;  %v2928_v8 = vadd.f32 0.5, %v2608_v11  ;;  %v2627_v14 = vmul.f32 0.5, %v4716_v7  ;;  %v4720_v45 = vpop.eup %4719 }
 0x176   : > { %8321 = vst [vmem:[#allocation34_spill] sm:$0xff] %v6521_v13  ;;  %v6525_v0 = vpop.f32.mrf.mxu0  ;;  %v3616_v4 = vadd.f32 %v3226_v6, %v3206_v56  ;;  %v2926_v13 = vadd.f32 0.5, %v2606_v15  ;;  %v2945_v25 = vadd.f32 0.5, %v2625_v2  ;;  %v2626_v56 = vmul.f32 0.5, %v4718_v51  ;;  %v4722_v6 = vpop.eup %4721 }
 0x177   : > { %8324 = vst [vmem:[#allocation35_spill] sm:$0xff] %v6525_v0  ;;  %v6527_v17 = vpop.f32.mrf.mxu1  ;;  %v3602_v46 = vadd.f32 %v3601_v27, %v3245_v29  ;;  %v3632_v5 = vadd.f32 %v3631_v53, %v3247_v28  ;;  %v3248_v15 = vmul.f32 %v2928_v8, %v6213_v22  ;;  %v2947_v19 = vadd.f32 0.5, %v2627_v14  ;;  %v4724_v34 = vpop.eup %4723 }
 0x178   : > { %8325 = vst [vmem:[#allocation36_spill] sm:$0xff] %v6527_v17  ;;  %v6531_v12 = vpop.f32.mrf.mxu0  ;;  %v3246_v61 = vmul.f32 %v2926_v13, %v6211_v24  ;;  %v2628_v1 = vmul.f32 0.5, %v4720_v45  ;;  %v3265_v55 = vmul.f32 %v2945_v25, %v6217_v31  ;;  %v2946_v7 = vadd.f32 0.5, %v2626_v56  ;;  %v4726_v29 = vpop.eup %4725 }
 0x179   : > { %8326 = vst [vmem:[#allocation53_spill] sm:$0xff] %v6531_v12  ;;  %v6533_v35 = vpop.f32.mrf.mxu1  ;;  %v2645_v27 = vmul.f32 0.5, %v4722_v6  ;;  %v3647_v24 = vadd.f32 %v3646_v63, %v3248_v15  ;;  %v3267_v13 = vmul.f32 %v2947_v19, %v6219_v23  ;;  %v2647_v53 = vmul.f32 0.5, %v4724_v34  ;;  %v4728_v28 = vpop.eup %4727 }
 0x17a   : > { %8327 = vst [vmem:[#allocation54_spill] sm:$0xff] %v6533_v35  ;;  %v6537_v60 = vpop.f32.mrf.mxu0  ;;  %v3617_v48 = vadd.f32 %v3616_v4, %v3246_v61  ;;  %v2948_v2 = vadd.f32 0.5, %v2628_v1  ;;  %v3603_v8 = vadd.f32 %v3602_v46, %v3265_v55  ;;  %v3266_v14 = vmul.f32 %v2946_v7, %v6228_v49  ;;  %v4730_v61 = vpop.eup %4729 }
 0x17b   : > { %8328 = vst [vmem:[#allocation55_spill] sm:$0xff] %v6537_v60  ;;  %v6539_v11 = vpop.f32.mrf.mxu1  ;;  %v2965_v45 = vadd.f32 0.5, %v2645_v27  ;;  %v2646_v4 = vmul.f32 0.5, %v4726_v29  ;;  %v3633_v31 = vadd.f32 %v3632_v5, %v3267_v13  ;;  %v2967_v56 = vadd.f32 0.5, %v2647_v53  ;;  %v4732_v15 = vpop.eup %4731 }
 0x17c   : > { %8329 = vst [vmem:[#allocation56_spill] sm:$0xff] %v6539_v11  ;;  %v6543_v51 = vpop.f32.mrf.mxu0  ;;  %v3268_v25 = vmul.f32 %v2948_v2, %v6230_v59  ;;  %v2648_v63 = vmul.f32 0.5, %v4728_v28  ;;  %v3618_v19 = vadd.f32 %v3617_v48, %v3266_v14  ;;  %v2665_v46 = vmul.f32 0.5, %v4730_v61  ;;  %v4734_v55 = vpop.eup %4733 }
 0x17d   : > { %8330 = vst [vmem:[#allocation57_spill] sm:$0xff] %v6543_v51  ;;  %v6545_v22 = vpop.f32.mrf.mxu1  ;;  %v3285_v1 = vmul.f32 %v2965_v45, %v6235_v50  ;;  %v2966_v34 = vadd.f32 0.5, %v2646_v4  ;;  %v3287_v7 = vmul.f32 %v2967_v56, %v6237_v21  ;;  %v2667_v5 = vmul.f32 0.5, %v4732_v15  ;;  %v4736_v13 = vpop.eup %4735 }
 0x17e   : > { %8331 = vst [vmem:[#allocation58_spill] sm:$0xff] %v6545_v22  ;;  %v6549_v6 = vpop.f32.mrf.mxu0  ;;  %v3648_v49 = vadd.f32 %v3647_v24, %v3268_v25  ;;  %v2968_v27 = vadd.f32 0.5, %v2648_v63  ;;  %v2985_v28 = vadd.f32 0.5, %v2665_v46  ;;  %v2666_v48 = vmul.f32 0.5, %v4734_v55  ;;  %v8338_v63 = vld [vmem:[#allocation30_spill] sm:$0xff] }
 0x17f   : > { %8332 = vst [vmem:[#allocation59_spill] sm:$0xff] %v6549_v6  ;;  %v6551_v23 = vpop.f32.mrf.mxu1  ;;  %v3604_v2 = vadd.f32 %v3603_v8, %v3285_v1  ;;  %v3286_v53 = vmul.f32 %v2966_v34, %v6250_v36  ;;  %v3634_v14 = vadd.f32 %v3633_v31, %v3287_v7  ;;  %v2987_v45 = vadd.f32 0.5, %v2667_v5  ;;  %v8339_v34 = vld [vmem:[#allocation10_spill] sm:$0xff] }
 0x180   : > { %8333 = vst [vmem:[#allocation60_spill] sm:$0xff] %v6551_v23  ;;  %v6555_v29 = vpop.f32.mrf.mxu0  ;;  %v3288_v50 = vmul.f32 %v2968_v27, %v6252_v3  ;;  %v2668_v4 = vmul.f32 0.5, %v4736_v13  ;;  %v3305_v25 = vmul.f32 %v2985_v28, %v6260_v9  ;;  %v2986_v56 = vadd.f32 0.5, %v2666_v48  ;;  %v8344_v5 = vld [vmem:[#allocation6_spill] sm:$0xff] }
 0x181   : > { %8334 = vst [vmem:[#allocation61_spill] sm:$0xff] %v6555_v29  ;;  %v6557_v59 = vpop.f32.mrf.mxu1  ;;  %v3619_v61 = vadd.f32 %v3618_v19, %v3286_v53  ;;  %v2046_v15 = vmul.f32 0.5, %v8338_v63  ;;  %v3307_v36 = vmul.f32 %v2987_v45, %v6262_v44  ;;  %v2048_v31 = vmul.f32 0.5, %v8339_v34 }
 0x182   : > { %8335 = vst [vmem:[#allocation62_spill] sm:$0xff] %v6557_v59  ;;  %v6561_v24 = vpop.f32.mrf.mxu0  ;;  %v3649_v8 = vadd.f32 %v3648_v49, %v3288_v50  ;;  %v2988_v1 = vadd.f32 0.5, %v2668_v4  ;;  %v6573_v55 = vadd.f32 %v3604_v2, %v3305_v25  ;;  %v3306_v7 = vmul.f32 %v2986_v56, %v6273_v47  ;;  %v8345_v47 = vld [vmem:[#allocation24_spill] sm:$0xff]  ;;  %v8351_v50 = vld [vmem:[#allocation26_spill] sm:$0xff]  ;;  %v8354_v25 = vld [vmem:[#allocation7_spill] sm:$0xff] }
 0x183   : > { %8336 = vst [vmem:[#allocation63_spill] sm:$0xff] %v6561_v24  ;;  %v6563_v21 = vpop.f32.mrf.mxu1  ;;  %v6577_v9 = vadd.f32 %v3634_v14, %v3307_v36  ;;  %4741 = vtanh.f32 %v2046_v15  ;;  %v2065_v13 = vmul.f32 0.5, %v8344_v5  ;;  %v2067_v58 = vmul.f32 0.5, %v8345_v47  ;;  %v8355_v15 = vld [vmem:[#allocation27_spill] sm:$0xff] }
 0x184   : > { %8337 = vst [vmem:[#allocation64_spill] sm:$0xff] %v6563_v21  ;;  %v6569_v46 = vpop.f32.mrf.mxu0  ;;  %v3308_v19 = vmul.f32 %v2988_v1, %v6275_v16  ;;  %v6585_v27 = vadd.f32 %v3619_v61, %v3306_v7  ;;  %4743 = vtanh.f32 %v2048_v31  ;;  %v8348_v16 = vld [vmem:[#allocation25_spill] sm:$0xff]  ;;  %v2068_v45 = vmul.f32 0.5, %v8351_v50  ;;  %v8358_v31 = vld [vmem:[#allocation28_spill] sm:$0xff] }
 0x185   : > { %8340 = vst [vmem:[#allocation30_spill] sm:$0xff] %v6569_v46  ;;  %v6571_v3 = vpop.f32.mrf.mxu1  ;;  %v2066_v10 = vmul.f32 0.5, %v8348_v16  ;;  %4745 = vtanh.f32 %v2065_v13  ;;  %v2085_v56 = vmul.f32 0.5, %v8354_v25  ;;  %v2086_v7 = vmul.f32 0.5, %v8358_v31 }
 0x186   : > { %8341 = vst [vmem:[#allocation10_spill] sm:$0xff] %v6571_v3  ;;  %v6581_v44 = vpop.f32.mrf.mxu0  ;;  %v6588_v2 = vadd.f32 %v3649_v8, %v3308_v19  ;;  %4747 = vtanh.f32 %v2067_v58  ;;  %v2087_v8 = vmul.f32 0.5, %v8355_v15  ;;  %v8359_v19 = vld [vmem:[#allocation11_spill] sm:$0xff]  ;;  %v6641_v22 = vmul.f32 0.5, %v6404_v39 }
 0x187   : > { %8342 = vst [vmem:[#allocation65_spill] sm:$0xff] %v6581_v44  ;;  %v6583_v49 = vpop.f32.mrf.mxu1  ;;  %4749 = vtanh.f32 %v2066_v10  ;;  %v2088_v13 = vmul.f32 0.5, %v8359_v19  ;;  %v6663_v51 = vmul.f32 0.5, %v6436_v62  ;;  %v6666_v18 = vmul.f32 0.5, %v6442_v54 }
 0x188   : > { %8343 = vst [vmem:[#allocation66_spill] sm:$0xff] %v6583_v49  ;;  %v6591_v53 = vpop.f32.mrf.mxu0  ;;  %4751 = vtanh.f32 %v2068_v45 }
 0x189   : > { %8346 = vst [vmem:[#allocation6_spill] sm:$0xff] %v6591_v53  ;;  %v6593_v28 = vpop.f32.mrf.mxu1  ;;  %4753 = vtanh.f32 %v2085_v56 }
 0x18a   : > { %8347 = vst [vmem:[#allocation24_spill] sm:$0xff] %v6593_v28  ;;  %v6596_v48 = vpop.f32.mrf.mxu0  ;;  %4755 = vtanh.f32 %v2087_v8  ;;  %v8370_v8 = vld [vmem:[#allocation16_spill] sm:$0xff] }
 0x18b   : > { %8349 = vst [vmem:[#allocation25_spill] sm:$0xff] %v6596_v48  ;;  %v6598_v14 = vpop.f32.mrf.mxu1  ;;  %v8363_v48 = vld [vmem:[#allocation13_spill] sm:$0xff]  ;;  %4757 = vtanh.f32 %v2086_v7  ;;  %v2125_v21 = vmul.f32 0.5, %v8370_v8 }
 0x18c   : > { %8350 = vst [vmem:[#allocation67_spill] sm:$0xff] %v6598_v14  ;;  %v6601_v4 = vpop.f32.mrf.mxu0  ;;  %v2107_v28 = vmul.f32 0.5, %v8363_v48  ;;  %4759 = vtanh.f32 %v2088_v13  ;;  %v2126_v13 = vmul.f32 0.5, %v6396_v57 }
 0x18d   : > { %8352 = vst [vmem:[#allocation26_spill] sm:$0xff] %v6601_v4  ;;  %v6603_v61 = vpop.f32.mrf.mxu1  ;;  %v4738_v4 = vpop.eup %4737 }
 0x18e   : > { %8353 = vst [vmem:[#allocation68_spill] sm:$0xff] %v6603_v61  ;;  %v6607_v36 = vpop.f32.mrf.mxu0  ;;  %v8362_v61 = vld [vmem:[#allocation12_spill] sm:$0xff]  ;;  %v4740_v45 = vpop.eup %4739  ;;  %v2685_v59 = vmul.f32 0.5, %v4738_v4 }
 0x18f   : > { %8356 = vst [vmem:[#allocation7_spill] sm:$0xff] %v6607_v36  ;;  %v6609_v1 = vpop.f32.mrf.mxu1  ;;  %v2105_v10 = vmul.f32 0.5, %v8362_v61  ;;  %v2687_v29 = vmul.f32 0.5, %v4740_v45  ;;  %v6657_v45 = vmul.f32 0.5, %v6423_v52 }
 0x190   : > { %8357 = vst [vmem:[#allocation27_spill] sm:$0xff] %v6609_v1  ;;  %v6613_v14 = vpop.f32.mrf.mxu0  ;;  %v8366_v1 = vld [vmem:[#allocation14_spill] sm:$0xff]  ;;  %v4742_v44 = vpop.eup %4741  ;;  %v3005_v11 = vadd.f32 0.5, %v2685_v59  ;;  %v6682_v59 = vmul.f32 0.5, %v6461_v43  ;;  %v8380_v43 = vld [vmem:[#allocation44_spill] sm:$0xff] }
 0x191   : > { %8360 = vst [vmem:[#allocation28_spill] sm:$0xff] %v6613_v14  ;;  %v6615_v58 = vpop.f32.mrf.mxu1  ;;  %v2106_v49 = vmul.f32 0.5, %v8366_v1  ;;  %v8367_v14 = vld [vmem:[#allocation15_spill] sm:$0xff]  ;;  %v4744_v46 = vpop.eup %4743  ;;  %4761 = vtanh.f32 %v2105_v10  ;;  %v2128_v10 = vmul.f32 0.5, %v6398_v32  ;;  %v3007_v60 = vadd.f32 0.5, %v2687_v29 }
 0x192   : > { %8361 = vst [vmem:[#allocation11_spill] sm:$0xff] %v6615_v58  ;;  %v6619_v53 = vpop.f32.mrf.mxu0  ;;  %v2108_v3 = vmul.f32 0.5, %v8367_v14  ;;  %4763 = vtanh.f32 %v2107_v28  ;;  %v4746_v23 = vpop.eup %4745  ;;  %v2688_v6 = vmul.f32 0.5, %v4744_v46 }
 0x193   : > { %8364 = vst [vmem:[#allocation12_spill] sm:$0xff] %v6619_v53  ;;  %v6621_v36 = vpop.f32.mrf.mxu1  ;;  %v8371_v53 = vld [vmem:[#allocation17_spill] sm:$0xff]  ;;  %4765 = vtanh.f32 %v2106_v49  ;;  %v4748_v28 = vpop.eup %4747  ;;  %v6647_v49 = vmul.f32 0.5, %v6415_v37  ;;  %v2705_v35 = vmul.f32 0.5, %v4746_v23  ;;  %v6676_v23 = vmul.f32 0.5, %v6455_v42 }
 0x194   : > { %8365 = vst [vmem:[#allocation13_spill] sm:$0xff] %v6621_v36  ;;  %v6625_v58 = vpop.f32.mrf.mxu0  ;;  %v2127_v24 = vmul.f32 0.5, %v8371_v53  ;;  %4767 = vtanh.f32 %v2108_v3  ;;  %v4750_v46 = vpop.eup %4749  ;;  %v6654_v3 = vmul.f32 0.5, %v6421_v40  ;;  %v2707_v17 = vmul.f32 0.5, %v4748_v28 }
 0x195   : > { %8368 = vst [vmem:[#allocation14_spill] sm:$0xff] %v6625_v58  ;;  %v6627_v56 = vpop.f32.mrf.mxu1  ;;  %v2686_v58 = vmul.f32 0.5, %v4742_v44  ;;  %4769 = vtanh.f32 %v2125_v21  ;;  %v2706_v0 = vmul.f32 0.5, %v4750_v46  ;;  %v3325_v21 = vmul.f32 %v3005_v11, %v6285_v30 }
 0x196   : > { %8369 = vst [vmem:[#allocation15_spill] sm:$0xff] %v6627_v56  ;;  %v6631_v36 = vpop.f32.mrf.mxu0  ;;  %v6638_v56 = vmul.f32 0.5, %v6402_v20  ;;  %4771 = vtanh.f32 %v2127_v24  ;;  %v3025_v28 = vadd.f32 0.5, %v2705_v35  ;;  %v3027_v42 = vadd.f32 0.5, %v2707_v17 }
 0x197   : > { %8372 = vst [vmem:[#allocation16_spill] sm:$0xff] %v6631_v36  ;;  %v6633_v7 = vpop.f32.mrf.mxu1  ;;  %v6660_v36 = vmul.f32 0.5, %v6434_v41  ;;  %v3006_v12 = vadd.f32 0.5, %v2686_v58  ;;  %4773 = vtanh.f32 %v2126_v13  ;;  %v6669_v41 = vmul.f32 0.5, %v6444_v33  ;;  %v8378_v58 = vld [vmem:[#allocation9_spill] sm:$0xff]  ;;  %v8379_v33 = vld [vmem:[#allocation43_spill] sm:$0xff] }
 0x198   : > { %8373 = vst [vmem:[#allocation17_spill] sm:$0xff] %v6633_v7  ;;  %v6644_v7 = vmul.f32 0.5, %v6413_v26  ;;  %v6649_v4 = vpop.f32.mrf.mxu0  ;;  %4775 = vtanh.f32 %v2128_v10  ;;  %v3327_v13 = vmul.f32 %v3007_v60, %v8378_v58  ;;  %v6689_v54 = vmul.f32 0.5, %v8379_v33  ;;  %v8381_v26 = vld [vmem:[#allocation45_spill] sm:$0xff]  ;;  %v8382_v60 = vld [vmem:[#allocation46_spill] sm:$0xff] }
 0x199   : > { %8374 = vst [vmem:[#allocation69_spill] sm:$0xff] %v6649_v4  ;;  %v6651_v44 = vpop.f32.mrf.mxu1  ;;  %v4752_v4 = vpop.eup %4751  ;;  %v3026_v40 = vadd.f32 0.5, %v2706_v0  ;;  %v6692_v37 = vmul.f32 0.5, %v8380_v43  ;;  %v6695_v30 = vmul.f32 0.5, %v8381_v26  ;;  %v6698_v35 = vmul.f32 0.5, %v8382_v60  ;;  %v8389_v58 = vld [vmem:[#allocation49_spill] sm:$0xff] }
 0x19a   : > { %8375 = vst [vmem:[#allocation70_spill] sm:$0xff] %v6651_v44  ;;  %v3008_v44 = vadd.f32 0.5, %v2688_v6  ;;  %v6671_v52 = vpop.f32.mrf.mxu0  ;;  %v4754_v29 = vpop.eup %4753  ;;  %v6679_v6 = vmul.f32 0.5, %v6457_v38  ;;  %v2708_v46 = vmul.f32 0.5, %v4752_v4  ;;  %v6711_v43 = vmul.f32 0.5, %v8389_v58 }
 0x19b   : > { %8376 = vst [vmem:[#allocation71_spill] sm:$0xff] %v6671_v52  ;;  %v6673_v62 = vpop.f32.mrf.mxu1  ;;  %v4756_v24 = vpop.eup %4755  ;;  %v2725_v17 = vmul.f32 0.5, %v4754_v29  ;;  %v3606_v33 = vadd.f32 %v6573_v55, %v3325_v21  ;;  %v3636_v60 = vadd.f32 %v6577_v9, %v3327_v13  ;;  %v3347_v20 = vmul.f32 %v3027_v42, %v8345_v47 }
 0x19c   : > { %8377 = vst [vmem:[#allocation72_spill] sm:$0xff] %v6673_v62  ;;  %v4758_v52 = vpop.eup %4757  ;;  %v3326_v62 = vmul.f32 %v3006_v12, %v8338_v63  ;;  %v3328_v10 = vmul.f32 %v3008_v44, %v8339_v34  ;;  %v6700_v11 = vpop.f32.mrf.mxu0  ;;  %v8385_v34 = vld [vmem:[#allocation47_spill] sm:$0xff]  ;;  %v8387_v44 = vld [vmem:[#allocation48_spill] sm:$0xff]  ;;  %8390 = vst [vmem:[#allocation76_spill] sm:$0xff] %v6711_v43  ;;  %v3028_v39 = vadd.f32 0.5, %v2708_v46  ;;  %v3346_v58 = vmul.f32 %v3026_v40, %v8348_v16 }
 0x19d   : > { %v4760_v38 = vpop.eup %4759  ;;  %8383 = vst [vmem:[#allocation9_spill] sm:$0xff] %v6700_v11  ;;  %v6702_v12 = vpop.f32.mrf.mxu1  ;;  %v6705_v4 = vmul.f32 0.5, %v8385_v34  ;;  %v6708_v0 = vmul.f32 0.5, %v8387_v44  ;;  %v3345_v11 = vmul.f32 %v3025_v28, %v8344_v5  ;;  %v2727_v44 = vmul.f32 0.5, %v4756_v24 }
 0x19e   : > { %8384 = vst [vmem:[#allocation73_spill] sm:$0xff] %v6702_v12  ;;  %v4762_v63 = vpop.eup %4761  ;;  %v3621_v29 = vadd.f32 %v6585_v27, %v3326_v62  ;;  %v3651_v34 = vadd.f32 %v6588_v2, %v3328_v10  ;;  %v2726_v43 = vmul.f32 0.5, %v4758_v52  ;;  %4777 = vtanh.f32 %v6638_v56  ;;  %v6721_v55 = vpop.f32.mrf.mxu0 }
 0x19f   : > { %8386 = vst [vmem:[#allocation74_spill] sm:$0xff] %v6705_v4  ;;  %8388 = vst [vmem:[#allocation75_spill] sm:$0xff] %v6708_v0  ;;  %v4764_v26 = vpop.eup %4763  ;;  %v2728_v4 = vmul.f32 0.5, %v4760_v38  ;;  %v6723_v9 = vpop.f32.mrf.mxu1  ;;  %v3045_v5 = vadd.f32 0.5, %v2725_v17  ;;  %v2745_v21 = vmul.f32 0.5, %v4762_v63  ;;  %4779 = vtanh.f32 %v6641_v22 }
 0x1a0   : > { %v4766_v12 = vpop.eup %4765  ;;  %8391 = vst [vmem:[#allocation77_spill] sm:$0xff] %v6721_v55  ;;  %8392 = vst [vmem:[#allocation78_spill] sm:$0xff] %v6723_v9  ;;  %v2747_v13 = vmul.f32 0.5, %v4764_v26  ;;  %v3607_v62 = vadd.f32 %v3606_v33, %v3345_v11  ;;  %v3348_v42 = vmul.f32 %v3028_v39, %v8351_v50  ;;  %4781 = vtanh.f32 %v6644_v7  ;;  %v6730_v26 = vpop.f32.mrf.mxu0 }
 0x1a1   : > { %v4768_v0 = vpop.eup %4767  ;;  %v2746_v27 = vmul.f32 0.5, %v4766_v12  ;;  %v3637_v52 = vadd.f32 %v3636_v60, %v3347_v20  ;;  %v3047_v38 = vadd.f32 0.5, %v2727_v44  ;;  %4783 = vtanh.f32 %v6647_v49  ;;  %8393 = vst [vmem:[#allocation79_spill] sm:$0xff] %v6730_v26  ;;  %v6732_v33 = vpop.f32.mrf.mxu1 }
 0x1a2   : > { %v4770_v40 = vpop.eup %4769  ;;  %v2748_v2 = vmul.f32 0.5, %v4768_v0  ;;  %v3622_v16 = vadd.f32 %v3621_v29, %v3346_v58  ;;  %v3046_v56 = vadd.f32 0.5, %v2726_v43  ;;  %v3048_v24 = vadd.f32 0.5, %v2728_v4  ;;  %8394 = vst [vmem:[#allocation80_spill] sm:$0xff] %v6732_v33 }
 0x1a3   : > { %v4772_v47 = vpop.eup %4771  ;;  %4785 = vtanh.f32 %v6654_v3  ;;  %v3365_v22 = vmul.f32 %v3045_v5, %v8354_v25  ;;  %v3065_v50 = vadd.f32 0.5, %v2745_v21  ;;  %v3067_v7 = vadd.f32 0.5, %v2747_v13  ;;  %v6744_v12 = vpop.f32.mrf.mxu1 }
 0x1a4   : > { %v4774_v39 = vpop.eup %4773  ;;  %4787 = vtanh.f32 %v6657_v45  ;;  %v3652_v28 = vadd.f32 %v3651_v34, %v3348_v42  ;;  %v3066_v49 = vadd.f32 0.5, %v2746_v27  ;;  %v2765_v46 = vmul.f32 0.5, %v4770_v40  ;;  %v6742_v45 = vpop.f32.mrf.mxu0  ;;  %8396 = vst [vmem:[#allocation82_spill] sm:$0xff] %v6744_v12 }
 0x1a5   : > { %v4776_v20 = vpop.eup %4775  ;;  %4789 = vtanh.f32 %v6660_v36  ;;  %v3367_v43 = vmul.f32 %v3047_v38, %v8355_v15  ;;  %v3068_v3 = vadd.f32 0.5, %v2748_v2  ;;  %v2767_v10 = vmul.f32 0.5, %v4772_v47  ;;  %8395 = vst [vmem:[#allocation81_spill] sm:$0xff] %v6742_v45 }
 0x1a6   : > { %4791 = vtanh.f32 %v6663_v51  ;;  %v3366_v60 = vmul.f32 %v3046_v56, %v8358_v31  ;;  %v3368_v25 = vmul.f32 %v3048_v24, %v8359_v19  ;;  %v2766_v11 = vmul.f32 0.5, %v4774_v39 }
 0x1a7   : > { %4793 = vtanh.f32 %v6666_v18  ;;  %v3385_v63 = vmul.f32 %v3065_v50, %v8362_v61  ;;  %v3387_v36 = vmul.f32 %v3067_v7, %v8363_v48  ;;  %v2768_v15 = vmul.f32 0.5, %v4776_v20  ;;  %v6754_v48 = vpop.f32.mrf.mxu0  ;;  %v8403_v7 = vld [vmem:[#allocation76_spill] sm:$0xff] }
 0x1a8   : > { %4795 = vtanh.f32 %v6669_v41  ;;  %v3608_v17 = vadd.f32 %v3607_v62, %v3365_v22  ;;  %v3386_v51 = vmul.f32 %v3066_v49, %v8366_v1  ;;  %v3085_v31 = vadd.f32 0.5, %v2765_v46  ;;  %8397 = vst [vmem:[#allocation83_spill] sm:$0xff] %v6754_v48  ;;  %v6756_v41 = vpop.f32.mrf.mxu1  ;;  %v8404_v49 = vld [vmem:[#allocation18_spill] sm:$0xff] }
 0x1a9   : > { %4797 = vtanh.f32 %v6676_v23  ;;  %v3638_v19 = vadd.f32 %v3637_v52, %v3367_v43  ;;  %v3388_v18 = vmul.f32 %v3068_v3, %v8367_v14  ;;  %v3087_v34 = vadd.f32 0.5, %v2767_v10  ;;  %8398 = vst [vmem:[#allocation84_spill] sm:$0xff] %v6756_v41 }
 0x1aa   : > { %4799 = vtanh.f32 %v6679_v6  ;;  %v3623_v4 = vadd.f32 %v3622_v16, %v3366_v60  ;;  %v3653_v44 = vadd.f32 %v3652_v28, %v3368_v25  ;;  %v3086_v61 = vadd.f32 0.5, %v2766_v11  ;;  %v8407_v11 = vld [vmem:[#allocation19_spill] sm:$0xff] }
 0x1ab   : > { %4801 = vtanh.f32 %v6682_v59  ;;  %v4778_v0 = vpop.eup %4777  ;;  %v3609_v1 = vadd.f32 %v3608_v17, %v3385_v63  ;;  %v3639_v58 = vadd.f32 %v3638_v19, %v3387_v36  ;;  %v3088_v29 = vadd.f32 0.5, %v2768_v15  ;;  %v8409_v19 = vld [vmem:[#allocation21_spill] sm:$0xff] }
 0x1ac   : > { %4803 = vtanh.f32 %v6689_v54  ;;  %v4780_v23 = vpop.eup %4779  ;;  %v3624_v14 = vadd.f32 %v3623_v4, %v3386_v51  ;;  %v3405_v5 = vmul.f32 %v3085_v31, %v8370_v8  ;;  %v2785_v6 = vmul.f32 0.5, %v4778_v0  ;;  %v6765_v54 = vpop.f32.mrf.mxu0  ;;  %v8408_v51 = vld [vmem:[#allocation20_spill] sm:$0xff] }
 0x1ad   : > { %4805 = vtanh.f32 %v6692_v37  ;;  %v4782_v21 = vpop.eup %4781  ;;  %v3654_v13 = vadd.f32 %v3653_v44, %v3388_v18  ;;  %v3407_v59 = vmul.f32 %v3087_v34, %v8371_v53  ;;  %v2787_v62 = vmul.f32 0.5, %v4780_v23  ;;  %8399 = vst [vmem:[#allocation85_spill] sm:$0xff] %v6765_v54  ;;  %v6767_v8 = vpop.f32.mrf.mxu1  ;;  %v8401_v53 = vld [vmem:[#allocation74_spill] sm:$0xff] }
 0x1ae   : > { %4807 = vtanh.f32 %v6695_v30  ;;  %v4784_v42 = vpop.eup %4783  ;;  %v3406_v27 = vmul.f32 %v3086_v61, %v6396_v57  ;;  %v3105_v40 = vadd.f32 0.5, %v2785_v6  ;;  %v2786_v52 = vmul.f32 0.5, %v4782_v21  ;;  %8400 = vst [vmem:[#allocation86_spill] sm:$0xff] %v6767_v8  ;;  %v8402_v57 = vld [vmem:[#allocation75_spill] sm:$0xff]  ;;  %v6774_v3 = vpop.f32.mrf.mxu0  ;;  %v8410_v61 = vld [vmem:[#allocation22_spill] sm:$0xff] }
 0x1af   : > { %4809 = vtanh.f32 %v6698_v35  ;;  %v3408_v37 = vmul.f32 %v3088_v29, %v6398_v32  ;;  %v3107_v2 = vadd.f32 0.5, %v2787_v62  ;;  %v2788_v47 = vmul.f32 0.5, %v4784_v42  ;;  %8405 = vst [vmem:[#allocation74_spill] sm:$0xff] %v6774_v3  ;;  %v6776_v10 = vpop.f32.mrf.mxu1  ;;  %v8412_v6 = vld [vmem:[#allocation23_spill] sm:$0xff] }
 0x1b0   : > { %v4786_v38 = vpop.eup %4785  ;;  %4811 = vtanh.f32 %v8401_v53  ;;  %v3610_v30 = vadd.f32 %v3609_v1, %v3405_v5  ;;  %v3106_v56 = vadd.f32 0.5, %v2786_v52  ;;  %v3640_v22 = vadd.f32 %v3639_v58, %v3407_v59  ;;  %8406 = vst [vmem:[#allocation75_spill] sm:$0xff] %v6776_v10  ;;  %v8411_v1 = vld [vmem:[#allocation8_spill] sm:$0xff]  ;;  %v6784_v62 = vpop.f32.mrf.mxu0  ;;  %v8415_v52 = vld [vmem:[#allocation38_spill] sm:$0xff] }
 0x1b1   : > { %v4788_v16 = vpop.eup %4787  ;;  %v2805_v24 = vmul.f32 0.5, %v4786_v38  ;;  %4813 = vtanh.f32 %v8402_v57  ;;  %v3108_v35 = vadd.f32 0.5, %v2788_v47  ;;  %v3625_v28 = vadd.f32 %v3624_v14, %v3406_v27  ;;  %8413 = vst [vmem:[#allocation76_spill] sm:$0xff] %v6784_v62  ;;  %v6786_v42 = vpop.f32.mrf.mxu1 }
 0x1b2   : > { %v4790_v39 = vpop.eup %4789  ;;  %v2807_v50 = vmul.f32 0.5, %v4788_v16  ;;  %4815 = vtanh.f32 %v8403_v7  ;;  %v3425_v32 = vmul.f32 %v3105_v40, %v8404_v49  ;;  %v3655_v25 = vadd.f32 %v3654_v13, %v3408_v37  ;;  %8414 = vst [vmem:[#allocation18_spill] sm:$0xff] %v6786_v42  ;;  %v8416_v49 = vld [vmem:[#allocation37_spill] sm:$0xff] }
 0x1b3   : > { %v4792_v20 = vpop.eup %4791  ;;  %v3125_v46 = vadd.f32 0.5, %v2805_v24  ;;  %v2806_v43 = vmul.f32 0.5, %v4790_v39  ;;  %v3427_v63 = vmul.f32 %v3107_v2, %v8407_v11  ;;  %v3426_v31 = vmul.f32 %v3106_v56, %v8408_v51  ;;  %v8420_v51 = vld [vmem:[#allocation40_spill] sm:$0xff] }
 0x1b4   : > { %v4794_v60 = vpop.eup %4793  ;;  %v3127_v36 = vadd.f32 0.5, %v2807_v50  ;;  %v2808_v15 = vmul.f32 0.5, %v4792_v20  ;;  %v3428_v18 = vmul.f32 %v3108_v35, %v8409_v19  ;;  %v3611_v5 = vadd.f32 %v3610_v30, %v3425_v32  ;;  %v8421_v19 = vld [vmem:[#allocation42_spill] sm:$0xff] }
 0x1b5   : > { %v4796_v17 = vpop.eup %4795  ;;  %v3126_v34 = vadd.f32 0.5, %v2806_v43  ;;  %v2825_v4 = vmul.f32 0.5, %v4794_v60  ;;  %v3445_v0 = vmul.f32 %v3125_v46, %v8410_v61  ;;  %v3641_v40 = vadd.f32 %v3640_v22, %v3427_v63  ;;  %v6790_v43 = vpop.f32.mrf.mxu0  ;;  %v8422_v61 = vld [vmem:[#allocation41_spill] sm:$0xff] }
 0x1b6   : > { %v4798_v44 = vpop.eup %4797  ;;  %v3447_v58 = vmul.f32 %v3127_v36, %v8411_v1  ;;  %v3128_v29 = vadd.f32 0.5, %v2808_v15  ;;  %v2827_v23 = vmul.f32 0.5, %v4796_v17  ;;  %v3626_v53 = vadd.f32 %v3625_v28, %v3426_v31  ;;  %8417 = vst [vmem:[#allocation19_spill] sm:$0xff] %v6790_v43  ;;  %v6792_v60 = vpop.f32.mrf.mxu1  ;;  %v8423_v1 = vld [vmem:[#allocation43_spill] sm:$0xff]  ;;  %v8474_v43 = vld [vmem:[#allocation26_spill] sm:$0xff] }
 0x1b7   : > { %v4800_v14 = vpop.eup %4799  ;;  %v3446_v21 = vmul.f32 %v3126_v34, %v8412_v6  ;;  %v3145_v13 = vadd.f32 0.5, %v2825_v4  ;;  %v2826_v59 = vmul.f32 0.5, %v4798_v44  ;;  %v3656_v16 = vadd.f32 %v3655_v25, %v3428_v18  ;;  %8418 = vst [vmem:[#allocation20_spill] sm:$0xff] %v6792_v60  ;;  %v8419_v25 = vld [vmem:[#allocation39_spill] sm:$0xff]  ;;  %v8424_v6 = vld [vmem:[#allocation44_spill] sm:$0xff] }
 0x1b8   : > { %v4802_v27 = vpop.eup %4801  ;;  %v3448_v38 = vmul.f32 %v3128_v29, %v8415_v52  ;;  %v3147_v37 = vadd.f32 0.5, %v2827_v23  ;;  %v2828_v2 = vmul.f32 0.5, %v4800_v14  ;;  %v3612_v57 = vadd.f32 %v3611_v5, %v3445_v0 }
 0x1b9   : > { %v4804_v47 = vpop.eup %4803  ;;  %v3146_v56 = vadd.f32 0.5, %v2826_v59  ;;  %v2845_v24 = vmul.f32 0.5, %v4802_v27  ;;  %v3642_v39 = vadd.f32 %v3641_v40, %v3447_v58  ;;  %v3627_v20 = vadd.f32 %v3626_v53, %v3446_v21  ;;  %v6800_v27 = vpop.f32.mrf.mxu0 }
 0x1ba   : > { %v4806_v30 = vpop.eup %4805  ;;  %v3148_v35 = vadd.f32 0.5, %v2828_v2  ;;  %v2847_v50 = vmul.f32 0.5, %v4804_v47  ;;  %v3465_v32 = vmul.f32 %v3145_v13, %v8416_v49  ;;  %v3657_v28 = vadd.f32 %v3656_v16, %v3448_v38  ;;  %8425 = vst [vmem:[#allocation21_spill] sm:$0xff] %v6800_v27  ;;  %v6802_v40 = vpop.f32.mrf.mxu1  ;;  %v8427_v38 = vld [vmem:[#allocation45_spill] sm:$0xff]  ;;  %v8473_v27 = vld [vmem:[#allocation67_spill] sm:$0xff] }
 0x1bb   : > { %v4808_v7 = vpop.eup %4807  ;;  %v3165_v46 = vadd.f32 0.5, %v2845_v24  ;;  %v2846_v22 = vmul.f32 0.5, %v4806_v30  ;;  %v3467_v63 = vmul.f32 %v3147_v37, %v8419_v25  ;;  %v3466_v31 = vmul.f32 %v3146_v56, %v8420_v51  ;;  %8426 = vst [vmem:[#allocation22_spill] sm:$0xff] %v6802_v40  ;;  %v8428_v56 = vld [vmem:[#allocation46_spill] sm:$0xff]  ;;  %v8430_v25 = vld [vmem:[#allocation48_spill] sm:$0xff]  ;;  %v8433_v51 = vld [vmem:[#allocation49_spill] sm:$0xff] }
 0x1bc   : > { %v4810_v11 = vpop.eup %4809  ;;  %v3167_v36 = vadd.f32 0.5, %v2847_v50  ;;  %v2848_v15 = vmul.f32 0.5, %v4808_v7  ;;  %v3468_v0 = vmul.f32 %v3148_v35, %v8422_v61  ;;  %v3613_v5 = vadd.f32 %v3612_v57, %v3465_v32  ;;  %v3525_v50 = vld [vmem:[#allocation2 + $0x30] sm:$0xff] }
 0x1bd   : > { %v4812_v17 = vpop.eup %4811  ;;  %v3485_v18 = vmul.f32 %v3165_v46, %v8421_v19  ;;  %v3166_v34 = vadd.f32 0.5, %v2846_v22  ;;  %v2865_v4 = vmul.f32 0.5, %v4810_v11  ;;  %v3643_v52 = vadd.f32 %v3642_v39, %v3467_v63  ;;  %v8429_v7 = vld [vmem:[#allocation47_spill] sm:$0xff]  ;;  %v3527_v11 = vld [vmem:[#allocation2 + $0x78] sm:$0xff]  ;;  %v6808_v63 = vpop.f32.mrf.mxu0 }
 0x1be   : > { %v4814_v44 = vpop.eup %4813  ;;  %v3487_v58 = vmul.f32 %v3167_v36, %v8423_v1  ;;  %v3168_v29 = vadd.f32 0.5, %v2848_v15  ;;  %v2867_v23 = vmul.f32 0.5, %v4812_v17  ;;  %v3628_v53 = vadd.f32 %v3627_v20, %v3466_v31  ;;  %8431 = vst [vmem:[#allocation8_spill] sm:$0xff] %v6808_v63  ;;  %v6810_v36 = vpop.f32.mrf.mxu1  ;;  %v3526_v17 = vld [vmem:[#allocation2 + $0x68] sm:$0xff] }
 0x1bf   : > { %v4816_v14 = vpop.eup %4815  ;;  %v3486_v21 = vmul.f32 %v3166_v34, %v8424_v6  ;;  %v3185_v13 = vadd.f32 0.5, %v2865_v4  ;;  %v2866_v59 = vmul.f32 0.5, %v4814_v44  ;;  %v3614_v16 = vadd.f32 %v3613_v5, %v3485_v18  ;;  %8432 = vst [vmem:[#allocation23_spill] sm:$0xff] %v6810_v36  ;;  %v3528_v18 = vld [vmem:[#allocation2 + $0x80] sm:$0xff]  ;;  %v6813_v61 = vpop.f32.mrf.mxu0 }
 0x1c0   : > { %v3488_v37 = vmul.f32 %v3168_v29, %v8427_v38  ;;  %v3187_v2 = vadd.f32 0.5, %v2867_v23  ;;  %v2868_v47 = vmul.f32 0.5, %v4816_v14  ;;  %v3658_v35 = vadd.f32 %v3657_v28, %v3468_v0  ;;  %8434 = vst [vmem:[#allocation38_spill] sm:$0xff] %v6813_v61  ;;  %v6815_v0 = vpop.f32.mrf.mxu1  ;;  %v8437_v23 = vld [vmem:[#allocation51_spill] sm:$0xff]  ;;  %v8442_v38 = vld [vmem:[#allocation52_spill] sm:$0xff]  ;;  %v8470_v61 = vld [vmem:[#allocation6_spill] sm:$0xff] }
 0x1c1   : > { %v3505_v24 = vmul.f32 %v3185_v13, %v8428_v56  ;;  %v3186_v30 = vadd.f32 0.5, %v2866_v59  ;;  %v3644_v57 = vadd.f32 %v3643_v52, %v3487_v58  ;;  %v3629_v46 = vadd.f32 %v3628_v53, %v3486_v21  ;;  %8435 = vst [vmem:[#allocation37_spill] sm:$0xff] %v6815_v0  ;;  %v8436_v58 = vld [vmem:[#allocation50_spill] sm:$0xff]  ;;  %v6819_v5 = vpop.f32.mrf.mxu0  ;;  %v8440_v21 = vld [vmem:[#allocation29_spill] sm:$0xff]  ;;  %v8441_v59 = vld [vmem:[#allocation31_spill] sm:$0xff] }
 0x1c2   : > { %v3507_v49 = vmul.f32 %v3187_v2, %v8429_v7  ;;  %v3188_v32 = vadd.f32 0.5, %v2868_v47  ;;  %v3659_v20 = vadd.f32 %v3658_v35, %v3488_v37  ;;  %v1929_v29 = vmul.f32 0.5, %v8436_v58  ;;  %8438 = vst [vmem:[#allocation39_spill] sm:$0xff] %v6819_v5  ;;  %v6821_v6 = vpop.f32.mrf.mxu1  ;;  %v8443_v2 = vld [vmem:[#allocation32_spill] sm:$0xff]  ;;  %v8446_v56 = vld [vmem:[#allocation33_spill] sm:$0xff]  ;;  %v8469_v0 = vld [vmem:[#allocation66_spill] sm:$0xff] }
 0x1c3   : > { %v3615_v22 = vadd.f32 %v3614_v16, %v3505_v24  ;;  %v3506_v39 = vmul.f32 %v3186_v30, %v8430_v25  ;;  %v1931_v14 = vmul.f32 0.5, %v8437_v23  ;;  %8439 = vst [vmem:[#allocation40_spill] sm:$0xff] %v6821_v6  ;;  %v1930_v13 = vmul.f32 0.5, %v8440_v21  ;;  %v6827_v53 = vpop.f32.mrf.mxu0  ;;  %v8447_v30 = vld [vmem:[#allocation34_spill] sm:$0xff]  ;;  %v8449_v7 = vld [vmem:[#allocation36_spill] sm:$0xff] }
 0x1c4   : > { %v3645_v15 = vadd.f32 %v3644_v57, %v3507_v49  ;;  %v3508_v31 = vmul.f32 %v3188_v32, %v8433_v51  ;;  %v1949_v52 = vmul.f32 0.5, %v8441_v59  ;;  %4817 = vtanh.f32 %v1929_v29  ;;  %8444 = vst [vmem:[#allocation42_spill] sm:$0xff] %v6827_v53  ;;  %v6829_v16 = vpop.f32.mrf.mxu1  ;;  %v8448_v57 = vld [vmem:[#allocation35_spill] sm:$0xff]  ;;  %v8453_v25 = vld [vmem:[#allocation54_spill] sm:$0xff]  ;;  %v8460_v29 = vld [vmem:[#allocation61_spill] sm:$0xff] }
 0x1c5   : > { %v3845_v28 = vadd.f32 %v3615_v22, %v3525_v50  ;;  %v3630_v19 = vadd.f32 %v3629_v46, %v3506_v39  ;;  %v1932_v37 = vmul.f32 0.5, %v8442_v38  ;;  %4819 = vtanh.f32 %v1931_v14  ;;  %8445 = vst [vmem:[#allocation41_spill] sm:$0xff] %v6829_v16  ;;  %v6835_v32 = vpop.f32.mrf.mxu0  ;;  %v8452_v22 = vld [vmem:[#allocation53_spill] sm:$0xff]  ;;  %v8467_v53 = vld [vmem:[#allocation10_spill] sm:$0xff] }
 0x1c6   : > { %v3847_v34 = vadd.f32 %v3645_v15, %v3527_v11  ;;  %v3660_v4 = vadd.f32 %v3659_v20, %v3508_v31  ;;  %v1951_v47 = vmul.f32 0.5, %v8443_v2  ;;  %4821 = vtanh.f32 %v1930_v13  ;;  %8450 = vst [vmem:[#allocation43_spill] sm:$0xff] %v6835_v32  ;;  %v6837_v46 = vpop.f32.mrf.mxu1  ;;  %v8454_v20 = vld [vmem:[#allocation55_spill] sm:$0xff]  ;;  %v8456_v31 = vld [vmem:[#allocation57_spill] sm:$0xff]  ;;  %v8461_v13 = vld [vmem:[#allocation62_spill] sm:$0xff] }
 0x1c7   : > { %3865 = vst [vmem:[#allocation2 + $0x30] sm:$0xff] %v3845_v28  ;;  %v3846_v44 = vadd.f32 %v3630_v19, %v3526_v17  ;;  %v1950_v24 = vmul.f32 0.5, %v8446_v56  ;;  %4823 = vtanh.f32 %v1949_v52  ;;  %v1952_v35 = vmul.f32 0.5, %v8447_v30  ;;  %8451 = vst [vmem:[#allocation44_spill] sm:$0xff] %v6837_v46  ;;  %v8455_v17 = vld [vmem:[#allocation56_spill] sm:$0xff]  ;;  %v8457_v19 = vld [vmem:[#allocation58_spill] sm:$0xff]  ;;  %v6859_v46 = vpop.f32.mrf.mxu0 }
 0x1c8   : > { %3867 = vst [vmem:[#allocation2 + $0x78] sm:$0xff] %v3847_v34  ;;  %v3848_v1 = vadd.f32 %v3660_v4, %v3528_v18  ;;  %4825 = vtanh.f32 %v1932_v37  ;;  %v1969_v50 = vmul.f32 0.5, %v8448_v57  ;;  %v1971_v49 = vmul.f32 0.5, %v8449_v7  ;;  %v8458_v34 = vld [vmem:[#allocation59_spill] sm:$0xff]  ;;  %8464 = vst [vmem:[#allocation45_spill] sm:$0xff] %v6859_v46  ;;  %v8466_v32 = vld [vmem:[#allocation30_spill] sm:$0xff] }
 0x1c9   : > { %3866 = vst [vmem:[#allocation2 + $0x68] sm:$0xff] %v3846_v44  ;;  %4827 = vtanh.f32 %v1951_v47  ;;  %v1970_v11 = vmul.f32 0.5, %v8452_v22  ;;  %v1972_v39 = vmul.f32 0.5, %v8453_v25  ;;  %v1989_v15 = vmul.f32 0.5, %v8454_v20  ;;  %v8459_v44 = vld [vmem:[#allocation60_spill] sm:$0xff]  ;;  %v8462_v37 = vld [vmem:[#allocation63_spill] sm:$0xff] }
 0x1ca   : > { %3868 = vst [vmem:[#allocation2 + $0x80] sm:$0xff] %v3848_v1  ;;  %4829 = vtanh.f32 %v1950_v24  ;;  %v1991_v51 = vmul.f32 0.5, %v8455_v17  ;;  %v1990_v28 = vmul.f32 0.5, %v8456_v31  ;;  %v1992_v18 = vmul.f32 0.5, %v8457_v19  ;;  %v8463_v24 = vld [vmem:[#allocation64_spill] sm:$0xff] }
 0x1cb   : > { %4831 = vtanh.f32 %v1952_v35  ;;  %v2009_v4 = vmul.f32 0.5, %v8458_v34  ;;  %v2011_v1 = vmul.f32 0.5, %v8459_v44  ;;  %v6848_v14 = vmul.f32 0.5, %v8460_v29  ;;  %v8471_v46 = vld [vmem:[#allocation24_spill] sm:$0xff]  ;;  %v8487_v44 = vld [vmem:[#allocation13_spill] sm:$0xff] }
 0x1cc   : > { %4833 = vtanh.f32 %v1969_v50  ;;  %v6851_v52 = vmul.f32 0.5, %v8461_v13  ;;  %v6854_v47 = vmul.f32 0.5, %v8462_v37  ;;  %v6857_v35 = vmul.f32 0.5, %v8463_v24  ;;  %v6861_v50 = vpop.f32.mrf.mxu1  ;;  %v8481_v37 = vld [vmem:[#allocation28_spill] sm:$0xff] }
 0x1cd   : > { %4835 = vtanh.f32 %v1971_v49  ;;  %8465 = vst [vmem:[#allocation46_spill] sm:$0xff] %v6861_v50  ;;  %v6864_v16 = vmul.f32 0.5, %v8466_v32  ;;  %v6867_v6 = vmul.f32 0.5, %v8467_v53  ;;  %v8468_v49 = vld [vmem:[#allocation65_spill] sm:$0xff]  ;;  %v6873_v36 = vmul.f32 0.5, %v8469_v0  ;;  %v8475_v0 = vld [vmem:[#allocation68_spill] sm:$0xff] }
 0x1ce   : > { %4837 = vtanh.f32 %v1970_v11  ;;  %v6870_v5 = vmul.f32 0.5, %v8468_v49  ;;  %v6876_v63 = vmul.f32 0.5, %v8470_v61  ;;  %v6879_v40 = vmul.f32 0.5, %v8471_v46  ;;  %v8472_v11 = vld [vmem:[#allocation25_spill] sm:$0xff]  ;;  %v8476_v61 = vld [vmem:[#allocation7_spill] sm:$0xff] }
 0x1cf   : > { %4839 = vtanh.f32 %v1972_v39  ;;  %v6882_v50 = vmul.f32 0.5, %v8472_v11  ;;  %v6885_v60 = vmul.f32 0.5, %v8473_v27  ;;  %v6888_v49 = vmul.f32 0.5, %v8474_v43  ;;  %v8477_v46 = vld [vmem:[#allocation27_spill] sm:$0xff]  ;;  %v6901_v11 = vpop.f32.mrf.mxu1 }
 0x1d0   : > { %4841 = vtanh.f32 %v1989_v15  ;;  %v6891_v53 = vmul.f32 0.5, %v8475_v0  ;;  %v6894_v32 = vmul.f32 0.5, %v8476_v61  ;;  %v6897_v24 = vmul.f32 0.5, %v8477_v46  ;;  %v6899_v15 = vpop.f32.mrf.mxu0  ;;  %8480 = vst [vmem:[#allocation49_spill] sm:$0xff] %v6901_v11  ;;  %v8483_v43 = vld [vmem:[#allocation11_spill] sm:$0xff]  ;;  %v8489_v46 = vld [vmem:[#allocation14_spill] sm:$0xff] }
 0x1d1   : > { %v4818_v39 = vpop.eup %4817  ;;  %4843 = vtanh.f32 %v1991_v51  ;;  %8479 = vst [vmem:[#allocation48_spill] sm:$0xff] %v6899_v15  ;;  %v6904_v13 = vmul.f32 0.5, %v8481_v37  ;;  %v6907_v29 = vmul.f32 0.5, %v8483_v43  ;;  %v8485_v51 = vld [vmem:[#allocation12_spill] sm:$0xff]  ;;  %v6913_v61 = vmul.f32 0.5, %v8487_v44  ;;  %v8491_v15 = vld [vmem:[#allocation15_spill] sm:$0xff] }
 0x1d2   : > { %8478 = vst [vmem:[#allocation47_spill] sm:$0xff] %v6897_v24  ;;  %v4820_v27 = vpop.eup %4819  ;;  %v6910_v0 = vmul.f32 0.5, %v8485_v51  ;;  %v6916_v19 = vmul.f32 0.5, %v8489_v46  ;;  %v6919_v31 = vmul.f32 0.5, %v8491_v15  ;;  %v8493_v11 = vld [vmem:[#allocation16_spill] sm:$0xff]  ;;  %v8495_v37 = vld [vmem:[#allocation17_spill] sm:$0xff]  ;;  %4845 = vtanh.f32 %v1990_v28  ;;  %v6945_v28 = vpop.f32.mrf.mxu0 }
 0x1d3   : > { %8482 = vst [vmem:[#allocation50_spill] sm:$0xff] %v6904_v13  ;;  %8484 = vst [vmem:[#allocation51_spill] sm:$0xff] %v6907_v29  ;;  %v4822_v34 = vpop.eup %4821  ;;  %v6922_v24 = vmul.f32 0.5, %v8493_v11  ;;  %v6925_v13 = vmul.f32 0.5, %v8495_v37  ;;  %v8497_v51 = vld [vmem:[#allocation69_spill] sm:$0xff]  ;;  %v8498_v44 = vld [vmem:[#allocation70_spill] sm:$0xff]  ;;  %4847 = vtanh.f32 %v1992_v18 }
 0x1d4   : > { %8486 = vst [vmem:[#allocation29_spill] sm:$0xff] %v6910_v0  ;;  %8488 = vst [vmem:[#allocation31_spill] sm:$0xff] %v6913_v61  ;;  %v4824_v43 = vpop.eup %4823  ;;  %v6928_v0 = vmul.f32 0.5, %v8497_v51  ;;  %v6931_v61 = vmul.f32 0.5, %v8498_v44  ;;  %v8499_v29 = vld [vmem:[#allocation71_spill] sm:$0xff]  ;;  %v8500_v15 = vld [vmem:[#allocation72_spill] sm:$0xff]  ;;  %v6947_v51 = vpop.f32.mrf.mxu1  ;;  %4849 = vtanh.f32 %v2009_v4 }
 0x1d5   : > { %8490 = vst [vmem:[#allocation52_spill] sm:$0xff] %v6916_v19  ;;  %8492 = vst [vmem:[#allocation32_spill] sm:$0xff] %v6919_v31  ;;  %v6934_v46 = vmul.f32 0.5, %v8499_v29  ;;  %v4826_v19 = vpop.eup %4825  ;;  %v6937_v31 = vmul.f32 0.5, %v8500_v15  ;;  %v8501_v11 = vld [vmem:[#allocation9_spill] sm:$0xff]  ;;  %v6950_v29 = vmul.f32 0.5, %v6721_v55  ;;  %4851 = vtanh.f32 %v2011_v1 }
 0x1d6   : > { %8494 = vst [vmem:[#allocation33_spill] sm:$0xff] %v6922_v24  ;;  %8496 = vst [vmem:[#allocation34_spill] sm:$0xff] %v6925_v13  ;;  %v6940_v24 = vmul.f32 0.5, %v8501_v11  ;;  %v8503_v37 = vld [vmem:[#allocation73_spill] sm:$0xff]  ;;  %v4828_v44 = vpop.eup %4827  ;;  %v6953_v18 = vmul.f32 0.5, %v6723_v9  ;;  %v6956_v15 = vmul.f32 0.5, %v6730_v26  ;;  %4853 = vtanh.f32 %v6848_v14 }
 0x1d7   : > { %v6943_v13 = vmul.f32 0.5, %v8503_v37  ;;  %8504 = vst [vmem:[#allocation36_spill] sm:$0xff] %v6945_v28  ;;  %8505 = vst [vmem:[#allocation53_spill] sm:$0xff] %v6947_v51  ;;  %v4830_v11 = vpop.eup %4829  ;;  %v6959_v37 = vmul.f32 0.5, %v6732_v33  ;;  %v6962_v28 = vmul.f32 0.5, %v6742_v45  ;;  %v6965_v4 = vmul.f32 0.5, %v6744_v12  ;;  %v6977_v45 = vpop.f32.mrf.mxu0 }
 0x1d8   : > { %8502 = vst [vmem:[#allocation35_spill] sm:$0xff] %v6940_v24  ;;  %v2589_v24 = vmul.f32 0.5, %v4824_v43  ;;  %v4832_v51 = vpop.eup %4831  ;;  %v6968_v55 = vmul.f32 0.5, %v6754_v48  ;;  %v6971_v9 = vmul.f32 0.5, %v6756_v41  ;;  %v6974_v26 = vmul.f32 0.5, %v6765_v54  ;;  %8510 = vst [vmem:[#allocation88_spill] sm:$0xff] %v6977_v45 }
 0x1d9   : > { %8506 = vst [vmem:[#allocation54_spill] sm:$0xff] %v6959_v37  ;;  %8507 = vst [vmem:[#allocation55_spill] sm:$0xff] %v6962_v28  ;;  %v4834_v43 = vpop.eup %4833  ;;  %v2569_v1 = vmul.f32 0.5, %v4818_v39  ;;  %v2571_v33 = vmul.f32 0.5, %v4820_v27  ;;  %v2570_v37 = vmul.f32 0.5, %v4822_v34  ;;  %v6979_v28 = vpop.f32.mrf.mxu1  ;;  %v2591_v48 = vmul.f32 0.5, %v4828_v44 }
 0x1da   : > { %8508 = vst [vmem:[#allocation56_spill] sm:$0xff] %v6965_v4  ;;  %8509 = vst [vmem:[#allocation87_spill] sm:$0xff] %v6974_v26  ;;  %v4836_v12 = vpop.eup %4835  ;;  %v2572_v4 = vmul.f32 0.5, %v4826_v19  ;;  %4855 = vtanh.f32 %v6851_v52  ;;  %v6983_v41 = vmul.f32 0.5, %v6767_v8  ;;  %v2909_v26 = vadd.f32 0.5, %v2589_v24  ;;  %v7000_v45 = vpop.f32.mrf.mxu0 }
 0x1db   : > { %8511 = vst [vmem:[#allocation89_spill] sm:$0xff] %v6979_v28  ;;  %v4838_v54 = vpop.eup %4837  ;;  %4857 = vtanh.f32 %v6854_v47  ;;  %v6987_v27 = vmul.f32 0.5, %v6774_v3  ;;  %v6990_v34 = vmul.f32 0.5, %v6776_v10  ;;  %v2590_v39 = vmul.f32 0.5, %v4830_v11  ;;  %8513 = vst [vmem:[#allocation91_spill] sm:$0xff] %v7000_v45  ;;  %v7002_v10 = vpop.f32.mrf.mxu1 }
 0x1dc   : > { %v4840_v14 = vpop.eup %4839  ;;  %4859 = vtanh.f32 %v6857_v35  ;;  %v6994_v19 = vmul.f32 0.5, %v6784_v62  ;;  %v6997_v44 = vmul.f32 0.5, %v6786_v42  ;;  %v2889_v24 = vadd.f32 0.5, %v2569_v1  ;;  %8514 = vst [vmem:[#allocation92_spill] sm:$0xff] %v7002_v10 }
 0x1dd   : > { %v4842_v52 = vpop.eup %4841  ;;  %v2891_v28 = vadd.f32 0.5, %v2571_v33  ;;  %v2890_v47 = vadd.f32 0.5, %v2570_v37  ;;  %4861 = vtanh.f32 %v6864_v16  ;;  %v2892_v11 = vadd.f32 0.5, %v2572_v4 }
 0x1de   : > { %8512 = vst [vmem:[#allocation90_spill] sm:$0xff] %v6997_v44  ;;  %v4844_v3 = vpop.eup %4843  ;;  %v2911_v8 = vadd.f32 0.5, %v2591_v48  ;;  %v2592_v35 = vmul.f32 0.5, %v4832_v51  ;;  %4863 = vtanh.f32 %v6867_v6  ;;  %v3229_v62 = vmul.f32 %v2909_v26, %v8441_v59  ;;  %v7010_v48 = vpop.f32.mrf.mxu0 }
 0x1df   : > { %v2609_v42 = vmul.f32 0.5, %v4834_v43  ;;  %v2611_v44 = vmul.f32 0.5, %v4836_v12  ;;  %4865 = vtanh.f32 %v6870_v5  ;;  %v2910_v33 = vadd.f32 0.5, %v2590_v39  ;;  %v4846_v16 = vpop.eup %4845  ;;  %8515 = vst [vmem:[#allocation93_spill] sm:$0xff] %v7010_v48  ;;  %v7012_v6 = vpop.f32.mrf.mxu1 }
 0x1e0   : > { %v2610_v37 = vmul.f32 0.5, %v4838_v54  ;;  %v2612_v1 = vmul.f32 0.5, %v4840_v14  ;;  %4867 = vtanh.f32 %v6873_v36  ;;  %v3209_v10 = vmul.f32 %v2889_v24, %v8436_v58  ;;  %8516 = vst [vmem:[#allocation94_spill] sm:$0xff] %v7012_v6  ;;  %v4848_v26 = vpop.eup %4847 }
 0x1e1   : > { %v2629_v45 = vmul.f32 0.5, %v4842_v52  ;;  %v2631_v4 = vmul.f32 0.5, %v4844_v3  ;;  %4869 = vtanh.f32 %v6876_v63  ;;  %v3211_v12 = vmul.f32 %v2891_v28, %v8437_v23  ;;  %v4850_v36 = vpop.eup %4849 }
 0x1e2   : > { %v3210_v5 = vmul.f32 %v2890_v47, %v8440_v21  ;;  %v2912_v54 = vadd.f32 0.5, %v2592_v35  ;;  %4871 = vtanh.f32 %v6879_v40  ;;  %v3212_v59 = vmul.f32 %v2892_v11, %v8442_v38  ;;  %v4852_v63 = vpop.eup %4851  ;;  %v7021_v21 = vpop.f32.mrf.mxu0 }
 0x1e3   : > { %v3231_v58 = vmul.f32 %v2911_v8, %v8443_v2  ;;  %v2929_v3 = vadd.f32 0.5, %v2609_v42  ;;  %v2931_v51 = vadd.f32 0.5, %v2611_v44  ;;  %v3661_v43 = vadd.f32 %v3229_v62, %v3209_v10  ;;  %8517 = vst [vmem:[#allocation95_spill] sm:$0xff] %v7021_v21  ;;  %v7023_v40 = vpop.f32.mrf.mxu1  ;;  %v4854_v38 = vpop.eup %4853 }
 0x1e4   : > { %v3230_v14 = vmul.f32 %v2910_v33, %v8446_v56  ;;  %v2930_v39 = vadd.f32 0.5, %v2610_v37  ;;  %v2932_v52 = vadd.f32 0.5, %v2612_v1  ;;  %v2949_v24 = vadd.f32 0.5, %v2629_v45  ;;  %8518 = vst [vmem:[#allocation96_spill] sm:$0xff] %v7023_v40 }
 0x1e5   : > { %v2951_v23 = vadd.f32 0.5, %v2631_v4  ;;  %v2630_v28 = vmul.f32 0.5, %v4846_v16  ;;  %4873 = vtanh.f32 %v6882_v50  ;;  %v3232_v8 = vmul.f32 %v2912_v54, %v8447_v30 }
 0x1e6   : > { %v2632_v42 = vmul.f32 0.5, %v4848_v26  ;;  %v2649_v2 = vmul.f32 0.5, %v4850_v36  ;;  %4875 = vtanh.f32 %v6885_v60  ;;  %v3249_v62 = vmul.f32 %v2929_v3, %v8448_v57  ;;  %v7035_v57 = vpop.f32.mrf.mxu0 }
 0x1e7   : > { %v4856_v10 = vpop.eup %4855  ;;  %v3251_v45 = vmul.f32 %v2931_v51, %v8449_v7  ;;  %v2651_v56 = vmul.f32 0.5, %v4852_v63  ;;  %4877 = vtanh.f32 %v6888_v49  ;;  %v3691_v44 = vadd.f32 %v3231_v58, %v3211_v12  ;;  %8519 = vst [vmem:[#allocation97_spill] sm:$0xff] %v7035_v57  ;;  %v7037_v7 = vpop.f32.mrf.mxu1  ;;  %v8522_v63 = vld [vmem:[#allocation57_spill] sm:$0xff] }
 0x1e8   : > { %v4858_v50 = vpop.eup %4857  ;;  %v3676_v47 = vadd.f32 %v3230_v14, %v3210_v5  ;;  %v3250_v11 = vmul.f32 %v2930_v39, %v8452_v22  ;;  %v3252_v35 = vmul.f32 %v2932_v52, %v8453_v25  ;;  %v3269_v33 = vmul.f32 %v2949_v24, %v8454_v20  ;;  %8520 = vst [vmem:[#allocation98_spill] sm:$0xff] %v7037_v7  ;;  %v8523_v14 = vld [vmem:[#allocation50_spill] sm:$0xff]  ;;  %v7043_v39 = vpop.f32.mrf.mxu0 }
 0x1e9   : > { %v4860_v30 = vpop.eup %4859  ;;  %v3271_v60 = vmul.f32 %v2951_v23, %v8455_v17  ;;  %v2950_v37 = vadd.f32 0.5, %v2630_v28  ;;  %4879 = vtanh.f32 %v6891_v53  ;;  %v3706_v1 = vadd.f32 %v3232_v8, %v3212_v59  ;;  %v8521_v53 = vld [vmem:[#allocation47_spill] sm:$0xff]  ;;  %v8526_v24 = vld [vmem:[#allocation58_spill] sm:$0xff] }
 0x1ea   : > { %v4862_v49 = vpop.eup %4861  ;;  %v2952_v16 = vadd.f32 0.5, %v2632_v42  ;;  %v2969_v4 = vadd.f32 0.5, %v2649_v2  ;;  %v2650_v26 = vmul.f32 0.5, %v4854_v38  ;;  %v3662_v12 = vadd.f32 %v3661_v43, %v3249_v62  ;;  %8524 = vst [vmem:[#allocation47_spill] sm:$0xff] %v7043_v39  ;;  %v7045_v43 = vpop.f32.mrf.mxu1  ;;  %v8527_v23 = vld [vmem:[#allocation59_spill] sm:$0xff]  ;;  %v8529_v2 = vld [vmem:[#allocation60_spill] sm:$0xff] }
 0x1eb   : > { %v4864_v22 = vpop.eup %4863  ;;  %v3692_v25 = vadd.f32 %v3691_v44, %v3251_v45  ;;  %v2971_v5 = vadd.f32 0.5, %v2651_v56  ;;  %4881 = vtanh.f32 %v6894_v32  ;;  %v3677_v17 = vadd.f32 %v3676_v47, %v3250_v11  ;;  %8525 = vst [vmem:[#allocation57_spill] sm:$0xff] %v7045_v43  ;;  %v8528_v8 = vld [vmem:[#allocation51_spill] sm:$0xff]  ;;  %v8530_v56 = vld [vmem:[#allocation29_spill] sm:$0xff] }
 0x1ec   : > { %v4866_v20 = vpop.eup %4865  ;;  %v3707_v54 = vadd.f32 %v3706_v1, %v3252_v35  ;;  %v2652_v36 = vmul.f32 0.5, %v4856_v10  ;;  %4883 = vtanh.f32 %v8521_v53  ;;  %v3663_v3 = vadd.f32 %v3662_v12, %v3269_v33  ;;  %v8531_v35 = vld [vmem:[#allocation31_spill] sm:$0xff]  ;;  %v8532_v1 = vld [vmem:[#allocation52_spill] sm:$0xff] }
 0x1ed   : > { %v4868_v58 = vpop.eup %4867  ;;  %v3693_v51 = vadd.f32 %v3692_v25, %v3271_v60  ;;  %v3270_v59 = vmul.f32 %v2950_v37, %v8522_v63  ;;  %4885 = vtanh.f32 %v8523_v14  ;;  %v3272_v32 = vmul.f32 %v2952_v16, %v8526_v24  ;;  %v7054_v16 = vpop.f32.mrf.mxu0  ;;  %v8535_v25 = vld [vmem:[#allocation32_spill] sm:$0xff]  ;;  %v8537_v63 = vld [vmem:[#allocation62_spill] sm:$0xff] }
 0x1ee   : > { %v4870_v52 = vpop.eup %4869  ;;  %v3289_v28 = vmul.f32 %v2969_v4, %v8527_v23  ;;  %v2970_v38 = vadd.f32 0.5, %v2650_v26  ;;  %4887 = vtanh.f32 %v8528_v8  ;;  %v3291_v10 = vmul.f32 %v2971_v5, %v8529_v2  ;;  %8533 = vst [vmem:[#allocation50_spill] sm:$0xff] %v7054_v16  ;;  %v7056_v4 = vpop.f32.mrf.mxu1 }
 0x1ef   : > { %v4872_v42 = vpop.eup %4871  ;;  %v2669_v62 = vmul.f32 0.5, %v4858_v50  ;;  %v2671_v45 = vmul.f32 0.5, %v4860_v30  ;;  %4889 = vtanh.f32 %v8530_v56  ;;  %v2972_v44 = vadd.f32 0.5, %v2652_v36  ;;  %8534 = vst [vmem:[#allocation58_spill] sm:$0xff] %v7056_v4 }
 0x1f0   : > { %v2670_v47 = vmul.f32 0.5, %v4862_v49  ;;  %v2672_v11 = vmul.f32 0.5, %v4864_v22  ;;  %4891 = vtanh.f32 %v8531_v35  ;;  %v3678_v33 = vadd.f32 %v3677_v17, %v3270_v59  ;;  %v8536_v22 = vld [vmem:[#allocation61_spill] sm:$0xff]  ;;  %v8544_v35 = vld [vmem:[#allocation30_spill] sm:$0xff] }
 0x1f1   : > { %v2689_v60 = vmul.f32 0.5, %v4866_v20  ;;  %v2691_v37 = vmul.f32 0.5, %v4868_v58  ;;  %4893 = vtanh.f32 %v8532_v1  ;;  %v3708_v12 = vadd.f32 %v3707_v54, %v3272_v32  ;;  %v8538_v54 = vld [vmem:[#allocation33_spill] sm:$0xff]  ;;  %v7064_v32 = vpop.f32.mrf.mxu1 }
 0x1f2   : > { %v4874_v26 = vpop.eup %4873  ;;  %v2690_v50 = vmul.f32 0.5, %v4870_v52  ;;  %v2692_v30 = vmul.f32 0.5, %v4872_v42  ;;  %4895 = vtanh.f32 %v8535_v25  ;;  %v3664_v49 = vadd.f32 %v3663_v3, %v3289_v28  ;;  %v7062_v52 = vpop.f32.mrf.mxu0  ;;  %8540 = vst [vmem:[#allocation51_spill] sm:$0xff] %v7064_v32  ;;  %v8547_v25 = vld [vmem:[#allocation66_spill] sm:$0xff] }
 0x1f3   : > { %v4876_v5 = vpop.eup %4875  ;;  %v3290_v36 = vmul.f32 %v2970_v38, %v8536_v22  ;;  %v2989_v53 = vadd.f32 0.5, %v2669_v62  ;;  %v2991_v17 = vadd.f32 0.5, %v2671_v45  ;;  %v3694_v58 = vadd.f32 %v3693_v51, %v3291_v10  ;;  %8539 = vst [vmem:[#allocation59_spill] sm:$0xff] %v7062_v52  ;;  %v8541_v62 = vld [vmem:[#allocation34_spill] sm:$0xff]  ;;  %v8542_v51 = vld [vmem:[#allocation63_spill] sm:$0xff]  ;;  %v8543_v45 = vld [vmem:[#allocation64_spill] sm:$0xff] }
 0x1f4   : > { %v4878_v20 = vpop.eup %4877  ;;  %v3292_v59 = vmul.f32 %v2972_v44, %v8537_v63  ;;  %v2990_v14 = vadd.f32 0.5, %v2670_v47  ;;  %v2992_v24 = vadd.f32 0.5, %v2672_v11  ;;  %v3009_v23 = vadd.f32 0.5, %v2689_v60  ;;  %v7075_v63 = vpop.f32.mrf.mxu0 }
 0x1f5   : > { %v3011_v8 = vadd.f32 0.5, %v2691_v37  ;;  %v2709_v2 = vmul.f32 0.5, %v4874_v26  ;;  %4897 = vtanh.f32 %v8538_v54  ;;  %v3010_v28 = vadd.f32 0.5, %v2690_v50  ;;  %v8545_v37 = vld [vmem:[#allocation10_spill] sm:$0xff]  ;;  %v8546_v50 = vld [vmem:[#allocation65_spill] sm:$0xff]  ;;  %8548 = vst [vmem:[#allocation60_spill] sm:$0xff] %v7075_v63 }
 0x1f6   : > { %v4880_v3 = vpop.eup %4879  ;;  %v3012_v38 = vadd.f32 0.5, %v2692_v30  ;;  %v2711_v42 = vmul.f32 0.5, %v4876_v5  ;;  %4899 = vtanh.f32 %v8541_v62  ;;  %v3309_v10 = vmul.f32 %v2989_v53, %v8542_v51 }
 0x1f7   : > { %v3311_v56 = vmul.f32 %v2991_v17, %v8543_v45  ;;  %v2710_v44 = vmul.f32 0.5, %v4878_v20  ;;  %4901 = vtanh.f32 %v6928_v0  ;;  %v3679_v11 = vadd.f32 %v3678_v33, %v3290_v36  ;;  %v7077_v17 = vpop.f32.mrf.mxu1  ;;  %v8550_v33 = vld [vmem:[#allocation6_spill] sm:$0xff] }
 0x1f8   : > { %v4882_v47 = vpop.eup %4881  ;;  %v3310_v60 = vmul.f32 %v2990_v14, %v8544_v35  ;;  %v3312_v1 = vmul.f32 %v2992_v24, %v8545_v37  ;;  %4903 = vtanh.f32 %v6931_v61  ;;  %v3329_v30 = vmul.f32 %v3009_v23, %v8546_v50  ;;  %8549 = vst [vmem:[#allocation29_spill] sm:$0xff] %v7077_v17  ;;  %v8551_v14 = vld [vmem:[#allocation24_spill] sm:$0xff]  ;;  %v8552_v23 = vld [vmem:[#allocation19_spill] sm:$0xff] }
 0x1f9   : > { %v4884_v26 = vpop.eup %4883  ;;  %v3331_v5 = vmul.f32 %v3011_v8, %v8547_v25  ;;  %v3029_v22 = vadd.f32 0.5, %v2709_v2  ;;  %v2712_v53 = vmul.f32 0.5, %v4880_v3  ;;  %v3709_v20 = vadd.f32 %v3708_v12, %v3292_v59  ;;  %v8553_v50 = vld [vmem:[#allocation20_spill] sm:$0xff] }
 0x1fa   : > { %v4886_v0 = vpop.eup %4885  ;;  %v3330_v36 = vmul.f32 %v3010_v28, %v8550_v33  ;;  %v3332_v54 = vmul.f32 %v3012_v38, %v8551_v14  ;;  %v3031_v24 = vadd.f32 0.5, %v2711_v42  ;;  %v3665_v61 = vadd.f32 %v3664_v49, %v3309_v10  ;;  %v8554_v33 = vld [vmem:[#allocation25_spill] sm:$0xff]  ;;  %v7088_v14 = vpop.f32.mrf.mxu0 }
 0x1fb   : > { %v4888_v62 = vpop.eup %4887  ;;  %v3695_v51 = vadd.f32 %v3694_v58, %v3311_v56  ;;  %v3030_v45 = vadd.f32 0.5, %v2710_v44  ;;  %v7082_v35 = vmul.f32 0.5, %v8552_v23  ;;  %v3680_v2 = vadd.f32 %v3679_v11, %v3310_v60  ;;  %8555 = vst [vmem:[#allocation31_spill] sm:$0xff] %v7088_v14  ;;  %v7090_v49 = vpop.f32.mrf.mxu1  ;;  %v8557_v44 = vld [vmem:[#allocation67_spill] sm:$0xff] }
 0x1fc   : > { %v4890_v8 = vpop.eup %4889  ;;  %v3710_v3 = vadd.f32 %v3709_v20, %v3312_v1  ;;  %v2729_v37 = vmul.f32 0.5, %v4882_v47  ;;  %v7085_v25 = vmul.f32 0.5, %v8553_v50  ;;  %v3666_v59 = vadd.f32 %v3665_v61, %v3329_v30  ;;  %8556 = vst [vmem:[#allocation52_spill] sm:$0xff] %v7090_v49  ;;  %v8558_v1 = vld [vmem:[#allocation26_spill] sm:$0xff]  ;;  %v8559_v61 = vld [vmem:[#allocation68_spill] sm:$0xff] }
 0x1fd   : > { %v4892_v12 = vpop.eup %4891  ;;  %v3696_v28 = vadd.f32 %v3695_v51, %v3331_v5  ;;  %v3349_v38 = vmul.f32 %v3029_v22, %v8554_v33  ;;  %v3032_v42 = vadd.f32 0.5, %v2712_v53  ;;  %v3681_v10 = vadd.f32 %v3680_v2, %v3330_v36 }
 0x1fe   : > { %v4894_v58 = vpop.eup %4893  ;;  %v3711_v56 = vadd.f32 %v3710_v3, %v3332_v54  ;;  %v3351_v11 = vmul.f32 %v3031_v24, %v8557_v44  ;;  %v2731_v60 = vmul.f32 0.5, %v4884_v26  ;;  %v3350_v20 = vmul.f32 %v3030_v45, %v8558_v1  ;;  %v8560_v54 = vld [vmem:[#allocation35_spill] sm:$0xff]  ;;  %v7098_v24 = vpop.f32.mrf.mxu0 }
 0x1ff   : > { %v4896_v47 = vpop.eup %4895  ;;  %v2730_v17 = vmul.f32 0.5, %v4886_v0  ;;  %v2732_v63 = vmul.f32 0.5, %v4888_v62  ;;  %4905 = vtanh.f32 %v6934_v46  ;;  %v3049_v30 = vadd.f32 0.5, %v2729_v37  ;;  %8561 = vst [vmem:[#allocation32_spill] sm:$0xff] %v7098_v24  ;;  %v7100_v26 = vpop.f32.mrf.mxu1 }
 0x200   : > { %v2749_v5 = vmul.f32 0.5, %v4890_v8  ;;  %v2751_v22 = vmul.f32 0.5, %v4892_v12  ;;  %4907 = vtanh.f32 %v6937_v31  ;;  %v3667_v53 = vadd.f32 %v3666_v59, %v3349_v38  ;;  %8562 = vst [vmem:[#allocation61_spill] sm:$0xff] %v7100_v26  ;;  %v8563_v12 = vld [vmem:[#allocation7_spill] sm:$0xff] }
 0x201   : > { %v3352_v51 = vmul.f32 %v3032_v42, %v8559_v61  ;;  %v2750_v36 = vmul.f32 0.5, %v4894_v58  ;;  %4909 = vtanh.f32 %v8560_v54  ;;  %v3697_v0 = vadd.f32 %v3696_v28, %v3351_v11 }
 0x202   : > { %v4898_v45 = vpop.eup %4897  ;;  %v3051_v62 = vadd.f32 0.5, %v2731_v60  ;;  %v2752_v2 = vmul.f32 0.5, %v4896_v47  ;;  %4911 = vtanh.f32 %v6943_v13  ;;  %v3682_v8 = vadd.f32 %v3681_v10, %v3350_v20  ;;  %v7107_v13 = vpop.f32.mrf.mxu0  ;;  %v8567_v60 = vld [vmem:[#allocation54_spill] sm:$0xff]  ;;  %v8568_v47 = vld [vmem:[#allocation28_spill] sm:$0xff]  ;;  %v8569_v20 = vld [vmem:[#allocation11_spill] sm:$0xff] }
 0x203   : > { %v4900_v46 = vpop.eup %4899  ;;  %v3050_v3 = vadd.f32 0.5, %v2730_v17  ;;  %v3052_v31 = vadd.f32 0.5, %v2732_v63  ;;  %4913 = vtanh.f32 %v6950_v29  ;;  %v3369_v59 = vmul.f32 %v3049_v30, %v8563_v12  ;;  %8564 = vst [vmem:[#allocation62_spill] sm:$0xff] %v7107_v13  ;;  %v7109_v10 = vpop.f32.mrf.mxu1  ;;  %v8566_v63 = vld [vmem:[#allocation27_spill] sm:$0xff] }
 0x204   : > { %v4902_v37 = vpop.eup %4901  ;;  %v3069_v33 = vadd.f32 0.5, %v2749_v5  ;;  %v3071_v38 = vadd.f32 0.5, %v2751_v22  ;;  %4915 = vtanh.f32 %v6953_v18  ;;  %v3712_v58 = vadd.f32 %v3711_v56, %v3352_v51  ;;  %8565 = vst [vmem:[#allocation33_spill] sm:$0xff] %v7109_v10  ;;  %v8570_v56 = vld [vmem:[#allocation55_spill] sm:$0xff]  ;;  %v8571_v5 = vld [vmem:[#allocation12_spill] sm:$0xff] }
 0x205   : > { %v4904_v42 = vpop.eup %4903  ;;  %v3070_v28 = vadd.f32 0.5, %v2750_v36  ;;  %v2769_v44 = vmul.f32 0.5, %v4898_v45  ;;  %4917 = vtanh.f32 %v6956_v15  ;;  %v3371_v17 = vmul.f32 %v3051_v62, %v8566_v63  ;;  %v8572_v15 = vld [vmem:[#allocation13_spill] sm:$0xff]  ;;  %v8573_v36 = vld [vmem:[#allocation56_spill] sm:$0xff]  ;;  %v8574_v45 = vld [vmem:[#allocation14_spill] sm:$0xff] }
 0x206   : > { %v3072_v29 = vadd.f32 0.5, %v2752_v2  ;;  %v2771_v11 = vmul.f32 0.5, %v4900_v46  ;;  %4919 = vtanh.f32 %v8567_v60  ;;  %v3370_v1 = vmul.f32 %v3050_v3, %v8568_v47  ;;  %v7121_v46 = vpop.f32.mrf.mxu0  ;;  %v7123_v3 = vpop.f32.mrf.mxu1  ;;  %v8578_v60 = vld [vmem:[#allocation87_spill] sm:$0xff] }
 0x207   : > { %v3372_v18 = vmul.f32 %v3052_v31, %v8569_v20  ;;  %v2770_v30 = vmul.f32 0.5, %v4902_v37  ;;  %4921 = vtanh.f32 %v8570_v56  ;;  %v3389_v22 = vmul.f32 %v3069_v33, %v8571_v5  ;;  %8575 = vst [vmem:[#allocation34_spill] sm:$0xff] %v7121_v46  ;;  %8576 = vst [vmem:[#allocation63_spill] sm:$0xff] %v7123_v3  ;;  %v8577_v37 = vld [vmem:[#allocation15_spill] sm:$0xff]  ;;  %v8579_v20 = vld [vmem:[#allocation16_spill] sm:$0xff] }
 0x208   : > { %v3391_v61 = vmul.f32 %v3071_v38, %v8572_v15  ;;  %v2772_v51 = vmul.f32 0.5, %v4904_v42  ;;  %4923 = vtanh.f32 %v8573_v36  ;;  %v3668_v54 = vadd.f32 %v3667_v53, %v3369_v59 }
 0x209   : > { %v3390_v62 = vmul.f32 %v3070_v28, %v8574_v45  ;;  %v3089_v2 = vadd.f32 0.5, %v2769_v44  ;;  %4925 = vtanh.f32 %v6968_v55  ;;  %v3698_v31 = vadd.f32 %v3697_v0, %v3371_v17 }
 0x20a   : > { %v3392_v12 = vmul.f32 %v3072_v29, %v8577_v37  ;;  %v3091_v63 = vadd.f32 0.5, %v2771_v11  ;;  %4927 = vtanh.f32 %v6971_v9  ;;  %v3683_v33 = vadd.f32 %v3682_v8, %v3370_v1  ;;  %v7131_v29 = vpop.f32.mrf.mxu0  ;;  %v7133_v9 = vpop.f32.mrf.mxu1  ;;  %v8582_v11 = vld [vmem:[#allocation17_spill] sm:$0xff] }
 0x20b   : > { %v3713_v38 = vadd.f32 %v3712_v58, %v3372_v18  ;;  %v3090_v42 = vadd.f32 0.5, %v2770_v30  ;;  %4929 = vtanh.f32 %v8578_v60  ;;  %v3669_v59 = vadd.f32 %v3668_v54, %v3389_v22  ;;  %8580 = vst [vmem:[#allocation64_spill] sm:$0xff] %v7131_v29  ;;  %8581 = vst [vmem:[#allocation30_spill] sm:$0xff] %v7133_v9  ;;  %v8585_v54 = vld [vmem:[#allocation90_spill] sm:$0xff]  ;;  %v8588_v60 = vld [vmem:[#allocation71_spill] sm:$0xff] }
 0x20c   : > { %v4906_v53 = vpop.eup %4905  ;;  %v3699_v28 = vadd.f32 %v3698_v31, %v3391_v61  ;;  %v3092_v44 = vadd.f32 0.5, %v2772_v51  ;;  %4931 = vtanh.f32 %v6983_v41  ;;  %v3684_v47 = vadd.f32 %v3683_v33, %v3390_v62  ;;  %v8583_v41 = vld [vmem:[#allocation69_spill] sm:$0xff]  ;;  %v7144_v37 = vpop.f32.mrf.mxu1 }
 0x20d   : > { %v4908_v55 = vpop.eup %4907  ;;  %v3409_v0 = vmul.f32 %v3089_v2, %v8579_v20  ;;  %v2789_v17 = vmul.f32 0.5, %v4906_v53  ;;  %4933 = vtanh.f32 %v6987_v27  ;;  %v3714_v58 = vadd.f32 %v3713_v38, %v3392_v12  ;;  %v8584_v27 = vld [vmem:[#allocation70_spill] sm:$0xff]  ;;  %8587 = vst [vmem:[#allocation65_spill] sm:$0xff] %v7144_v37 }
 0x20e   : > { %v4910_v8 = vpop.eup %4909  ;;  %v3411_v1 = vmul.f32 %v3091_v63, %v8582_v11  ;;  %v2791_v18 = vmul.f32 0.5, %v4908_v55  ;;  %4935 = vtanh.f32 %v6990_v34  ;;  %v3410_v56 = vmul.f32 %v3090_v42, %v8583_v41  ;;  %v7142_v34 = vpop.f32.mrf.mxu0 }
 0x20f   : > { %v4912_v30 = vpop.eup %4911  ;;  %v3109_v5 = vadd.f32 0.5, %v2789_v17  ;;  %v2790_v22 = vmul.f32 0.5, %v4910_v8  ;;  %4937 = vtanh.f32 %v6994_v19  ;;  %v3412_v61 = vmul.f32 %v3092_v44, %v8584_v27  ;;  %8586 = vst [vmem:[#allocation10_spill] sm:$0xff] %v7142_v34  ;;  %v8595_v27 = vld [vmem:[#allocation78_spill] sm:$0xff] }
 0x210   : > { %v4914_v15 = vpop.eup %4913  ;;  %v3111_v51 = vadd.f32 0.5, %v2791_v18  ;;  %v2792_v36 = vmul.f32 0.5, %v4912_v30  ;;  %4939 = vtanh.f32 %v8585_v54  ;;  %v3670_v62 = vadd.f32 %v3669_v59, %v3409_v0  ;;  %v8589_v0 = vld [vmem:[#allocation72_spill] sm:$0xff]  ;;  %v8590_v18 = vld [vmem:[#allocation9_spill] sm:$0xff] }
 0x211   : > { %v4916_v45 = vpop.eup %4915  ;;  %v3110_v2 = vadd.f32 0.5, %v2790_v22  ;;  %v2809_v31 = vmul.f32 0.5, %v4914_v15  ;;  %4941 = vtanh.f32 %v7082_v35  ;;  %v3700_v63 = vadd.f32 %v3699_v28, %v3411_v1  ;;  %v8591_v28 = vld [vmem:[#allocation73_spill] sm:$0xff] }
 0x212   : > { %v4918_v12 = vpop.eup %4917  ;;  %v3112_v19 = vadd.f32 0.5, %v2792_v36  ;;  %v2811_v33 = vmul.f32 0.5, %v4916_v45  ;;  %4943 = vtanh.f32 %v7085_v25  ;;  %v3685_v42 = vadd.f32 %v3684_v47, %v3410_v56  ;;  %v7151_v25 = vpop.f32.mrf.mxu0  ;;  %v8596_v45 = vld [vmem:[#allocation79_spill] sm:$0xff] }
 0x213   : > { %v4920_v38 = vpop.eup %4919  ;;  %v3429_v53 = vmul.f32 %v3109_v5, %v8588_v60  ;;  %v3129_v44 = vadd.f32 0.5, %v2809_v31  ;;  %v2810_v59 = vmul.f32 0.5, %v4918_v12  ;;  %v3715_v20 = vadd.f32 %v3714_v58, %v3412_v61  ;;  %8592 = vst [vmem:[#allocation66_spill] sm:$0xff] %v7151_v25  ;;  %v7153_v47 = vpop.f32.mrf.mxu1  ;;  %v8594_v5 = vld [vmem:[#allocation77_spill] sm:$0xff] }
 0x214   : > { %v4922_v55 = vpop.eup %4921  ;;  %v3431_v35 = vmul.f32 %v3111_v51, %v8589_v0  ;;  %v3131_v17 = vadd.f32 0.5, %v2811_v33  ;;  %v2812_v8 = vmul.f32 0.5, %v4920_v38  ;;  %v3430_v30 = vmul.f32 %v3110_v2, %v8590_v18  ;;  %8593 = vst [vmem:[#allocation6_spill] sm:$0xff] %v7153_v47  ;;  %v8597_v38 = vld [vmem:[#allocation80_spill] sm:$0xff] }
 0x215   : > { %v4924_v11 = vpop.eup %4923  ;;  %v3432_v1 = vmul.f32 %v3112_v19, %v8591_v28  ;;  %v3130_v41 = vadd.f32 0.5, %v2810_v59  ;;  %v2829_v22 = vmul.f32 0.5, %v4922_v55  ;;  %v3449_v15 = vmul.f32 %v3129_v44, %v8594_v5 }
 0x216   : > { %v4926_v56 = vpop.eup %4925  ;;  %v3451_v58 = vmul.f32 %v3131_v17, %v8595_v27  ;;  %v3132_v61 = vadd.f32 0.5, %v2812_v8  ;;  %v2831_v51 = vmul.f32 0.5, %v4924_v11  ;;  %v3671_v54 = vadd.f32 %v3670_v62, %v3429_v53  ;;  %v7159_v17 = vpop.f32.mrf.mxu0 }
 0x217   : > { %v4928_v36 = vpop.eup %4927  ;;  %v3450_v31 = vmul.f32 %v3130_v41, %v8596_v45  ;;  %v3149_v2 = vadd.f32 0.5, %v2829_v22  ;;  %v2830_v12 = vmul.f32 0.5, %v4926_v56  ;;  %v3701_v33 = vadd.f32 %v3700_v63, %v3431_v35  ;;  %8598 = vst [vmem:[#allocation24_spill] sm:$0xff] %v7159_v17  ;;  %v7161_v8 = vpop.f32.mrf.mxu1  ;;  %v8600_v35 = vld [vmem:[#allocation81_spill] sm:$0xff] }
 0x218   : > { %v4930_v19 = vpop.eup %4929  ;;  %v3452_v60 = vmul.f32 %v3132_v61, %v8597_v38  ;;  %v3151_v59 = vadd.f32 0.5, %v2831_v51  ;;  %v2832_v55 = vmul.f32 0.5, %v4928_v36  ;;  %v3686_v18 = vadd.f32 %v3685_v42, %v3430_v30  ;;  %8599 = vst [vmem:[#allocation19_spill] sm:$0xff] %v7161_v8  ;;  %v8603_v8 = vld [vmem:[#allocation85_spill] sm:$0xff] }
 0x219   : > { %v4932_v0 = vpop.eup %4931  ;;  %v3716_v28 = vadd.f32 %v3715_v20, %v3432_v1  ;;  %v3150_v44 = vadd.f32 0.5, %v2830_v12  ;;  %v2849_v5 = vmul.f32 0.5, %v4930_v19  ;;  %v3672_v53 = vadd.f32 %v3671_v54, %v3449_v15  ;;  %v8601_v20 = vld [vmem:[#allocation82_spill] sm:$0xff]  ;;  %v8602_v19 = vld [vmem:[#allocation83_spill] sm:$0xff] }
 0x21a   : > { %v4934_v62 = vpop.eup %4933  ;;  %v3702_v11 = vadd.f32 %v3701_v33, %v3451_v58  ;;  %v3152_v41 = vadd.f32 0.5, %v2832_v55  ;;  %v2851_v22 = vmul.f32 0.5, %v4932_v0  ;;  %v3687_v63 = vadd.f32 %v3686_v18, %v3450_v31  ;;  %v7167_v33 = vpop.f32.mrf.mxu0  ;;  %v8606_v55 = vld [vmem:[#allocation84_spill] sm:$0xff]  ;;  %v8607_v18 = vld [vmem:[#allocation86_spill] sm:$0xff] }
 0x21b   : > { %v4936_v56 = vpop.eup %4935  ;;  %v3469_v27 = vmul.f32 %v3149_v2, %v8600_v35  ;;  %v3169_v61 = vadd.f32 0.5, %v2849_v5  ;;  %v2850_v51 = vmul.f32 0.5, %v4934_v62  ;;  %v3717_v42 = vadd.f32 %v3716_v28, %v3452_v60  ;;  %8604 = vst [vmem:[#allocation20_spill] sm:$0xff] %v7167_v33  ;;  %v7169_v31 = vpop.f32.mrf.mxu1  ;;  %v8610_v33 = vld [vmem:[#allocation76_spill] sm:$0xff] }
 0x21c   : > { %v4938_v36 = vpop.eup %4937  ;;  %v3471_v30 = vmul.f32 %v3151_v59, %v8601_v20  ;;  %v3171_v1 = vadd.f32 0.5, %v2851_v22  ;;  %v2852_v45 = vmul.f32 0.5, %v4936_v56  ;;  %v3470_v38 = vmul.f32 %v3150_v44, %v8602_v19  ;;  %8605 = vst [vmem:[#allocation25_spill] sm:$0xff] %v7169_v31  ;;  %v8608_v22 = vld [vmem:[#allocation74_spill] sm:$0xff] }
 0x21d   : > { %v4940_v12 = vpop.eup %4939  ;;  %v3489_v15 = vmul.f32 %v3169_v61, %v8603_v8  ;;  %v3170_v58 = vadd.f32 0.5, %v2850_v51  ;;  %v2869_v54 = vmul.f32 0.5, %v4938_v36  ;;  %v3472_v0 = vmul.f32 %v3152_v41, %v8606_v55  ;;  %v8609_v61 = vld [vmem:[#allocation75_spill] sm:$0xff]  ;;  %v7176_v55 = vpop.f32.mrf.mxu0 }
 0x21e   : > { %v4942_v2 = vpop.eup %4941  ;;  %v3491_v60 = vmul.f32 %v3171_v1, %v8607_v18  ;;  %v3172_v28 = vadd.f32 0.5, %v2852_v45  ;;  %v2871_v59 = vmul.f32 0.5, %v4940_v12  ;;  %v3673_v62 = vadd.f32 %v3672_v53, %v3469_v27  ;;  %8611 = vst [vmem:[#allocation67_spill] sm:$0xff] %v7176_v55  ;;  %v7178_v1 = vpop.f32.mrf.mxu1  ;;  %v3529_v27 = vld [vmem:[#allocation2 + $0x8] sm:$0xff] }
 0x21f   : > { %v4944_v5 = vpop.eup %4943  ;;  %v3490_v56 = vmul.f32 %v3170_v58, %v8608_v22  ;;  %v3189_v44 = vadd.f32 0.5, %v2869_v54  ;;  %v2870_v35 = vmul.f32 0.5, %v4942_v2  ;;  %v3703_v8 = vadd.f32 %v3702_v11, %v3471_v30  ;;  %8612 = vst [vmem:[#allocation26_spill] sm:$0xff] %v7178_v1  ;;  %v8613_v12 = vld [vmem:[#allocation18_spill] sm:$0xff] }
 0x220   : > { %v3492_v51 = vmul.f32 %v3172_v28, %v8609_v61  ;;  %v3191_v36 = vadd.f32 0.5, %v2871_v59  ;;  %v2872_v20 = vmul.f32 0.5, %v4944_v5  ;;  %v3688_v19 = vadd.f32 %v3687_v63, %v3470_v38  ;;  %v3531_v2 = vld [vmem:[#allocation2 + $0x28] sm:$0xff]  ;;  %v3532_v5 = vld [vmem:[#allocation2 + $0x40] sm:$0xff] }
 0x221   : > { %v3674_v31 = vadd.f32 %v3673_v62, %v3489_v15  ;;  %v3509_v17 = vmul.f32 %v3189_v44, %v8610_v33  ;;  %v3190_v41 = vadd.f32 0.5, %v2870_v35  ;;  %v3718_v45 = vadd.f32 %v3717_v42, %v3472_v0  ;;  %v3530_v15 = vld [vmem:[#allocation2 + $0x88] sm:$0xff]  ;;  %v7183_v62 = vpop.f32.mrf.mxu0  ;;  %v7185_v42 = vpop.f32.mrf.mxu1 }
 0x222   : > { %v3704_v53 = vadd.f32 %v3703_v8, %v3491_v60  ;;  %v3511_v58 = vmul.f32 %v3191_v36, %v8613_v12  ;;  %v3192_v54 = vadd.f32 0.5, %v2872_v20  ;;  %v3689_v11 = vadd.f32 %v3688_v19, %v3490_v56  ;;  %8614 = vst [vmem:[#allocation68_spill] sm:$0xff] %v7183_v62  ;;  %8615 = vst [vmem:[#allocation35_spill] sm:$0xff] %v7185_v42  ;;  %v8619_v44 = vld [vmem:[#allocation22_spill] sm:$0xff]  ;;  %v8620_v8 = vld [vmem:[#allocation8_spill] sm:$0xff] }
 0x223   : > { %v3675_v30 = vadd.f32 %v3674_v31, %v3509_v17  ;;  %v3510_v18 = vmul.f32 %v3190_v41, %v8552_v23  ;;  %v3719_v63 = vadd.f32 %v3718_v45, %v3492_v51  ;;  %v7187_v23 = vpop.f32.mrf.mxu0  ;;  %v7189_v31 = vpop.f32.mrf.mxu1  ;;  %v1935_v35 = vmul.f32 0.5, %v8619_v44  ;;  %v8621_v51 = vld [vmem:[#allocation38_spill] sm:$0xff]  ;;  %v8624_v41 = vld [vmem:[#allocation23_spill] sm:$0xff] }
 0x224   : > { %v3705_v38 = vadd.f32 %v3704_v53, %v3511_v58  ;;  %v3512_v33 = vmul.f32 %v3192_v54, %v8553_v50  ;;  %8616 = vst [vmem:[#allocation7_spill] sm:$0xff] %v7187_v23  ;;  %8617 = vst [vmem:[#allocation27_spill] sm:$0xff] %v7189_v31  ;;  %v8618_v50 = vld [vmem:[#allocation21_spill] sm:$0xff]  ;;  %v1934_v61 = vmul.f32 0.5, %v8620_v8  ;;  %v1953_v36 = vmul.f32 0.5, %v8621_v51  ;;  %v8626_v12 = vld [vmem:[#allocation39_spill] sm:$0xff] }
 0x225   : > { %v3849_v28 = vadd.f32 %v3675_v30, %v3529_v27  ;;  %v3690_v59 = vadd.f32 %v3689_v11, %v3510_v18  ;;  %v1933_v56 = vmul.f32 0.5, %v8618_v50  ;;  %v7195_v20 = vpop.f32.mrf.mxu0  ;;  %v7197_v19 = vpop.f32.mrf.mxu1  ;;  %v1936_v45 = vmul.f32 0.5, %v8624_v41  ;;  %v8625_v53 = vld [vmem:[#allocation37_spill] sm:$0xff]  ;;  %v8627_v54 = vld [vmem:[#allocation40_spill] sm:$0xff]  ;;  %v8630_v18 = vld [vmem:[#allocation42_spill] sm:$0xff] }
 0x226   : > { %v3851_v0 = vadd.f32 %v3705_v38, %v3531_v2  ;;  %v3720_v60 = vadd.f32 %v3719_v63, %v3512_v33  ;;  %8622 = vst [vmem:[#allocation54_spill] sm:$0xff] %v7195_v20  ;;  %8623 = vst [vmem:[#allocation28_spill] sm:$0xff] %v7197_v19  ;;  %v1955_v27 = vmul.f32 0.5, %v8625_v53  ;;  %v1954_v58 = vmul.f32 0.5, %v8626_v12  ;;  %v8631_v38 = vld [vmem:[#allocation41_spill] sm:$0xff]  ;;  %v8632_v33 = vld [vmem:[#allocation43_spill] sm:$0xff] }
 0x227   : > { %3869 = vst [vmem:[#allocation2 + $0x8] sm:$0xff] %v3849_v28  ;;  %v3850_v22 = vadd.f32 %v3690_v59, %v3530_v15  ;;  %4945 = vtanh.f32 %v1933_v56  ;;  %v1956_v11 = vmul.f32 0.5, %v8627_v54  ;;  %v7203_v30 = vpop.f32.mrf.mxu0  ;;  %v7205_v2 = vpop.f32.mrf.mxu1  ;;  %v1973_v63 = vmul.f32 0.5, %v8630_v18  ;;  %v8633_v59 = vld [vmem:[#allocation44_spill] sm:$0xff] }
 0x228   : > { %3871 = vst [vmem:[#allocation2 + $0x28] sm:$0xff] %v3851_v0  ;;  %v3852_v17 = vadd.f32 %v3720_v60, %v3532_v5  ;;  %4947 = vtanh.f32 %v1935_v35  ;;  %8628 = vst [vmem:[#allocation11_spill] sm:$0xff] %v7203_v30  ;;  %v1975_v15 = vmul.f32 0.5, %v8631_v38  ;;  %v1974_v28 = vmul.f32 0.5, %v8632_v33  ;;  %v8634_v0 = vld [vmem:[#allocation45_spill] sm:$0xff]  ;;  %v8636_v56 = vld [vmem:[#allocation48_spill] sm:$0xff] }
 0x229   : > { %3870 = vst [vmem:[#allocation2 + $0x88] sm:$0xff] %v3850_v22  ;;  %4949 = vtanh.f32 %v1934_v61  ;;  %8629 = vst [vmem:[#allocation55_spill] sm:$0xff] %v7205_v2  ;;  %v1976_v5 = vmul.f32 0.5, %v8633_v59  ;;  %v1993_v60 = vmul.f32 0.5, %v8634_v0  ;;  %v8635_v22 = vld [vmem:[#allocation46_spill] sm:$0xff]  ;;  %v1994_v35 = vmul.f32 0.5, %v8636_v56  ;;  %v7217_v2 = vpop.f32.mrf.mxu1 }
 0x22a   : > { %3872 = vst [vmem:[#allocation2 + $0x40] sm:$0xff] %v3852_v17  ;;  %4951 = vtanh.f32 %v1953_v36  ;;  %v1995_v17 = vmul.f32 0.5, %v8635_v22  ;;  %v8637_v61 = vld [vmem:[#allocation49_spill] sm:$0xff]  ;;  %8639 = vst [vmem:[#allocation13_spill] sm:$0xff] %v7217_v2  ;;  %v8642_v38 = vld [vmem:[#allocation88_spill] sm:$0xff]  ;;  %v7237_v2 = vmul.f32 0.5, %v7012_v6 }
 0x22b   : > { %4953 = vtanh.f32 %v1936_v45  ;;  %v1996_v36 = vmul.f32 0.5, %v8637_v61  ;;  %v7215_v45 = vpop.f32.mrf.mxu0  ;;  %v8641_v30 = vld [vmem:[#allocation53_spill] sm:$0xff]  ;;  %v7222_v59 = vmul.f32 0.5, %v8642_v38  ;;  %v8644_v22 = vld [vmem:[#allocation91_spill] sm:$0xff]  ;;  %v8645_v61 = vld [vmem:[#allocation92_spill] sm:$0xff]  ;;  %v7256_v6 = vmul.f32 0.5, %v7043_v39 }
 0x22c   : > { %4955 = vtanh.f32 %v1955_v27  ;;  %8638 = vst [vmem:[#allocation12_spill] sm:$0xff] %v7215_v45  ;;  %v8640_v27 = vld [vmem:[#allocation36_spill] sm:$0xff]  ;;  %v2015_v33 = vmul.f32 0.5, %v8641_v30  ;;  %v7228_v56 = vmul.f32 0.5, %v8644_v22  ;;  %v7231_v18 = vmul.f32 0.5, %v8645_v61 }
 0x22d   : > { %4957 = vtanh.f32 %v1954_v58  ;;  %v2013_v58 = vmul.f32 0.5, %v8640_v27  ;;  %v7240_v45 = vmul.f32 0.5, %v7021_v21  ;;  %v7246_v22 = vmul.f32 0.5, %v7035_v57 }
 0x22e   : > { %4959 = vtanh.f32 %v1956_v11  ;;  %v8643_v11 = vld [vmem:[#allocation89_spill] sm:$0xff]  ;;  %v7249_v61 = vmul.f32 0.5, %v7037_v7  ;;  %v7259_v21 = vmul.f32 0.5, %v7045_v43  ;;  %v7265_v57 = vmul.f32 0.5, %v7056_v4 }
 0x22f   : > { %4961 = vtanh.f32 %v1973_v63  ;;  %v7225_v0 = vmul.f32 0.5, %v8643_v11  ;;  %v7234_v63 = vmul.f32 0.5, %v7010_v48  ;;  %v7253_v48 = vpop.f32.mrf.mxu1  ;;  %v7268_v7 = vmul.f32 0.5, %v7062_v52  ;;  %v8649_v43 = vld [vmem:[#allocation29_spill] sm:$0xff] }
 0x230   : > { %4963 = vtanh.f32 %v1975_v15  ;;  %v7243_v15 = vmul.f32 0.5, %v7023_v40  ;;  %8647 = vst [vmem:[#allocation14_spill] sm:$0xff] %v7253_v48  ;;  %v7271_v48 = vmul.f32 0.5, %v7064_v32  ;;  %v7277_v11 = vmul.f32 0.5, %v8649_v43 }
 0x231   : > { %4965 = vtanh.f32 %v1974_v28  ;;  %v7251_v28 = vpop.f32.mrf.mxu0  ;;  %v7286_v52 = vmul.f32 0.5, %v7098_v24  ;;  %v7289_v32 = vmul.f32 0.5, %v7100_v26  ;;  %v7292_v38 = vmul.f32 0.5, %v7107_v13 }
 0x232   : > { %4967 = vtanh.f32 %v1976_v5  ;;  %8646 = vst [vmem:[#allocation56_spill] sm:$0xff] %v7251_v28  ;;  %v7262_v5 = vmul.f32 0.5, %v7054_v16  ;;  %v8648_v28 = vld [vmem:[#allocation60_spill] sm:$0xff]  ;;  %v7280_v16 = vmul.f32 0.5, %v7088_v14  ;;  %v7299_v14 = vpop.f32.mrf.mxu1  ;;  %v7305_v24 = vmul.f32 0.5, %v7123_v3 }
 0x233   : > { %4969 = vtanh.f32 %v1993_v60  ;;  %v7274_v39 = vmul.f32 0.5, %v8648_v28  ;;  %v7295_v28 = vmul.f32 0.5, %v7109_v10  ;;  %v7297_v43 = vpop.f32.mrf.mxu0  ;;  %8652 = vst [vmem:[#allocation16_spill] sm:$0xff] %v7299_v14  ;;  %v7308_v26 = vmul.f32 0.5, %v7131_v29  ;;  %v8658_v29 = vld [vmem:[#allocation24_spill] sm:$0xff] }
 0x234   : > { %v4946_v40 = vpop.eup %4945  ;;  %4971 = vtanh.f32 %v1995_v17  ;;  %8650 = vst [vmem:[#allocation15_spill] sm:$0xff] %v7280_v16  ;;  %v7283_v17 = vmul.f32 0.5, %v7090_v49  ;;  %8651 = vst [vmem:[#allocation87_spill] sm:$0xff] %v7297_v43  ;;  %v7302_v49 = vmul.f32 0.5, %v7121_v46  ;;  %v7311_v10 = vmul.f32 0.5, %v7133_v9 }
 0x235   : > { %v4948_v60 = vpop.eup %4947  ;;  %4973 = vtanh.f32 %v1994_v35  ;;  %8653 = vst [vmem:[#allocation17_spill] sm:$0xff] %v7308_v26  ;;  %v7314_v43 = vmul.f32 0.5, %v7142_v34  ;;  %v7317_v14 = vmul.f32 0.5, %v7144_v37  ;;  %v7320_v46 = vmul.f32 0.5, %v7151_v25 }
 0x236   : > { %v4950_v4 = vpop.eup %4949  ;;  %4975 = vtanh.f32 %v1996_v36  ;;  %8654 = vst [vmem:[#allocation69_spill] sm:$0xff] %v7311_v10  ;;  %v7323_v3 = vmul.f32 0.5, %v7153_v47  ;;  %v7326_v26 = vmul.f32 0.5, %v8658_v29  ;;  %v8660_v10 = vld [vmem:[#allocation19_spill] sm:$0xff]  ;;  %v7342_v29 = vmul.f32 0.5, %v7176_v55 }
 0x237   : > { %v4952_v16 = vpop.eup %4951  ;;  %8655 = vst [vmem:[#allocation70_spill] sm:$0xff] %v7314_v43  ;;  %8656 = vst [vmem:[#allocation90_spill] sm:$0xff] %v7317_v14  ;;  %4977 = vtanh.f32 %v2013_v58  ;;  %v7329_v34 = vmul.f32 0.5, %v8660_v10  ;;  %v8662_v43 = vld [vmem:[#allocation20_spill] sm:$0xff]  ;;  %v7334_v14 = vpop.f32.mrf.mxu0  ;;  %v7353_v55 = vmul.f32 0.5, %v7185_v42 }
 0x238   : > { %v4954_v13 = vpop.eup %4953  ;;  %8657 = vst [vmem:[#allocation71_spill] sm:$0xff] %v7320_v46  ;;  %8659 = vst [vmem:[#allocation72_spill] sm:$0xff] %v7326_v26  ;;  %v2593_v9 = vmul.f32 0.5, %v4952_v16  ;;  %4979 = vtanh.f32 %v2015_v33  ;;  %v7332_v37 = vmul.f32 0.5, %v8662_v43  ;;  %v7336_v58 = vpop.f32.mrf.mxu1  ;;  %v8666_v46 = vld [vmem:[#allocation25_spill] sm:$0xff]  ;;  %v7345_v16 = vmul.f32 0.5, %v7178_v1 }
 0x239   : > { %v4956_v35 = vpop.eup %4955  ;;  %8661 = vst [vmem:[#allocation9_spill] sm:$0xff] %v7329_v34  ;;  %8664 = vst [vmem:[#allocation77_spill] sm:$0xff] %v7334_v14  ;;  %v7339_v47 = vmul.f32 0.5, %v8666_v46  ;;  %v7348_v33 = vmul.f32 0.5, %v7183_v62  ;;  %v2573_v43 = vmul.f32 0.5, %v4946_v40  ;;  %v2574_v34 = vmul.f32 0.5, %v4950_v4  ;;  %v7362_v4 = vpop.f32.mrf.mxu0 }
 0x23a   : > { %v4958_v36 = vpop.eup %4957  ;;  %8663 = vst [vmem:[#allocation73_spill] sm:$0xff] %v7332_v37  ;;  %8665 = vst [vmem:[#allocation78_spill] sm:$0xff] %v7336_v58  ;;  %v2575_v37 = vmul.f32 0.5, %v4948_v60  ;;  %4981 = vtanh.f32 %v7222_v59  ;;  %v2576_v14 = vmul.f32 0.5, %v4954_v13  ;;  %v2595_v26 = vmul.f32 0.5, %v4956_v35  ;;  %v7364_v59 = vpop.f32.mrf.mxu1 }
 0x23b   : > { %v4960_v25 = vpop.eup %4959  ;;  %4983 = vtanh.f32 %v7225_v0  ;;  %v2913_v1 = vadd.f32 0.5, %v2593_v9  ;;  %v7357_v62 = vmul.f32 0.5, %v7187_v23  ;;  %v7360_v40 = vmul.f32 0.5, %v7189_v31  ;;  %8668 = vst [vmem:[#allocation80_spill] sm:$0xff] %v7362_v4  ;;  %8669 = vst [vmem:[#allocation81_spill] sm:$0xff] %v7364_v59 }
 0x23c   : > { %v4962_v10 = vpop.eup %4961  ;;  %4985 = vtanh.f32 %v7228_v56  ;;  %v2594_v60 = vmul.f32 0.5, %v4958_v36  ;;  %v7368_v0 = vmul.f32 0.5, %v7195_v20  ;;  %v7371_v9 = vmul.f32 0.5, %v7197_v19  ;;  %v7377_v19 = vpop.f32.mrf.mxu0 }
 0x23d   : > { %v4964_v58 = vpop.eup %4963  ;;  %8667 = vst [vmem:[#allocation79_spill] sm:$0xff] %v7360_v40  ;;  %4987 = vtanh.f32 %v7231_v18  ;;  %v2893_v35 = vadd.f32 0.5, %v2573_v43  ;;  %v2895_v23 = vadd.f32 0.5, %v2575_v37  ;;  %v2894_v42 = vadd.f32 0.5, %v2574_v34 }
 0x23e   : > { %v4966_v46 = vpop.eup %4965  ;;  %8670 = vst [vmem:[#allocation82_spill] sm:$0xff] %v7371_v9  ;;  %4989 = vtanh.f32 %v7234_v63  ;;  %v2896_v4 = vadd.f32 0.5, %v2576_v14  ;;  %v2915_v40 = vadd.f32 0.5, %v2595_v26  ;;  %v2596_v59 = vmul.f32 0.5, %v4960_v25  ;;  %v7379_v9 = vpop.f32.mrf.mxu1 }
 0x23f   : > { %v4968_v13 = vpop.eup %4967  ;;  %4991 = vtanh.f32 %v7237_v2  ;;  %v3233_v18 = vmul.f32 %v2913_v1, %v8621_v51  ;;  %v2613_v36 = vmul.f32 0.5, %v4962_v10  ;;  %v2615_v20 = vmul.f32 0.5, %v4964_v58 }
 0x240   : > { %v4970_v56 = vpop.eup %4969  ;;  %4993 = vtanh.f32 %v7240_v45  ;;  %v2914_v43 = vadd.f32 0.5, %v2594_v60  ;;  %v2614_v34 = vmul.f32 0.5, %v4966_v46  ;;  %v2616_v37 = vmul.f32 0.5, %v4968_v13 }
 0x241   : > { %v4972_v31 = vpop.eup %4971  ;;  %4995 = vtanh.f32 %v7243_v15  ;;  %v3213_v26 = vmul.f32 %v2893_v35, %v8618_v50  ;;  %v2633_v25 = vmul.f32 0.5, %v4970_v56  ;;  %v3215_v1 = vmul.f32 %v2895_v23, %v8619_v44  ;;  %v7389_v50 = vpop.f32.mrf.mxu0  ;;  %v8671_v56 = vld [vmem:[#allocation42_spill] sm:$0xff] }
 0x242   : > { %v4974_v14 = vpop.eup %4973  ;;  %v2635_v2 = vmul.f32 0.5, %v4972_v31  ;;  %4997 = vtanh.f32 %v7246_v22  ;;  %v3214_v51 = vmul.f32 %v2894_v42, %v8620_v8  ;;  %v2916_v45 = vadd.f32 0.5, %v2596_v59  ;;  %v7391_v31 = vpop.f32.mrf.mxu1 }
 0x243   : > { %v4976_v10 = vpop.eup %4975  ;;  %4999 = vtanh.f32 %v7249_v61  ;;  %v3216_v46 = vmul.f32 %v2896_v4, %v8624_v41  ;;  %v3235_v15 = vmul.f32 %v2915_v40, %v8625_v53  ;;  %v2933_v58 = vadd.f32 0.5, %v2613_v36 }
 0x244   : > { %v4978_v63 = vpop.eup %4977  ;;  %v2935_v13 = vadd.f32 0.5, %v2615_v20  ;;  %v3721_v60 = vadd.f32 %v3233_v18, %v3213_v26  ;;  %v3234_v23 = vmul.f32 %v2914_v43, %v8626_v12  ;;  %v2934_v44 = vadd.f32 0.5, %v2614_v34  ;;  %v8672_v18 = vld [vmem:[#allocation41_spill] sm:$0xff]  ;;  %v7400_v43 = vpop.f32.mrf.mxu0 }
 0x245   : > { %v4980_v22 = vpop.eup %4979  ;;  %v2936_v42 = vadd.f32 0.5, %v2616_v37  ;;  %v2953_v8 = vadd.f32 0.5, %v2633_v25  ;;  %v2955_v59 = vadd.f32 0.5, %v2635_v2  ;;  %v2634_v61 = vmul.f32 0.5, %v4974_v14  ;;  %8673 = vst [vmem:[#allocation83_spill] sm:$0xff] %v7400_v43  ;;  %v7402_v34 = vpop.f32.mrf.mxu1  ;;  %v8676_v25 = vld [vmem:[#allocation44_spill] sm:$0xff] }
 0x246   : > { %5001 = vtanh.f32 %v7256_v6  ;;  %v3236_v53 = vmul.f32 %v2916_v45, %v8627_v54  ;;  %v2636_v40 = vmul.f32 0.5, %v4976_v10  ;;  %v2653_v20 = vmul.f32 0.5, %v4978_v63  ;;  %8674 = vst [vmem:[#allocation85_spill] sm:$0xff] %v7402_v34  ;;  %v8675_v54 = vld [vmem:[#allocation43_spill] sm:$0xff]  ;;  %v8677_v10 = vld [vmem:[#allocation45_spill] sm:$0xff]  ;;  %v8678_v63 = vld [vmem:[#allocation46_spill] sm:$0xff] }
 0x247   : > { %v4982_v41 = vpop.eup %4981  ;;  %5003 = vtanh.f32 %v7259_v21  ;;  %v3253_v35 = vmul.f32 %v2933_v58, %v8671_v56  ;;  %v3255_v36 = vmul.f32 %v2935_v13, %v8672_v18  ;;  %v2655_v12 = vmul.f32 0.5, %v4980_v22 }
 0x248   : > { %v4984_v4 = vpop.eup %4983  ;;  %5005 = vtanh.f32 %v7262_v5  ;;  %v3751_v37 = vadd.f32 %v3235_v15, %v3215_v1  ;;  %v3736_v14 = vadd.f32 %v3234_v23, %v3214_v51  ;;  %v3254_v26 = vmul.f32 %v2934_v44, %v8675_v54  ;;  %v7410_v23 = vpop.f32.mrf.mxu0 }
 0x249   : > { %v4986_v6 = vpop.eup %4985  ;;  %v3256_v2 = vmul.f32 %v2936_v42, %v8676_v25  ;;  %v3273_v45 = vmul.f32 %v2953_v8, %v8677_v10  ;;  %v3275_v58 = vmul.f32 %v2955_v59, %v8678_v63  ;;  %v2954_v13 = vadd.f32 0.5, %v2634_v61  ;;  %8679 = vst [vmem:[#allocation84_spill] sm:$0xff] %v7410_v23  ;;  %v7412_v44 = vpop.f32.mrf.mxu1 }
 0x24a   : > { %v4988_v21 = vpop.eup %4987  ;;  %5007 = vtanh.f32 %v7265_v57  ;;  %v3766_v22 = vadd.f32 %v3236_v53, %v3216_v46  ;;  %v2956_v56 = vadd.f32 0.5, %v2636_v40  ;;  %v2973_v18 = vadd.f32 0.5, %v2653_v20  ;;  %8680 = vst [vmem:[#allocation86_spill] sm:$0xff] %v7412_v44  ;;  %v8682_v20 = vld [vmem:[#allocation49_spill] sm:$0xff]  ;;  %v7422_v54 = vpop.f32.mrf.mxu0 }
 0x24b   : > { %v4990_v5 = vpop.eup %4989  ;;  %v2654_v34 = vmul.f32 0.5, %v4982_v41  ;;  %v3722_v1 = vadd.f32 %v3721_v60, %v3253_v35  ;;  %v3752_v51 = vadd.f32 %v3751_v37, %v3255_v36  ;;  %v2975_v15 = vadd.f32 0.5, %v2655_v12  ;;  %v8681_v41 = vld [vmem:[#allocation48_spill] sm:$0xff]  ;;  %8684 = vst [vmem:[#allocation74_spill] sm:$0xff] %v7422_v54 }
 0x24c   : > { %v4992_v43 = vpop.eup %4991  ;;  %5009 = vtanh.f32 %v7268_v7  ;;  %v3737_v8 = vadd.f32 %v3736_v14, %v3254_v26  ;;  %v3767_v59 = vadd.f32 %v3766_v22, %v3256_v2  ;;  %v2656_v61 = vmul.f32 0.5, %v4984_v4  ;;  %v8683_v14 = vld [vmem:[#allocation15_spill] sm:$0xff]  ;;  %v7424_v26 = vpop.f32.mrf.mxu1 }
 0x24d   : > { %v4994_v42 = vpop.eup %4993  ;;  %5011 = vtanh.f32 %v7271_v48  ;;  %v3723_v46 = vadd.f32 %v3722_v1, %v3273_v45  ;;  %v3753_v53 = vadd.f32 %v3752_v51, %v3275_v58  ;;  %v3274_v40 = vmul.f32 %v2954_v13, %v8681_v41  ;;  %8685 = vst [vmem:[#allocation75_spill] sm:$0xff] %v7424_v26  ;;  %v8686_v58 = vld [vmem:[#allocation88_spill] sm:$0xff]  ;;  %v8689_v1 = vld [vmem:[#allocation89_spill] sm:$0xff]  ;;  %v8690_v41 = vld [vmem:[#allocation91_spill] sm:$0xff] }
 0x24e   : > { %v4996_v57 = vpop.eup %4995  ;;  %5013 = vtanh.f32 %v7274_v39  ;;  %v3276_v7 = vmul.f32 %v2956_v56, %v8682_v20  ;;  %v3293_v35 = vmul.f32 %v2973_v18, %v8640_v27  ;;  %v2974_v36 = vadd.f32 0.5, %v2654_v34 }
 0x24f   : > { %v4998_v60 = vpop.eup %4997  ;;  %5015 = vtanh.f32 %v7277_v11  ;;  %v3295_v4 = vmul.f32 %v2975_v15, %v8641_v30  ;;  %v2673_v37 = vmul.f32 0.5, %v4986_v6  ;;  %v2675_v48 = vmul.f32 0.5, %v4988_v21 }
 0x250   : > { %v5000_v12 = vpop.eup %4999  ;;  %5017 = vtanh.f32 %v8683_v14  ;;  %v2976_v39 = vadd.f32 0.5, %v2656_v61  ;;  %v2674_v25 = vmul.f32 0.5, %v4990_v5  ;;  %v2676_v2 = vmul.f32 0.5, %v4992_v43  ;;  %v7430_v43 = vpop.f32.mrf.mxu0  ;;  %v8696_v14 = vld [vmem:[#allocation95_spill] sm:$0xff] }
 0x251   : > { %5019 = vtanh.f32 %v7283_v17  ;;  %v3738_v27 = vadd.f32 %v3737_v8, %v3274_v40  ;;  %v2693_v34 = vmul.f32 0.5, %v4994_v42  ;;  %v2695_v10 = vmul.f32 0.5, %v4996_v57  ;;  %8687 = vst [vmem:[#allocation76_spill] sm:$0xff] %v7430_v43  ;;  %v7432_v17 = vpop.f32.mrf.mxu1 }
 0x252   : > { %5021 = vtanh.f32 %v7286_v52  ;;  %v3768_v30 = vadd.f32 %v3767_v59, %v3276_v7  ;;  %v2694_v6 = vmul.f32 0.5, %v4998_v60  ;;  %v2696_v21 = vmul.f32 0.5, %v5000_v12  ;;  %8688 = vst [vmem:[#allocation18_spill] sm:$0xff] %v7432_v17  ;;  %v8691_v60 = vld [vmem:[#allocation92_spill] sm:$0xff]  ;;  %v7440_v7 = vpop.f32.mrf.mxu0 }
 0x253   : > { %v5002_v11 = vpop.eup %5001  ;;  %5023 = vtanh.f32 %v7289_v32  ;;  %v3724_v63 = vadd.f32 %v3723_v46, %v3293_v35  ;;  %v3294_v13 = vmul.f32 %v2974_v36, %v8686_v58  ;;  %v2993_v22 = vadd.f32 0.5, %v2673_v37  ;;  %8692 = vst [vmem:[#allocation21_spill] sm:$0xff] %v7440_v7  ;;  %v7442_v35 = vpop.f32.mrf.mxu1  ;;  %v8695_v37 = vld [vmem:[#allocation94_spill] sm:$0xff] }
 0x254   : > { %v5004_v45 = vpop.eup %5003  ;;  %v2995_v5 = vadd.f32 0.5, %v2675_v48  ;;  %v3754_v18 = vadd.f32 %v3753_v53, %v3295_v4  ;;  %v3296_v52 = vmul.f32 %v2976_v39, %v8689_v1  ;;  %v2994_v51 = vadd.f32 0.5, %v2674_v25  ;;  %8693 = vst [vmem:[#allocation22_spill] sm:$0xff] %v7442_v35  ;;  %v8697_v25 = vld [vmem:[#allocation96_spill] sm:$0xff]  ;;  %v8700_v1 = vld [vmem:[#allocation11_spill] sm:$0xff] }
 0x255   : > { %v5006_v56 = vpop.eup %5005  ;;  %v2996_v15 = vadd.f32 0.5, %v2676_v2  ;;  %v3013_v42 = vadd.f32 0.5, %v2693_v34  ;;  %v3015_v8 = vadd.f32 0.5, %v2695_v10  ;;  %v2713_v59 = vmul.f32 0.5, %v5002_v11 }
 0x256   : > { %5025 = vtanh.f32 %v7292_v38  ;;  %v3014_v61 = vadd.f32 0.5, %v2694_v6  ;;  %v3016_v57 = vadd.f32 0.5, %v2696_v21  ;;  %v2715_v46 = vmul.f32 0.5, %v5004_v45  ;;  %v8694_v38 = vld [vmem:[#allocation93_spill] sm:$0xff]  ;;  %v8699_v45 = vld [vmem:[#allocation98_spill] sm:$0xff] }
 0x257   : > { %v5008_v32 = vpop.eup %5007  ;;  %5027 = vtanh.f32 %v7295_v28  ;;  %v3313_v40 = vmul.f32 %v2993_v22, %v8690_v41  ;;  %v3315_v20 = vmul.f32 %v2995_v5, %v8691_v60  ;;  %v2714_v53 = vmul.f32 0.5, %v5006_v56  ;;  %v8698_v6 = vld [vmem:[#allocation97_spill] sm:$0xff] }
 0x258   : > { %5029 = vtanh.f32 %v7302_v49  ;;  %v3739_v12 = vadd.f32 %v3738_v27, %v3294_v13  ;;  %v3314_v4 = vmul.f32 %v2994_v51, %v8694_v38  ;;  %v3316_v48 = vmul.f32 %v2996_v15, %v8695_v37  ;;  %v7454_v51 = vpop.f32.mrf.mxu0  ;;  %v7456_v15 = vpop.f32.mrf.mxu1 }
 0x259   : > { %v5010_v36 = vpop.eup %5009  ;;  %5031 = vtanh.f32 %v7305_v24  ;;  %v3333_v39 = vmul.f32 %v3013_v42, %v8696_v14  ;;  %v3335_v2 = vmul.f32 %v3015_v8, %v8697_v25  ;;  %v3033_v34 = vadd.f32 0.5, %v2713_v59  ;;  %8701 = vst [vmem:[#allocation8_spill] sm:$0xff] %v7454_v51  ;;  %8702 = vst [vmem:[#allocation38_spill] sm:$0xff] %v7456_v15  ;;  %v8706_v25 = vld [vmem:[#allocation50_spill] sm:$0xff] }
 0x25a   : > { %v5012_v28 = vpop.eup %5011  ;;  %v2716_v10 = vmul.f32 0.5, %v5008_v32  ;;  %v3769_v11 = vadd.f32 %v3768_v30, %v3296_v52  ;;  %v3334_v21 = vmul.f32 %v3014_v61, %v8698_v6  ;;  %v3336_v58 = vmul.f32 %v3016_v57, %v8699_v45  ;;  %v8703_v52 = vld [vmem:[#allocation55_spill] sm:$0xff]  ;;  %v8710_v6 = vld [vmem:[#allocation69_spill] sm:$0xff]  ;;  %v8711_v45 = vld [vmem:[#allocation58_spill] sm:$0xff] }
 0x25b   : > { %v5014_v49 = vpop.eup %5013  ;;  %v3035_v27 = vadd.f32 0.5, %v2715_v46  ;;  %v3725_v22 = vadd.f32 %v3724_v63, %v3313_v40  ;;  %v3755_v5 = vadd.f32 %v3754_v18, %v3315_v20  ;;  %v3034_v56 = vadd.f32 0.5, %v2714_v53  ;;  %v8704_v63 = vld [vmem:[#allocation47_spill] sm:$0xff]  ;;  %v8705_v53 = vld [vmem:[#allocation57_spill] sm:$0xff] }
 0x25c   : > { %v5016_v13 = vpop.eup %5015  ;;  %v7452_v24 = vmul.f32 0.5, %v8700_v1  ;;  %v3740_v8 = vadd.f32 %v3739_v12, %v3314_v4  ;;  %v3770_v59 = vadd.f32 %v3769_v11, %v3316_v48  ;;  %v2733_v30 = vmul.f32 0.5, %v5010_v36  ;;  %v8707_v48 = vld [vmem:[#allocation17_spill] sm:$0xff]  ;;  %v7465_v11 = vpop.f32.mrf.mxu0 }
 0x25d   : > { %v5018_v42 = vpop.eup %5017  ;;  %v7459_v32 = vmul.f32 0.5, %v8703_v52  ;;  %v3726_v57 = vadd.f32 %v3725_v22, %v3333_v39  ;;  %v3756_v46 = vadd.f32 %v3755_v5, %v3335_v2  ;;  %v3353_v18 = vmul.f32 %v3033_v34, %v8704_v63  ;;  %8708 = vst [vmem:[#allocation23_spill] sm:$0xff] %v7465_v11  ;;  %v7467_v39 = vpop.f32.mrf.mxu1 }
 0x25e   : > { %v5020_v61 = vpop.eup %5019  ;;  %v3036_v41 = vadd.f32 0.5, %v2716_v10  ;;  %v3741_v60 = vadd.f32 %v3740_v8, %v3334_v21  ;;  %v3771_v20 = vadd.f32 %v3770_v59, %v3336_v58  ;;  %v3355_v38 = vmul.f32 %v3035_v27, %v8705_v53  ;;  %8709 = vst [vmem:[#allocation37_spill] sm:$0xff] %v7467_v39  ;;  %v8712_v27 = vld [vmem:[#allocation70_spill] sm:$0xff] }
 0x25f   : > { %v5022_v40 = vpop.eup %5021  ;;  %v2735_v37 = vmul.f32 0.5, %v5012_v28  ;;  %v3354_v12 = vmul.f32 %v3034_v56, %v8706_v25  ;;  %v2734_v4 = vmul.f32 0.5, %v5014_v49  ;;  %v2736_v36 = vmul.f32 0.5, %v5016_v13  ;;  %v8713_v56 = vld [vmem:[#allocation90_spill] sm:$0xff] }
 0x260   : > { %v5024_v14 = vpop.eup %5023  ;;  %5033 = vtanh.f32 %v8707_v48  ;;  %v3053_v2 = vadd.f32 0.5, %v2733_v30  ;;  %v2753_v34 = vmul.f32 0.5, %v5018_v42  ;;  %v2755_v10 = vmul.f32 0.5, %v5020_v61  ;;  %v8714_v42 = vld [vmem:[#allocation71_spill] sm:$0xff]  ;;  %v7474_v61 = vpop.f32.mrf.mxu0 }
 0x261   : > { %5035 = vtanh.f32 %v8710_v6  ;;  %v3727_v21 = vadd.f32 %v3726_v57, %v3353_v18  ;;  %v3356_v58 = vmul.f32 %v3036_v41, %v8711_v45  ;;  %v2754_v28 = vmul.f32 0.5, %v5022_v40  ;;  %8715 = vst [vmem:[#allocation39_spill] sm:$0xff] %v7474_v61  ;;  %v7476_v57 = vpop.f32.mrf.mxu1  ;;  %v8717_v41 = vld [vmem:[#allocation59_spill] sm:$0xff]  ;;  %v8720_v6 = vld [vmem:[#allocation9_spill] sm:$0xff]  ;;  %v8721_v45 = vld [vmem:[#allocation60_spill] sm:$0xff] }
 0x262   : > { %5037 = vtanh.f32 %v8712_v27  ;;  %v3757_v49 = vadd.f32 %v3756_v46, %v3355_v38  ;;  %v3055_v13 = vadd.f32 0.5, %v2735_v37  ;;  %v2756_v5 = vmul.f32 0.5, %v5024_v14  ;;  %8716 = vst [vmem:[#allocation40_spill] sm:$0xff] %v7476_v57 }
 0x263   : > { %v5026_v22 = vpop.eup %5025  ;;  %5039 = vtanh.f32 %v8713_v56  ;;  %v3742_v59 = vadd.f32 %v3741_v60, %v3354_v12  ;;  %v3054_v63 = vadd.f32 0.5, %v2734_v4  ;;  %v3056_v30 = vadd.f32 0.5, %v2736_v36  ;;  %v8718_v60 = vld [vmem:[#allocation72_spill] sm:$0xff]  ;;  %v8719_v12 = vld [vmem:[#allocation51_spill] sm:$0xff]  ;;  %v8722_v56 = vld [vmem:[#allocation29_spill] sm:$0xff] }
 0x264   : > { %v5028_v8 = vpop.eup %5027  ;;  %5041 = vtanh.f32 %v8714_v42  ;;  %v3373_v40 = vmul.f32 %v3053_v2, %v8717_v41  ;;  %v3073_v53 = vadd.f32 0.5, %v2753_v34  ;;  %v3075_v25 = vadd.f32 0.5, %v2755_v10  ;;  %v8723_v10 = vld [vmem:[#allocation73_spill] sm:$0xff] }
 0x265   : > { %v5030_v18 = vpop.eup %5029  ;;  %5043 = vtanh.f32 %v7323_v3  ;;  %v3772_v38 = vadd.f32 %v3771_v20, %v3356_v58  ;;  %v3074_v37 = vadd.f32 0.5, %v2754_v28  ;;  %v2773_v14 = vmul.f32 0.5, %v5026_v22  ;;  %v7486_v3 = vpop.f32.mrf.mxu0  ;;  %v8726_v58 = vld [vmem:[#allocation31_spill] sm:$0xff]  ;;  %v8727_v22 = vld [vmem:[#allocation52_spill] sm:$0xff] }
 0x266   : > { %v5032_v46 = vpop.eup %5031  ;;  %5045 = vtanh.f32 %v8718_v60  ;;  %v3375_v4 = vmul.f32 %v3055_v13, %v8719_v12  ;;  %v3076_v36 = vadd.f32 0.5, %v2756_v5  ;;  %v2775_v48 = vmul.f32 0.5, %v5028_v8  ;;  %8724 = vst [vmem:[#allocation36_spill] sm:$0xff] %v7486_v3  ;;  %v7488_v20 = vpop.f32.mrf.mxu1  ;;  %v8728_v8 = vld [vmem:[#allocation32_spill] sm:$0xff] }
 0x267   : > { %5047 = vtanh.f32 %v8720_v6  ;;  %v3374_v27 = vmul.f32 %v3054_v63, %v8721_v45  ;;  %v3376_v2 = vmul.f32 %v3056_v30, %v8722_v56  ;;  %v2774_v34 = vmul.f32 0.5, %v5030_v18  ;;  %8725 = vst [vmem:[#allocation53_spill] sm:$0xff] %v7488_v20  ;;  %v8729_v18 = vld [vmem:[#allocation61_spill] sm:$0xff] }
 0x268   : > { %5049 = vtanh.f32 %v8723_v10  ;;  %v3393_v28 = vmul.f32 %v3073_v53, %v8726_v58  ;;  %v3395_v42 = vmul.f32 %v3075_v25, %v8727_v22  ;;  %v2776_v13 = vmul.f32 0.5, %v5032_v46  ;;  %v7498_v25 = vpop.f32.mrf.mxu0 }
 0x269   : > { %5051 = vtanh.f32 %v7339_v47  ;;  %v3728_v5 = vadd.f32 %v3727_v21, %v3373_v40  ;;  %v3394_v41 = vmul.f32 %v3074_v37, %v8728_v8  ;;  %v3093_v63 = vadd.f32 0.5, %v2773_v14  ;;  %8730 = vst [vmem:[#allocation42_spill] sm:$0xff] %v7498_v25  ;;  %v7500_v47 = vpop.f32.mrf.mxu1  ;;  %v8732_v14 = vld [vmem:[#allocation62_spill] sm:$0xff] }
 0x26a   : > { %5053 = vtanh.f32 %v7342_v29  ;;  %v3758_v30 = vadd.f32 %v3757_v49, %v3375_v4  ;;  %v3396_v60 = vmul.f32 %v3076_v36, %v8729_v18  ;;  %v3095_v12 = vadd.f32 0.5, %v2775_v48  ;;  %8731 = vst [vmem:[#allocation41_spill] sm:$0xff] %v7500_v47  ;;  %v8739_v8 = vld [vmem:[#allocation82_spill] sm:$0xff] }
 0x26b   : > { %5055 = vtanh.f32 %v7345_v16  ;;  %v3743_v6 = vadd.f32 %v3742_v59, %v3374_v27  ;;  %v3773_v45 = vadd.f32 %v3772_v38, %v3376_v2  ;;  %v3094_v53 = vadd.f32 0.5, %v2774_v34  ;;  %v8734_v27 = vld [vmem:[#allocation79_spill] sm:$0xff]  ;;  %v8735_v2 = vld [vmem:[#allocation34_spill] sm:$0xff] }
 0x26c   : > { %5057 = vtanh.f32 %v7348_v33  ;;  %v3729_v40 = vadd.f32 %v3728_v5, %v3393_v28  ;;  %v3759_v46 = vadd.f32 %v3758_v30, %v3395_v42  ;;  %v3096_v37 = vadd.f32 0.5, %v2776_v13  ;;  %v8733_v33 = vld [vmem:[#allocation33_spill] sm:$0xff]  ;;  %v7511_v28 = vpop.f32.mrf.mxu1 }
 0x26d   : > { %v5034_v21 = vpop.eup %5033  ;;  %5059 = vtanh.f32 %v7353_v55  ;;  %v3744_v49 = vadd.f32 %v3743_v6, %v3394_v41  ;;  %v3413_v4 = vmul.f32 %v3093_v63, %v8732_v14  ;;  %v3774_v38 = vadd.f32 %v3773_v45, %v3396_v60  ;;  %v7509_v55 = vpop.f32.mrf.mxu0  ;;  %8737 = vst [vmem:[#allocation44_spill] sm:$0xff] %v7511_v28 }
 0x26e   : > { %v5036_v29 = vpop.eup %5035  ;;  %v2793_v16 = vmul.f32 0.5, %v5034_v21  ;;  %5061 = vtanh.f32 %v7357_v62  ;;  %v3415_v36 = vmul.f32 %v3095_v12, %v8733_v33  ;;  %v3414_v34 = vmul.f32 %v3094_v53, %v8735_v2  ;;  %8736 = vst [vmem:[#allocation43_spill] sm:$0xff] %v7509_v55  ;;  %v8738_v62 = vld [vmem:[#allocation63_spill] sm:$0xff]  ;;  %v8740_v21 = vld [vmem:[#allocation64_spill] sm:$0xff]  ;;  %v8743_v33 = vld [vmem:[#allocation30_spill] sm:$0xff] }
 0x26f   : > { %v5038_v59 = vpop.eup %5037  ;;  %v2795_v48 = vmul.f32 0.5, %v5036_v29  ;;  %5063 = vtanh.f32 %v8734_v27  ;;  %v3416_v42 = vmul.f32 %v3096_v37, %v8738_v62  ;;  %v3730_v63 = vadd.f32 %v3729_v40, %v3413_v4  ;;  %v8744_v27 = vld [vmem:[#allocation10_spill] sm:$0xff] }
 0x270   : > { %v5040_v56 = vpop.eup %5039  ;;  %v3113_v10 = vadd.f32 0.5, %v2793_v16  ;;  %v2794_v58 = vmul.f32 0.5, %v5038_v59  ;;  %5065 = vtanh.f32 %v7368_v0  ;;  %v3760_v12 = vadd.f32 %v3759_v46, %v3415_v36  ;;  %v7518_v16 = vpop.f32.mrf.mxu0  ;;  %v8747_v62 = vld [vmem:[#allocation6_spill] sm:$0xff] }
 0x271   : > { %v5042_v22 = vpop.eup %5041  ;;  %v3115_v13 = vadd.f32 0.5, %v2795_v48  ;;  %v2796_v5 = vmul.f32 0.5, %v5040_v56  ;;  %5067 = vtanh.f32 %v8739_v8  ;;  %v3745_v53 = vadd.f32 %v3744_v49, %v3414_v34  ;;  %8741 = vst [vmem:[#allocation45_spill] sm:$0xff] %v7518_v16  ;;  %v7520_v59 = vpop.f32.mrf.mxu1 }
 0x272   : > { %v5044_v41 = vpop.eup %5043  ;;  %v3114_v30 = vadd.f32 0.5, %v2794_v58  ;;  %v2813_v18 = vmul.f32 0.5, %v5042_v22  ;;  %5069 = vtanh.f32 %v7452_v24  ;;  %v3433_v37 = vmul.f32 %v3113_v10, %v8740_v21  ;;  %8742 = vst [vmem:[#allocation46_spill] sm:$0xff] %v7520_v59  ;;  %v8746_v58 = vld [vmem:[#allocation66_spill] sm:$0xff] }
 0x273   : > { %v5046_v60 = vpop.eup %5045  ;;  %v3116_v0 = vadd.f32 0.5, %v2796_v5  ;;  %v2815_v6 = vmul.f32 0.5, %v5044_v41  ;;  %5071 = vtanh.f32 %v7459_v32  ;;  %v3775_v4 = vadd.f32 %v3774_v38, %v3416_v42  ;;  %v8745_v32 = vld [vmem:[#allocation65_spill] sm:$0xff]  ;;  %v8748_v42 = vld [vmem:[#allocation24_spill] sm:$0xff] }
 0x274   : > { %v5048_v45 = vpop.eup %5047  ;;  %v3133_v29 = vadd.f32 0.5, %v2813_v18  ;;  %v2814_v14 = vmul.f32 0.5, %v5046_v60  ;;  %v3435_v24 = vmul.f32 %v3115_v13, %v8743_v33  ;;  %v3434_v56 = vmul.f32 %v3114_v30, %v8744_v27  ;;  %v7530_v30 = vpop.f32.mrf.mxu1 }
 0x275   : > { %v5050_v40 = vpop.eup %5049  ;;  %v3135_v48 = vadd.f32 0.5, %v2815_v6  ;;  %v2816_v46 = vmul.f32 0.5, %v5048_v45  ;;  %v3436_v2 = vmul.f32 %v3116_v0, %v8745_v32  ;;  %v3731_v38 = vadd.f32 %v3730_v63, %v3433_v37  ;;  %v7528_v45 = vpop.f32.mrf.mxu0  ;;  %8750 = vst [vmem:[#allocation49_spill] sm:$0xff] %v7530_v30 }
 0x276   : > { %v5052_v36 = vpop.eup %5051  ;;  %v3134_v49 = vadd.f32 0.5, %v2814_v14  ;;  %v2833_v34 = vmul.f32 0.5, %v5050_v40  ;;  %v3453_v22 = vmul.f32 %v3133_v29, %v8746_v58  ;;  %8749 = vst [vmem:[#allocation48_spill] sm:$0xff] %v7528_v45  ;;  %v3761_v21 = vadd.f32 %v3760_v12, %v3435_v24  ;;  %v8751_v14 = vld [vmem:[#allocation19_spill] sm:$0xff] }
 0x277   : > { %v5054_v10 = vpop.eup %5053  ;;  %v3455_v5 = vmul.f32 %v3135_v48, %v8747_v62  ;;  %v3136_v8 = vadd.f32 0.5, %v2816_v46  ;;  %v2835_v41 = vmul.f32 0.5, %v5052_v36  ;;  %v3746_v48 = vadd.f32 %v3745_v53, %v3434_v56  ;;  %v7534_v24 = vpop.f32.mrf.mxu0 }
 0x278   : > { %v5056_v18 = vpop.eup %5055  ;;  %v3454_v13 = vmul.f32 %v3134_v49, %v8748_v42  ;;  %v3153_v60 = vadd.f32 0.5, %v2833_v34  ;;  %v2834_v6 = vmul.f32 0.5, %v5054_v10  ;;  %v3776_v46 = vadd.f32 %v3775_v4, %v3436_v2  ;;  %v8752_v42 = vld [vmem:[#allocation20_spill] sm:$0xff]  ;;  %8753 = vst [vmem:[#allocation15_spill] sm:$0xff] %v7534_v24  ;;  %v8755_v4 = vld [vmem:[#allocation25_spill] sm:$0xff] }
 0x279   : > { %v5058_v0 = vpop.eup %5057  ;;  %v3456_v40 = vmul.f32 %v3136_v8, %v8751_v14  ;;  %v3155_v33 = vadd.f32 0.5, %v2835_v41  ;;  %v2836_v29 = vmul.f32 0.5, %v5056_v18  ;;  %v3732_v37 = vadd.f32 %v3731_v38, %v3453_v22  ;;  %v7536_v8 = vpop.f32.mrf.mxu1  ;;  %v8758_v14 = vld [vmem:[#allocation26_spill] sm:$0xff] }
 0x27a   : > { %v5060_v27 = vpop.eup %5059  ;;  %v3154_v36 = vadd.f32 0.5, %v2834_v6  ;;  %v2853_v32 = vmul.f32 0.5, %v5058_v0  ;;  %v3762_v49 = vadd.f32 %v3761_v21, %v3455_v5  ;;  %v3747_v62 = vadd.f32 %v3746_v48, %v3454_v13  ;;  %8754 = vst [vmem:[#allocation88_spill] sm:$0xff] %v7536_v8  ;;  %v8756_v5 = vld [vmem:[#allocation67_spill] sm:$0xff]  ;;  %v8757_v6 = vld [vmem:[#allocation68_spill] sm:$0xff] }
 0x27b   : > { %v5062_v63 = vpop.eup %5061  ;;  %v3156_v34 = vadd.f32 0.5, %v2836_v29  ;;  %v2855_v10 = vmul.f32 0.5, %v5060_v27  ;;  %v3473_v30 = vmul.f32 %v3153_v60, %v8752_v42  ;;  %v3777_v53 = vadd.f32 %v3776_v46, %v3456_v40  ;;  %v8759_v27 = vld [vmem:[#allocation35_spill] sm:$0xff]  ;;  %v3535_v8 = vld [vmem:[#allocation2 + $0x98] sm:$0xff] }
 0x27c   : > { %v5064_v58 = vpop.eup %5063  ;;  %v3173_v45 = vadd.f32 0.5, %v2853_v32  ;;  %v2854_v12 = vmul.f32 0.5, %v5062_v63  ;;  %v3475_v56 = vmul.f32 %v3155_v33, %v8755_v4  ;;  %v3474_v38 = vmul.f32 %v3154_v36, %v8756_v5  ;;  %v8760_v46 = vld [vmem:[#allocation7_spill] sm:$0xff]  ;;  %v7544_v4 = vpop.f32.mrf.mxu0 }
 0x27d   : > { %v5066_v41 = vpop.eup %5065  ;;  %v3175_v2 = vadd.f32 0.5, %v2855_v10  ;;  %v2856_v18 = vmul.f32 0.5, %v5064_v58  ;;  %v3476_v29 = vmul.f32 %v3156_v34, %v8758_v14  ;;  %v3733_v40 = vadd.f32 %v3732_v37, %v3473_v30  ;;  %8761 = vst [vmem:[#allocation89_spill] sm:$0xff] %v7544_v4  ;;  %v7546_v36 = vpop.f32.mrf.mxu1  ;;  %v3533_v37 = vld [vmem:[#allocation2 + $0x58] sm:$0xff] }
 0x27e   : > { %v5068_v22 = vpop.eup %5067  ;;  %v3493_v0 = vmul.f32 %v3173_v45, %v8757_v6  ;;  %v3174_v13 = vadd.f32 0.5, %v2854_v12  ;;  %v2873_v21 = vmul.f32 0.5, %v5066_v41  ;;  %8762 = vst [vmem:[#allocation91_spill] sm:$0xff] %v7546_v36  ;;  %v3763_v45 = vadd.f32 %v3762_v49, %v3475_v56  ;;  %v8763_v12 = vld [vmem:[#allocation27_spill] sm:$0xff]  ;;  %v7552_v56 = vpop.f32.mrf.mxu0 }
 0x27f   : > { %v5070_v60 = vpop.eup %5069  ;;  %v3495_v48 = vmul.f32 %v3175_v2, %v8759_v27  ;;  %v3176_v32 = vadd.f32 0.5, %v2856_v18  ;;  %v2875_v63 = vmul.f32 0.5, %v5068_v22  ;;  %v3748_v34 = vadd.f32 %v3747_v62, %v3474_v38  ;;  %v8764_v2 = vld [vmem:[#allocation54_spill] sm:$0xff]  ;;  %8766 = vst [vmem:[#allocation92_spill] sm:$0xff] %v7552_v56 }
 0x280   : > { %v5072_v42 = vpop.eup %5071  ;;  %v3494_v33 = vmul.f32 %v3174_v13, %v8760_v46  ;;  %v3193_v10 = vadd.f32 0.5, %v2873_v21  ;;  %v2874_v58 = vmul.f32 0.5, %v5070_v60  ;;  %v3734_v14 = vadd.f32 %v3733_v40, %v3493_v0  ;;  %v8765_v13 = vld [vmem:[#allocation28_spill] sm:$0xff]  ;;  %v3534_v0 = vld [vmem:[#allocation2 + $0x10] sm:$0xff] }
 0x281   : > { %v3496_v41 = vmul.f32 %v3176_v32, %v8763_v12  ;;  %v3195_v5 = vadd.f32 0.5, %v2875_v63  ;;  %v2876_v6 = vmul.f32 0.5, %v5072_v42  ;;  %v3778_v27 = vadd.f32 %v3777_v53, %v3476_v29  ;;  %v7554_v32 = vpop.f32.mrf.mxu1 }
 0x282   : > { %v3513_v18 = vmul.f32 %v3193_v10, %v8764_v2  ;;  %v3194_v22 = vadd.f32 0.5, %v2874_v58  ;;  %v3764_v30 = vadd.f32 %v3763_v45, %v3495_v48  ;;  %v3749_v46 = vadd.f32 %v3748_v34, %v3494_v33  ;;  %8767 = vst [vmem:[#allocation93_spill] sm:$0xff] %v7554_v32  ;;  %v3536_v48 = vld [vmem:[#allocation2 + $0x60] sm:$0xff]  ;;  %v7557_v10 = vpop.f32.mrf.mxu0  ;;  %v8770_v45 = vld [vmem:[#allocation12_spill] sm:$0xff]  ;;  %v8775_v34 = vld [vmem:[#allocation87_spill] sm:$0xff] }
 0x283   : > { %v3515_v21 = vmul.f32 %v3195_v5, %v8765_v13  ;;  %v3196_v60 = vadd.f32 0.5, %v2876_v6  ;;  %v3779_v62 = vadd.f32 %v3778_v27, %v3496_v41  ;;  %8768 = vst [vmem:[#allocation94_spill] sm:$0xff] %v7557_v10  ;;  %v7559_v58 = vpop.f32.mrf.mxu1  ;;  %v1937_v12 = vmul.f32 0.5, %v8770_v45  ;;  %v8771_v41 = vld [vmem:[#allocation13_spill] sm:$0xff]  ;;  %v8776_v2 = vld [vmem:[#allocation14_spill] sm:$0xff] }
 0x284   : > { %v3735_v4 = vadd.f32 %v3734_v14, %v3513_v18  ;;  %v3514_v49 = vmul.f32 %v3194_v22, %v8700_v1  ;;  %8769 = vst [vmem:[#allocation95_spill] sm:$0xff] %v7559_v58  ;;  %v1939_v5 = vmul.f32 0.5, %v8771_v41  ;;  %v1957_v14 = vmul.f32 0.5, %v8775_v34  ;;  %v8777_v22 = vld [vmem:[#allocation16_spill] sm:$0xff]  ;;  %v8780_v13 = vld [vmem:[#allocation77_spill] sm:$0xff] }
 0x285   : > { %v3765_v38 = vadd.f32 %v3764_v30, %v3515_v21  ;;  %v3516_v63 = vmul.f32 %v3196_v60, %v8703_v52  ;;  %v7563_v52 = vpop.f32.mrf.mxu0  ;;  %5073 = vtanh.f32 %v1937_v12  ;;  %v1940_v18 = vmul.f32 0.5, %v8776_v2  ;;  %v8781_v60 = vld [vmem:[#allocation78_spill] sm:$0xff]  ;;  %v8787_v12 = vld [vmem:[#allocation85_spill] sm:$0xff] }
 0x286   : > { %v3853_v53 = vadd.f32 %v3735_v4, %v3533_v37  ;;  %v3750_v29 = vadd.f32 %v3749_v46, %v3514_v49  ;;  %8772 = vst [vmem:[#allocation96_spill] sm:$0xff] %v7563_v52  ;;  %v7565_v4 = vpop.f32.mrf.mxu1  ;;  %5075 = vtanh.f32 %v1939_v5  ;;  %v1959_v27 = vmul.f32 0.5, %v8777_v22  ;;  %v8782_v49 = vld [vmem:[#allocation80_spill] sm:$0xff] }
 0x287   : > { %v3855_v42 = vadd.f32 %v3765_v38, %v3535_v8  ;;  %v3780_v40 = vadd.f32 %v3779_v62, %v3516_v63  ;;  %8773 = vst [vmem:[#allocation97_spill] sm:$0xff] %v7565_v4  ;;  %v8774_v8 = vld [vmem:[#allocation56_spill] sm:$0xff]  ;;  %v7571_v30 = vpop.f32.mrf.mxu0  ;;  %v1958_v21 = vmul.f32 0.5, %v8780_v13  ;;  %v1960_v46 = vmul.f32 0.5, %v8781_v60  ;;  %v8783_v38 = vld [vmem:[#allocation81_spill] sm:$0xff] }
 0x288   : > { %3873 = vst [vmem:[#allocation2 + $0x58] sm:$0xff] %v3853_v53  ;;  %v3854_v33 = vadd.f32 %v3750_v29, %v3534_v0  ;;  %v1938_v6 = vmul.f32 0.5, %v8774_v8  ;;  %8778 = vst [vmem:[#allocation98_spill] sm:$0xff] %v7571_v30  ;;  %v7573_v37 = vpop.f32.mrf.mxu1  ;;  %v1977_v62 = vmul.f32 0.5, %v8782_v49  ;;  %v1979_v0 = vmul.f32 0.5, %v8783_v38 }
 0x289   : > { %3875 = vst [vmem:[#allocation2 + $0x98] sm:$0xff] %v3855_v42  ;;  %v3856_v1 = vadd.f32 %v3780_v40, %v3536_v48  ;;  %8779 = vst [vmem:[#allocation11_spill] sm:$0xff] %v7573_v37  ;;  %v7579_v63 = vpop.f32.mrf.mxu0  ;;  %v1978_v29 = vmul.f32 0.5, %v7377_v19  ;;  %v1980_v48 = vmul.f32 0.5, %v7379_v9  ;;  %v1997_v42 = vmul.f32 0.5, %v7389_v50 }
 0x28a   : > { %3874 = vst [vmem:[#allocation2 + $0x10] sm:$0xff] %v3854_v33  ;;  %5077 = vtanh.f32 %v1938_v6  ;;  %8784 = vst [vmem:[#allocation55_spill] sm:$0xff] %v7579_v63  ;;  %v7581_v53 = vpop.f32.mrf.mxu1  ;;  %v1999_v40 = vmul.f32 0.5, %v7391_v31  ;;  %v8786_v33 = vld [vmem:[#allocation83_spill] sm:$0xff]  ;;  %v2000_v5 = vmul.f32 0.5, %v8787_v12  ;;  %v2017_v6 = vmul.f32 0.5, %v7410_v23 }
 0x28b   : > { %3876 = vst [vmem:[#allocation2 + $0x60] sm:$0xff] %v3856_v1  ;;  %5079 = vtanh.f32 %v1957_v14  ;;  %8785 = vst [vmem:[#allocation47_spill] sm:$0xff] %v7581_v53  ;;  %v1998_v1 = vmul.f32 0.5, %v8786_v33  ;;  %v2019_v14 = vmul.f32 0.5, %v7412_v44  ;;  %v7603_v33 = vpop.f32.mrf.mxu0  ;;  %v7608_v44 = vmul.f32 0.5, %v7440_v7  ;;  %v8798_v12 = vld [vmem:[#allocation49_spill] sm:$0xff] }
 0x28c   : > { %5081 = vtanh.f32 %v1940_v18  ;;  %v7592_v18 = vmul.f32 0.5, %v7422_v54  ;;  %8788 = vst [vmem:[#allocation57_spill] sm:$0xff] %v7603_v33  ;;  %v7611_v54 = vmul.f32 0.5, %v7442_v35  ;;  %v7629_v35 = vmul.f32 0.5, %v7476_v57 }
 0x28d   : > { %5083 = vtanh.f32 %v1959_v27  ;;  %v7595_v27 = vmul.f32 0.5, %v7424_v26  ;;  %v7623_v26 = vmul.f32 0.5, %v7467_v39  ;;  %v7641_v39 = vmul.f32 0.5, %v7500_v47  ;;  %v8796_v47 = vld [vmem:[#allocation48_spill] sm:$0xff] }
 0x28e   : > { %5085 = vtanh.f32 %v1958_v21  ;;  %v7598_v21 = vmul.f32 0.5, %v7430_v43  ;;  %v7617_v43 = vmul.f32 0.5, %v7456_v15  ;;  %v7635_v15 = vmul.f32 0.5, %v7488_v20 }
 0x28f   : > { %5087 = vtanh.f32 %v1960_v46  ;;  %v7601_v46 = vmul.f32 0.5, %v7432_v17  ;;  %v7620_v17 = vmul.f32 0.5, %v7465_v11  ;;  %v7638_v11 = vmul.f32 0.5, %v7498_v25  ;;  %8791 = vst [vmem:[#allocation69_spill] sm:$0xff] %v7641_v39 }
 0x290   : > { %5089 = vtanh.f32 %v1977_v62  ;;  %v7605_v62 = vpop.f32.mrf.mxu1  ;;  %v7648_v7 = vmul.f32 0.5, %v7509_v55  ;;  %v7657_v25 = vmul.f32 0.5, %v7520_v59  ;;  %v7660_v23 = vmul.f32 0.5, %v8796_v47  ;;  %v8799_v55 = vld [vmem:[#allocation88_spill] sm:$0xff] }
 0x291   : > { %5091 = vtanh.f32 %v1979_v0  ;;  %8789 = vst [vmem:[#allocation50_spill] sm:$0xff] %v7605_v62  ;;  %v7614_v0 = vmul.f32 0.5, %v7454_v51  ;;  %v7632_v51 = vmul.f32 0.5, %v7486_v3  ;;  %8790 = vst [vmem:[#allocation17_spill] sm:$0xff] %v7638_v11  ;;  %v7651_v3 = vmul.f32 0.5, %v7511_v28 }
 0x292   : > { %5093 = vtanh.f32 %v1978_v29  ;;  %v7626_v29 = vmul.f32 0.5, %v7474_v61  ;;  %v7645_v61 = vpop.f32.mrf.mxu1  ;;  %8794 = vst [vmem:[#allocation90_spill] sm:$0xff] %v7648_v7  ;;  %8797 = vst [vmem:[#allocation59_spill] sm:$0xff] %v7660_v23  ;;  %v7663_v39 = vmul.f32 0.5, %v8798_v12  ;;  %v7666_v11 = vmul.f32 0.5, %v7534_v24 }
 0x293   : > { %5095 = vtanh.f32 %v1980_v48  ;;  %v5074_v48 = vpop.eup %5073  ;;  %8793 = vst [vmem:[#allocation70_spill] sm:$0xff] %v7645_v61  ;;  %v7669_v7 = vmul.f32 0.5, %v8799_v55  ;;  %v7675_v59 = vmul.f32 0.5, %v7546_v36  ;;  %v7678_v47 = vmul.f32 0.5, %v7552_v56 }
 0x294   : > { %5097 = vtanh.f32 %v1997_v42  ;;  %v7643_v42 = vpop.f32.mrf.mxu0  ;;  %v5076_v57 = vpop.eup %5075  ;;  %v7681_v12 = vmul.f32 0.5, %v7554_v32  ;;  %v7684_v24 = vmul.f32 0.5, %v7557_v10  ;;  %v7687_v55 = vmul.f32 0.5, %v7559_v58 }
 0x295   : > { %5099 = vtanh.f32 %v1999_v40  ;;  %8792 = vst [vmem:[#allocation58_spill] sm:$0xff] %v7643_v42  ;;  %v7654_v40 = vmul.f32 0.5, %v7518_v16  ;;  %v8800_v16 = vld [vmem:[#allocation89_spill] sm:$0xff]  ;;  %v7694_v56 = vmul.f32 0.5, %v7563_v52  ;;  %v7700_v32 = vmul.f32 0.5, %v7571_v30 }
 0x296   : > { %5101 = vtanh.f32 %v1998_v1  ;;  %8801 = vst [vmem:[#allocation72_spill] sm:$0xff] %v7681_v12  ;;  %8802 = vst [vmem:[#allocation51_spill] sm:$0xff] %v7684_v24  ;;  %v7689_v1 = vpop.f32.mrf.mxu0  ;;  %v7703_v58 = vmul.f32 0.5, %v7573_v37  ;;  %v7712_v52 = vmul.f32 0.5, %v7603_v33  ;;  %v7718_v30 = vmul.f32 0.5, %v7643_v42 }
 0x297   : > { %8795 = vst [vmem:[#allocation71_spill] sm:$0xff] %v7654_v40  ;;  %v5078_v20 = vpop.eup %5077  ;;  %v7672_v40 = vmul.f32 0.5, %v8800_v16  ;;  %5103 = vtanh.f32 %v2000_v5  ;;  %8803 = vst [vmem:[#allocation9_spill] sm:$0xff] %v7687_v55  ;;  %v7691_v16 = vpop.f32.mrf.mxu1  ;;  %v7697_v5 = vmul.f32 0.5, %v7565_v4  ;;  %v7706_v55 = vmul.f32 0.5, %v7579_v63 }
 0x298   : > { %v5080_v28 = vpop.eup %5079  ;;  %8804 = vst [vmem:[#allocation60_spill] sm:$0xff] %v7689_v1  ;;  %8805 = vst [vmem:[#allocation29_spill] sm:$0xff] %v7691_v16  ;;  %5105 = vtanh.f32 %v2017_v6  ;;  %v7709_v6 = vmul.f32 0.5, %v7581_v53  ;;  %v7715_v4 = vmul.f32 0.5, %v7605_v62  ;;  %v2579_v37 = vmul.f32 0.5, %v5076_v57  ;;  %v7721_v63 = vpop.f32.mrf.mxu0 }
 0x299   : > { %v5082_v23 = vpop.eup %5081  ;;  %v2597_v24 = vmul.f32 0.5, %v5080_v28  ;;  %5107 = vtanh.f32 %v2019_v14  ;;  %8806 = vst [vmem:[#allocation73_spill] sm:$0xff] %v7703_v58  ;;  %8807 = vst [vmem:[#allocation31_spill] sm:$0xff] %v7706_v55  ;;  %v2577_v14 = vmul.f32 0.5, %v5074_v48  ;;  %v2578_v58 = vmul.f32 0.5, %v5078_v20  ;;  %v7723_v55 = vpop.f32.mrf.mxu1 }
 0x29a   : > { %v5084_v36 = vpop.eup %5083  ;;  %8808 = vst [vmem:[#allocation52_spill] sm:$0xff] %v7709_v6  ;;  %8809 = vst [vmem:[#allocation32_spill] sm:$0xff] %v7718_v30  ;;  %5109 = vtanh.f32 %v7592_v18  ;;  %v2580_v6 = vmul.f32 0.5, %v5082_v23  ;;  %v7727_v62 = vmul.f32 0.5, %v7645_v61  ;;  %v7731_v57 = vmul.f32 0.5, %v7689_v1 }
 0x29b   : > { %v5086_v10 = vpop.eup %5085  ;;  %8810 = vst [vmem:[#allocation61_spill] sm:$0xff] %v7721_v63  ;;  %8811 = vst [vmem:[#allocation62_spill] sm:$0xff] %v7723_v55  ;;  %v2599_v33 = vmul.f32 0.5, %v5084_v36  ;;  %5111 = vtanh.f32 %v7595_v27  ;;  %v2917_v30 = vadd.f32 0.5, %v2597_v24  ;;  %v7734_v20 = vmul.f32 0.5, %v7691_v16 }
 0x29c   : > { %v5088_v12 = vpop.eup %5087  ;;  %5113 = vtanh.f32 %v7598_v21  ;;  %8812 = vst [vmem:[#allocation33_spill] sm:$0xff] %v7731_v57  ;;  %v2598_v48 = vmul.f32 0.5, %v5086_v10  ;;  %v7738_v23 = vmul.f32 0.5, %v7721_v63  ;;  %v7741_v36 = vmul.f32 0.5, %v7723_v55 }
 0x29d   : > { %v5090_v28 = vpop.eup %5089  ;;  %8813 = vst [vmem:[#allocation79_spill] sm:$0xff] %v7734_v20  ;;  %5115 = vtanh.f32 %v7601_v46  ;;  %v2897_v24 = vadd.f32 0.5, %v2577_v14  ;;  %v2899_v61 = vadd.f32 0.5, %v2579_v37  ;;  %v2898_v21 = vadd.f32 0.5, %v2578_v58 }
 0x29e   : > { %v5092_v53 = vpop.eup %5091  ;;  %8814 = vst [vmem:[#allocation34_spill] sm:$0xff] %v7738_v23  ;;  %8815 = vst [vmem:[#allocation63_spill] sm:$0xff] %v7741_v36  ;;  %5117 = vtanh.f32 %v7608_v44  ;;  %v2900_v57 = vadd.f32 0.5, %v2580_v6  ;;  %v2919_v16 = vadd.f32 0.5, %v2599_v33  ;;  %v2600_v20 = vmul.f32 0.5, %v5088_v12 }
 0x29f   : > { %v5094_v42 = vpop.eup %5093  ;;  %5119 = vtanh.f32 %v7611_v54  ;;  %v3237_v10 = vmul.f32 %v2917_v30, %v8775_v34  ;;  %v2617_v46 = vmul.f32 0.5, %v5090_v28  ;;  %v2619_v63 = vmul.f32 0.5, %v5092_v53 }
 0x2a0   : > { %v5096_v18 = vpop.eup %5095  ;;  %5121 = vtanh.f32 %v7614_v0  ;;  %v2918_v55 = vadd.f32 0.5, %v2598_v48  ;;  %v2618_v36 = vmul.f32 0.5, %v5094_v42  ;;  %v3217_v44 = vmul.f32 %v2897_v24, %v8770_v45 }
 0x2a1   : > { %v5098_v27 = vpop.eup %5097  ;;  %v2620_v23 = vmul.f32 0.5, %v5096_v18  ;;  %5123 = vtanh.f32 %v7617_v43  ;;  %v3219_v54 = vmul.f32 %v2899_v61, %v8771_v41  ;;  %v3218_v34 = vmul.f32 %v2898_v21, %v8774_v8 }
 0x2a2   : > { %v5100_v1 = vpop.eup %5099  ;;  %v2637_v37 = vmul.f32 0.5, %v5098_v27  ;;  %5125 = vtanh.f32 %v7620_v17  ;;  %v2920_v30 = vadd.f32 0.5, %v2600_v20  ;;  %v3220_v12 = vmul.f32 %v2900_v57, %v8776_v2 }
 0x2a3   : > { %v5102_v58 = vpop.eup %5101  ;;  %v2639_v6 = vmul.f32 0.5, %v5100_v1  ;;  %5127 = vtanh.f32 %v7623_v26  ;;  %v3239_v43 = vmul.f32 %v2919_v16, %v8777_v22  ;;  %v2937_v0 = vadd.f32 0.5, %v2617_v46 }
 0x2a4   : > { %v5104_v33 = vpop.eup %5103  ;;  %v2939_v42 = vadd.f32 0.5, %v2619_v63  ;;  %v3781_v28 = vadd.f32 %v3237_v10, %v3217_v44  ;;  %v3238_v1 = vmul.f32 %v2918_v55, %v8780_v13  ;;  %v2938_v17 = vadd.f32 0.5, %v2618_v36 }
 0x2a5   : > { %v5106_v53 = vpop.eup %5105  ;;  %v2940_v14 = vadd.f32 0.5, %v2620_v23  ;;  %v2957_v18 = vadd.f32 0.5, %v2637_v37  ;;  %v2959_v61 = vadd.f32 0.5, %v2639_v6  ;;  %v2638_v41 = vmul.f32 0.5, %v5102_v58 }
 0x2a6   : > { %v5108_v45 = vpop.eup %5107  ;;  %5129 = vtanh.f32 %v7626_v29  ;;  %v3240_v26 = vmul.f32 %v2920_v30, %v8781_v60  ;;  %v2640_v20 = vmul.f32 0.5, %v5104_v33  ;;  %v2657_v2 = vmul.f32 0.5, %v5106_v53  ;;  %v8817_v33 = vld [vmem:[#allocation69_spill] sm:$0xff]  ;;  %v8819_v53 = vld [vmem:[#allocation90_spill] sm:$0xff] }
 0x2a7   : > { %v5110_v8 = vpop.eup %5109  ;;  %5131 = vtanh.f32 %v7629_v35  ;;  %v3257_v22 = vmul.f32 %v2937_v0, %v8782_v49  ;;  %v3259_v63 = vmul.f32 %v2939_v42, %v8783_v38  ;;  %v2659_v55 = vmul.f32 0.5, %v5108_v45  ;;  %v8821_v42 = vld [vmem:[#allocation84_spill] sm:$0xff] }
 0x2a8   : > { %v5112_v16 = vpop.eup %5111  ;;  %5133 = vtanh.f32 %v7632_v51  ;;  %v3811_v57 = vadd.f32 %v3239_v43, %v3219_v54  ;;  %v3796_v48 = vadd.f32 %v3238_v1, %v3218_v34  ;;  %v3258_v29 = vmul.f32 %v2938_v17, %v7377_v19  ;;  %v8816_v19 = vld [vmem:[#allocation17_spill] sm:$0xff]  ;;  %v8818_v34 = vld [vmem:[#allocation83_spill] sm:$0xff]  ;;  %v8822_v17 = vld [vmem:[#allocation86_spill] sm:$0xff] }
 0x2a9   : > { %v5114_v13 = vpop.eup %5113  ;;  %v3260_v23 = vmul.f32 %v2940_v14, %v7379_v9  ;;  %v3277_v36 = vmul.f32 %v2957_v18, %v7389_v50  ;;  %v3279_v35 = vmul.f32 %v2959_v61, %v7391_v31  ;;  %v2958_v27 = vadd.f32 0.5, %v2638_v41  ;;  %v8820_v43 = vld [vmem:[#allocation85_spill] sm:$0xff]  ;;  %v8823_v41 = vld [vmem:[#allocation71_spill] sm:$0xff] }
 0x2aa   : > { %v5116_v60 = vpop.eup %5115  ;;  %5135 = vtanh.f32 %v7635_v15  ;;  %v3826_v38 = vadd.f32 %v3240_v26, %v3220_v12  ;;  %v2960_v24 = vadd.f32 0.5, %v2640_v20  ;;  %v2977_v21 = vadd.f32 0.5, %v2657_v2 }
 0x2ab   : > { %v5118_v49 = vpop.eup %5117  ;;  %v2658_v51 = vmul.f32 0.5, %v5110_v8  ;;  %v3782_v46 = vadd.f32 %v3781_v28, %v3257_v22  ;;  %v3812_v58 = vadd.f32 %v3811_v57, %v3259_v63  ;;  %v2979_v44 = vadd.f32 0.5, %v2659_v55  ;;  %v8824_v63 = vld [vmem:[#allocation59_spill] sm:$0xff] }
 0x2ac   : > { %v5120_v10 = vpop.eup %5119  ;;  %5137 = vtanh.f32 %v8816_v19  ;;  %v3797_v37 = vadd.f32 %v3796_v48, %v3258_v29  ;;  %v3827_v6 = vadd.f32 %v3826_v38, %v3260_v23  ;;  %v2660_v50 = vmul.f32 0.5, %v5112_v16  ;;  %v8825_v23 = vld [vmem:[#allocation74_spill] sm:$0xff] }
 0x2ad   : > { %v5122_v9 = vpop.eup %5121  ;;  %5139 = vtanh.f32 %v8817_v33  ;;  %v3783_v54 = vadd.f32 %v3782_v46, %v3277_v36  ;;  %v3813_v15 = vadd.f32 %v3812_v58, %v3279_v35  ;;  %v3278_v30 = vmul.f32 %v2958_v27, %v8818_v34 }
 0x2ae   : > { %v5124_v31 = vpop.eup %5123  ;;  %5141 = vtanh.f32 %v8819_v53  ;;  %v3280_v0 = vmul.f32 %v2960_v24, %v8820_v43  ;;  %v3297_v45 = vmul.f32 %v2977_v21, %v8821_v42  ;;  %v2978_v28 = vadd.f32 0.5, %v2658_v51  ;;  %v8831_v43 = vld [vmem:[#allocation8_spill] sm:$0xff] }
 0x2af   : > { %v5126_v12 = vpop.eup %5125  ;;  %5143 = vtanh.f32 %v7651_v3  ;;  %v3299_v14 = vmul.f32 %v2979_v44, %v8822_v17  ;;  %v2677_v18 = vmul.f32 0.5, %v5114_v13  ;;  %v2679_v61 = vmul.f32 0.5, %v5116_v60 }
 0x2b0   : > { %v5128_v1 = vpop.eup %5127  ;;  %5145 = vtanh.f32 %v8823_v41  ;;  %v2980_v8 = vadd.f32 0.5, %v2660_v50  ;;  %v2678_v26 = vmul.f32 0.5, %v5118_v49  ;;  %v2680_v20 = vmul.f32 0.5, %v5120_v10 }
 0x2b1   : > { %5147 = vtanh.f32 %v7657_v25  ;;  %v3798_v2 = vadd.f32 %v3797_v37, %v3278_v30  ;;  %v2697_v16 = vmul.f32 0.5, %v5122_v9  ;;  %v2699_v22 = vmul.f32 0.5, %v5124_v31  ;;  %v8826_v25 = vld [vmem:[#allocation75_spill] sm:$0xff]  ;;  %v8827_v9 = vld [vmem:[#allocation76_spill] sm:$0xff]  ;;  %v8830_v30 = vld [vmem:[#allocation22_spill] sm:$0xff] }
 0x2b2   : > { %5149 = vtanh.f32 %v8824_v63  ;;  %v3828_v57 = vadd.f32 %v3827_v6, %v3280_v0  ;;  %v2698_v3 = vmul.f32 0.5, %v5126_v12  ;;  %v2700_v48 = vmul.f32 0.5, %v5128_v1  ;;  %v8828_v6 = vld [vmem:[#allocation18_spill] sm:$0xff]  ;;  %v7793_v1 = vpop.f32.mrf.mxu1 }
 0x2b3   : > { %v5130_v55 = vpop.eup %5129  ;;  %5151 = vtanh.f32 %v7663_v39  ;;  %v3784_v29 = vadd.f32 %v3783_v54, %v3297_v45  ;;  %v3298_v60 = vmul.f32 %v2978_v28, %v8825_v23  ;;  %v2997_v36 = vadd.f32 0.5, %v2677_v18  ;;  %v8832_v0 = vld [vmem:[#allocation38_spill] sm:$0xff] }
 0x2b4   : > { %v5132_v13 = vpop.eup %5131  ;;  %v2999_v35 = vadd.f32 0.5, %v2679_v61  ;;  %v3814_v49 = vadd.f32 %v3813_v15, %v3299_v14  ;;  %v3300_v38 = vmul.f32 %v2980_v8, %v8826_v25  ;;  %v2998_v24 = vadd.f32 0.5, %v2678_v26  ;;  %v8829_v15 = vld [vmem:[#allocation21_spill] sm:$0xff]  ;;  %v8833_v14 = vld [vmem:[#allocation23_spill] sm:$0xff]  ;;  %v8836_v25 = vld [vmem:[#allocation40_spill] sm:$0xff] }
 0x2b5   : > { %v5134_v27 = vpop.eup %5133  ;;  %v3000_v21 = vadd.f32 0.5, %v2680_v20  ;;  %v3017_v51 = vadd.f32 0.5, %v2697_v16  ;;  %v3019_v10 = vadd.f32 0.5, %v2699_v22  ;;  %v2717_v46 = vmul.f32 0.5, %v5130_v55  ;;  %v8834_v61 = vld [vmem:[#allocation37_spill] sm:$0xff] }
 0x2b6   : > { %5153 = vtanh.f32 %v7666_v11  ;;  %v3018_v44 = vadd.f32 0.5, %v2698_v3  ;;  %v3020_v39 = vadd.f32 0.5, %v2700_v48  ;;  %v2719_v19 = vmul.f32 0.5, %v5132_v13  ;;  %v7789_v11 = vpop.f32.mrf.mxu0 }
 0x2b7   : > { %v5136_v58 = vpop.eup %5135  ;;  %5155 = vtanh.f32 %v7669_v7  ;;  %v3317_v37 = vmul.f32 %v2997_v36, %v8827_v9  ;;  %v3319_v50 = vmul.f32 %v2999_v35, %v8828_v6  ;;  %v2718_v33 = vmul.f32 0.5, %v5134_v27  ;;  %v8838_v9 = vld [vmem:[#allocation72_spill] sm:$0xff]  ;;  %v8839_v6 = vld [vmem:[#allocation53_spill] sm:$0xff] }
 0x2b8   : > { %5157 = vtanh.f32 %v7672_v40  ;;  %v3799_v54 = vadd.f32 %v3798_v2, %v3298_v60  ;;  %v3318_v34 = vmul.f32 %v2998_v24, %v8829_v15  ;;  %v3320_v53 = vmul.f32 %v3000_v21, %v8830_v30  ;;  %v8835_v60 = vld [vmem:[#allocation39_spill] sm:$0xff] }
 0x2b9   : > { %v5138_v31 = vpop.eup %5137  ;;  %5159 = vtanh.f32 %v7675_v59  ;;  %v3337_v7 = vmul.f32 %v3017_v51, %v8831_v43  ;;  %v3339_v42 = vmul.f32 %v3019_v10, %v8832_v0  ;;  %v3037_v45 = vadd.f32 0.5, %v2717_v46  ;;  %v8837_v51 = vld [vmem:[#allocation36_spill] sm:$0xff] }
 0x2ba   : > { %v5140_v12 = vpop.eup %5139  ;;  %v2720_v28 = vmul.f32 0.5, %v5136_v58  ;;  %v3829_v17 = vadd.f32 %v3828_v57, %v3300_v38  ;;  %v3338_v18 = vmul.f32 %v3018_v44, %v8833_v14  ;;  %v3340_v41 = vmul.f32 %v3020_v39, %v8834_v61 }
 0x2bb   : > { %v5142_v40 = vpop.eup %5141  ;;  %v3039_v8 = vadd.f32 0.5, %v2719_v19  ;;  %v3785_v59 = vadd.f32 %v3784_v29, %v3317_v37  ;;  %v3815_v20 = vadd.f32 %v3814_v49, %v3319_v50  ;;  %v3038_v2 = vadd.f32 0.5, %v2718_v33 }
 0x2bc   : > { %v5144_v26 = vpop.eup %5143  ;;  %v7798_v16 = vmul.f32 0.5, %v7789_v11  ;;  %v3800_v63 = vadd.f32 %v3799_v54, %v3318_v34  ;;  %v3830_v55 = vadd.f32 %v3829_v17, %v3320_v53  ;;  %v2737_v3 = vmul.f32 0.5, %v5138_v31  ;;  %v8840_v31 = vld [vmem:[#allocation51_spill] sm:$0xff]  ;;  %v8841_v53 = vld [vmem:[#allocation9_spill] sm:$0xff] }
 0x2bd   : > { %v5146_v22 = vpop.eup %5145  ;;  %v7801_v48 = vmul.f32 0.5, %v7793_v1  ;;  %v3786_v13 = vadd.f32 %v3785_v59, %v3337_v7  ;;  %v3816_v23 = vadd.f32 %v3815_v20, %v3339_v42  ;;  %v3357_v36 = vmul.f32 %v3037_v45, %v8835_v60  ;;  %v8842_v42 = vld [vmem:[#allocation42_spill] sm:$0xff]  ;;  %v8844_v20 = vld [vmem:[#allocation73_spill] sm:$0xff] }
 0x2be   : > { %v5148_v57 = vpop.eup %5147  ;;  %v3040_v35 = vadd.f32 0.5, %v2720_v28  ;;  %v3801_v29 = vadd.f32 %v3800_v63, %v3338_v18  ;;  %v3831_v49 = vadd.f32 %v3830_v55, %v3340_v41  ;;  %v3359_v38 = vmul.f32 %v3039_v8, %v8836_v25  ;;  %v8843_v41 = vld [vmem:[#allocation41_spill] sm:$0xff] }
 0x2bf   : > { %v5150_v27 = vpop.eup %5149  ;;  %v2739_v24 = vmul.f32 0.5, %v5140_v12  ;;  %v3358_v10 = vmul.f32 %v3038_v2, %v8837_v51  ;;  %v2738_v46 = vmul.f32 0.5, %v5142_v40  ;;  %v2740_v58 = vmul.f32 0.5, %v5144_v26  ;;  %v8852_v25 = vld [vmem:[#allocation49_spill] sm:$0xff] }
 0x2c0   : > { %v5152_v21 = vpop.eup %5151  ;;  %5161 = vtanh.f32 %v7678_v47  ;;  %v3057_v44 = vadd.f32 0.5, %v2737_v3  ;;  %v2757_v39 = vmul.f32 0.5, %v5146_v22  ;;  %v2759_v19 = vmul.f32 0.5, %v5148_v57  ;;  %v8846_v22 = vld [vmem:[#allocation44_spill] sm:$0xff]  ;;  %v8847_v3 = vld [vmem:[#allocation31_spill] sm:$0xff] }
 0x2c1   : > { %5163 = vtanh.f32 %v8838_v9  ;;  %v3787_v37 = vadd.f32 %v3786_v13, %v3357_v36  ;;  %v3360_v50 = vmul.f32 %v3040_v35, %v8839_v6  ;;  %v2758_v33 = vmul.f32 0.5, %v5150_v27  ;;  %v8849_v13 = vld [vmem:[#allocation46_spill] sm:$0xff]  ;;  %v8850_v36 = vld [vmem:[#allocation52_spill] sm:$0xff] }
 0x2c2   : > { %5165 = vtanh.f32 %v8840_v31  ;;  %v3817_v15 = vadd.f32 %v3816_v23, %v3359_v38  ;;  %v3059_v34 = vadd.f32 0.5, %v2739_v24  ;;  %v2760_v30 = vmul.f32 0.5, %v5152_v21  ;;  %v8851_v35 = vld [vmem:[#allocation48_spill] sm:$0xff] }
 0x2c3   : > { %v5154_v54 = vpop.eup %5153  ;;  %5167 = vtanh.f32 %v8841_v53  ;;  %v3802_v43 = vadd.f32 %v3801_v29, %v3358_v10  ;;  %v3058_v47 = vadd.f32 0.5, %v2738_v46  ;;  %v3060_v7 = vadd.f32 0.5, %v2740_v58  ;;  %v8853_v46 = vld [vmem:[#allocation32_spill] sm:$0xff] }
 0x2c4   : > { %v5156_v12 = vpop.eup %5155  ;;  %5169 = vtanh.f32 %v7694_v56  ;;  %v3377_v45 = vmul.f32 %v3057_v44, %v8842_v42  ;;  %v3077_v28 = vadd.f32 0.5, %v2757_v39  ;;  %v3079_v40 = vadd.f32 0.5, %v2759_v19  ;;  %v8845_v56 = vld [vmem:[#allocation43_spill] sm:$0xff] }
 0x2c5   : > { %v5158_v0 = vpop.eup %5157  ;;  %5171 = vtanh.f32 %v7697_v5  ;;  %v3832_v14 = vadd.f32 %v3831_v49, %v3360_v50  ;;  %v3078_v18 = vadd.f32 0.5, %v2758_v33  ;;  %v2777_v61 = vmul.f32 0.5, %v5154_v54  ;;  %v8848_v5 = vld [vmem:[#allocation45_spill] sm:$0xff]  ;;  %v8856_v54 = vld [vmem:[#allocation88_spill] sm:$0xff]  ;;  %v8860_v42 = vld [vmem:[#allocation91_spill] sm:$0xff] }
 0x2c6   : > { %v5160_v17 = vpop.eup %5159  ;;  %5173 = vtanh.f32 %v7700_v32  ;;  %v3379_v8 = vmul.f32 %v3059_v34, %v8843_v41  ;;  %v3080_v26 = vadd.f32 0.5, %v2760_v30  ;;  %v2779_v59 = vmul.f32 0.5, %v5156_v12  ;;  %v8855_v33 = vld [vmem:[#allocation33_spill] sm:$0xff]  ;;  %v8857_v30 = vld [vmem:[#allocation79_spill] sm:$0xff] }
 0x2c7   : > { %5175 = vtanh.f32 %v8844_v20  ;;  %v3378_v2 = vmul.f32 %v3058_v47, %v8845_v56  ;;  %v3380_v63 = vmul.f32 %v3060_v7, %v8846_v22  ;;  %v2778_v55 = vmul.f32 0.5, %v5158_v0  ;;  %v8858_v12 = vld [vmem:[#allocation89_spill] sm:$0xff]  ;;  %v8862_v22 = vld [vmem:[#allocation92_spill] sm:$0xff] }
 0x2c8   : > { %5177 = vtanh.f32 %v8847_v3  ;;  %v3397_v57 = vmul.f32 %v3077_v28, %v8848_v5  ;;  %v3399_v23 = vmul.f32 %v3079_v40, %v8849_v13  ;;  %v2780_v60 = vmul.f32 0.5, %v5160_v17  ;;  %v8861_v17 = vld [vmem:[#allocation63_spill] sm:$0xff]  ;;  %v8863_v13 = vld [vmem:[#allocation93_spill] sm:$0xff] }
 0x2c9   : > { %5179 = vtanh.f32 %v8850_v36  ;;  %v3788_v32 = vadd.f32 %v3787_v37, %v3377_v45  ;;  %v3398_v27 = vmul.f32 %v3078_v18, %v8851_v35  ;;  %v3097_v29 = vadd.f32 0.5, %v2777_v61 }
 0x2ca   : > { %5181 = vtanh.f32 %v7712_v52  ;;  %v3818_v49 = vadd.f32 %v3817_v15, %v3379_v8  ;;  %v3400_v38 = vmul.f32 %v3080_v26, %v8852_v25  ;;  %v3099_v24 = vadd.f32 0.5, %v2779_v59  ;;  %v8854_v52 = vld [vmem:[#allocation15_spill] sm:$0xff] }
 0x2cb   : > { %5183 = vtanh.f32 %v7715_v4  ;;  %v3803_v21 = vadd.f32 %v3802_v43, %v3378_v2  ;;  %v3833_v51 = vadd.f32 %v3832_v14, %v3380_v63  ;;  %v3098_v10 = vadd.f32 0.5, %v2778_v55 }
 0x2cc   : > { %5185 = vtanh.f32 %v8853_v46  ;;  %v3789_v44 = vadd.f32 %v3788_v32, %v3397_v57  ;;  %v3819_v39 = vadd.f32 %v3818_v49, %v3399_v23  ;;  %v3100_v19 = vadd.f32 0.5, %v2780_v60 }
 0x2cd   : > { %v5162_v58 = vpop.eup %5161  ;;  %5187 = vtanh.f32 %v7727_v62  ;;  %v3804_v37 = vadd.f32 %v3803_v21, %v3398_v27  ;;  %v3417_v6 = vmul.f32 %v3097_v29, %v8854_v52  ;;  %v3834_v4 = vadd.f32 %v3833_v51, %v3400_v38  ;;  %v8859_v62 = vld [vmem:[#allocation34_spill] sm:$0xff]  ;;  %v8865_v27 = vld [vmem:[#allocation95_spill] sm:$0xff]  ;;  %v8866_v38 = vld [vmem:[#allocation96_spill] sm:$0xff] }
 0x2ce   : > { %v5164_v9 = vpop.eup %5163  ;;  %v2797_v50 = vmul.f32 0.5, %v5162_v58  ;;  %5189 = vtanh.f32 %v8855_v33  ;;  %v3419_v15 = vmul.f32 %v3099_v24, %v8856_v54  ;;  %v3418_v43 = vmul.f32 %v3098_v10, %v8858_v12  ;;  %v8867_v21 = vld [vmem:[#allocation97_spill] sm:$0xff] }
 0x2cf   : > { %v5166_v31 = vpop.eup %5165  ;;  %v2799_v34 = vmul.f32 0.5, %v5164_v9  ;;  %5191 = vtanh.f32 %v8857_v30  ;;  %v3420_v45 = vmul.f32 %v3100_v19, %v8860_v42  ;;  %v3790_v18 = vadd.f32 %v3789_v44, %v3417_v6 }
 0x2d0   : > { %v5168_v53 = vpop.eup %5167  ;;  %v3117_v47 = vadd.f32 0.5, %v2797_v50  ;;  %v2798_v7 = vmul.f32 0.5, %v5166_v31  ;;  %5193 = vtanh.f32 %v8859_v62  ;;  %v3820_v26 = vadd.f32 %v3819_v39, %v3419_v15  ;;  %v8868_v39 = vld [vmem:[#allocation98_spill] sm:$0xff]  ;;  %v8869_v50 = vld [vmem:[#allocation11_spill] sm:$0xff] }
 0x2d1   : > { %v5170_v0 = vpop.eup %5169  ;;  %v3119_v28 = vadd.f32 0.5, %v2799_v34  ;;  %v2800_v40 = vmul.f32 0.5, %v5168_v53  ;;  %5195 = vtanh.f32 %v8861_v17  ;;  %v3805_v2 = vadd.f32 %v3804_v37, %v3418_v43 }
 0x2d2   : > { %v5172_v14 = vpop.eup %5171  ;;  %v3118_v61 = vadd.f32 0.5, %v2798_v7  ;;  %v2817_v41 = vmul.f32 0.5, %v5170_v0  ;;  %5197 = vtanh.f32 %v7798_v16  ;;  %v3437_v63 = vmul.f32 %v3117_v47, %v8862_v22  ;;  %v8864_v16 = vld [vmem:[#allocation94_spill] sm:$0xff] }
 0x2d3   : > { %v5174_v8 = vpop.eup %5173  ;;  %v3120_v59 = vadd.f32 0.5, %v2800_v40  ;;  %v2819_v20 = vmul.f32 0.5, %v5172_v14  ;;  %5199 = vtanh.f32 %v7801_v48  ;;  %v3835_v57 = vadd.f32 %v3834_v4, %v3420_v45  ;;  %v8870_v45 = vld [vmem:[#allocation55_spill] sm:$0xff] }
 0x2d4   : > { %v5176_v56 = vpop.eup %5175  ;;  %v3137_v55 = vadd.f32 0.5, %v2817_v41  ;;  %v2818_v3 = vmul.f32 0.5, %v5174_v8  ;;  %v3439_v23 = vmul.f32 %v3119_v28, %v8863_v13  ;;  %v3438_v35 = vmul.f32 %v3118_v61, %v8864_v16  ;;  %v8871_v61 = vld [vmem:[#allocation47_spill] sm:$0xff]  ;;  %v8875_v13 = vld [vmem:[#allocation70_spill] sm:$0xff] }
 0x2d5   : > { %v5178_v5 = vpop.eup %5177  ;;  %v3139_v60 = vadd.f32 0.5, %v2819_v20  ;;  %v2820_v36 = vmul.f32 0.5, %v5176_v56  ;;  %v3440_v29 = vmul.f32 %v3120_v59, %v8865_v27  ;;  %v3791_v44 = vadd.f32 %v3790_v18, %v3437_v63  ;;  %v8872_v20 = vld [vmem:[#allocation57_spill] sm:$0xff] }
 0x2d6   : > { %v5180_v32 = vpop.eup %5179  ;;  %v3138_v49 = vadd.f32 0.5, %v2818_v3  ;;  %v2837_v25 = vmul.f32 0.5, %v5178_v5  ;;  %v3457_v24 = vmul.f32 %v3137_v55, %v8866_v38  ;;  %v3821_v6 = vadd.f32 %v3820_v26, %v3439_v23  ;;  %v8874_v5 = vld [vmem:[#allocation50_spill] sm:$0xff] }
 0x2d7   : > { %v5182_v48 = vpop.eup %5181  ;;  %v3459_v51 = vmul.f32 %v3139_v60, %v8867_v21  ;;  %v3140_v10 = vadd.f32 0.5, %v2820_v36  ;;  %v2839_v46 = vmul.f32 0.5, %v5180_v32  ;;  %v3806_v15 = vadd.f32 %v3805_v2, %v3438_v35  ;;  %v8873_v2 = vld [vmem:[#allocation58_spill] sm:$0xff]  ;;  %v8876_v35 = vld [vmem:[#allocation60_spill] sm:$0xff] }
 0x2d8   : > { %v5184_v58 = vpop.eup %5183  ;;  %v3458_v19 = vmul.f32 %v3138_v49, %v8868_v39  ;;  %v3157_v9 = vadd.f32 0.5, %v2837_v25  ;;  %v2838_v37 = vmul.f32 0.5, %v5182_v48  ;;  %v3836_v34 = vadd.f32 %v3835_v57, %v3440_v29  ;;  %v8877_v48 = vld [vmem:[#allocation29_spill] sm:$0xff] }
 0x2d9   : > { %v5186_v52 = vpop.eup %5185  ;;  %v3460_v33 = vmul.f32 %v3140_v10, %v8869_v50  ;;  %v3159_v31 = vadd.f32 0.5, %v2839_v46  ;;  %v2840_v4 = vmul.f32 0.5, %v5184_v58  ;;  %v3792_v43 = vadd.f32 %v3791_v44, %v3457_v24  ;;  %v8878_v46 = vld [vmem:[#allocation61_spill] sm:$0xff] }
 0x2da   : > { %v5188_v54 = vpop.eup %5187  ;;  %v3158_v30 = vadd.f32 0.5, %v2838_v37  ;;  %v2857_v53 = vmul.f32 0.5, %v5186_v52  ;;  %v3822_v47 = vadd.f32 %v3821_v6, %v3459_v51  ;;  %v3807_v42 = vadd.f32 %v3806_v15, %v3458_v19  ;;  %v8879_v37 = vld [vmem:[#allocation62_spill] sm:$0xff] }
 0x2db   : > { %v5190_v12 = vpop.eup %5189  ;;  %v3160_v7 = vadd.f32 0.5, %v2840_v4  ;;  %v2859_v62 = vmul.f32 0.5, %v5188_v54  ;;  %v3477_v28 = vmul.f32 %v3157_v9, %v8870_v45  ;;  %v3837_v18 = vadd.f32 %v3836_v34, %v3460_v33  ;;  %v3537_v9 = vld [vmem:[#allocation2 + $0x20] sm:$0xff]  ;;  %v3538_v34 = vld [vmem:[#allocation2 + $0x48] sm:$0xff] }
 0x2dc   : > { %v5192_v0 = vpop.eup %5191  ;;  %v3177_v40 = vadd.f32 0.5, %v2857_v53  ;;  %v2858_v17 = vmul.f32 0.5, %v5190_v12  ;;  %v3479_v41 = vmul.f32 %v3159_v31, %v8871_v61  ;;  %v3478_v56 = vmul.f32 %v3158_v30, %v8872_v20  ;;  %v3539_v31 = vld [vmem:[#allocation2 + $0x70] sm:$0xff] }
 0x2dd   : > { %v5194_v14 = vpop.eup %5193  ;;  %v3179_v8 = vadd.f32 0.5, %v2859_v62  ;;  %v2860_v26 = vmul.f32 0.5, %v5192_v0  ;;  %v3480_v57 = vmul.f32 %v3160_v7, %v8874_v5  ;;  %v3793_v16 = vadd.f32 %v3792_v43, %v3477_v28  ;;  %v3540_v43 = vld [vmem:[#allocation2 + $0x90] sm:$0xff] }
 0x2de   : > { %v5196_v59 = vpop.eup %5195  ;;  %v3497_v22 = vmul.f32 %v3177_v40, %v8873_v2  ;;  %v3178_v63 = vadd.f32 0.5, %v2858_v17  ;;  %v2877_v55 = vmul.f32 0.5, %v5194_v14  ;;  %v3823_v25 = vadd.f32 %v3822_v47, %v3479_v41 }
 0x2df   : > { %v5198_v3 = vpop.eup %5197  ;;  %v3499_v23 = vmul.f32 %v3179_v8, %v8875_v13  ;;  %v3180_v60 = vadd.f32 0.5, %v2860_v26  ;;  %v2879_v36 = vmul.f32 0.5, %v5196_v59  ;;  %v3808_v51 = vadd.f32 %v3807_v42, %v3478_v56 }
 0x2e0   : > { %v5200_v32 = vpop.eup %5199  ;;  %v3498_v27 = vmul.f32 %v3178_v63, %v8876_v35  ;;  %v3197_v29 = vadd.f32 0.5, %v2877_v55  ;;  %v2878_v49 = vmul.f32 0.5, %v5198_v3  ;;  %v3794_v10 = vadd.f32 %v3793_v16, %v3497_v22 }
 0x2e1   : > { %v3500_v38 = vmul.f32 %v3180_v60, %v8877_v48  ;;  %v3199_v24 = vadd.f32 0.5, %v2879_v36  ;;  %v2880_v21 = vmul.f32 0.5, %v5200_v32  ;;  %v3838_v39 = vadd.f32 %v3837_v18, %v3480_v57 }
 0x2e2   : > { %v3517_v58 = vmul.f32 %v3197_v29, %v8878_v46  ;;  %v3198_v44 = vadd.f32 0.5, %v2878_v49  ;;  %v3824_v19 = vadd.f32 %v3823_v25, %v3499_v23  ;;  %v3809_v50 = vadd.f32 %v3808_v51, %v3498_v27 }
 0x2e3   : > { %v3519_v52 = vmul.f32 %v3199_v24, %v8879_v37  ;;  %v3200_v6 = vadd.f32 0.5, %v2880_v21  ;;  %v3839_v54 = vadd.f32 %v3838_v39, %v3500_v38 }
 0x2e4   : > { %v3795_v33 = vadd.f32 %v3794_v10, %v3517_v58  ;;  %v3518_v4 = vmul.f32 %v3198_v44, %v7789_v11 }
 0x2e5   : > { %v3825_v15 = vadd.f32 %v3824_v19, %v3519_v52  ;;  %v3520_v30 = vmul.f32 %v3200_v6, %v7793_v1 }
 0x2e6   : > { %v3857_v53 = vadd.f32 %v3795_v33, %v3537_v9  ;;  %v3810_v12 = vadd.f32 %v3809_v50, %v3518_v4 }
 0x2e7   : > { %v3859_v47 = vadd.f32 %v3825_v15, %v3539_v31  ;;  %v3840_v7 = vadd.f32 %v3839_v54, %v3520_v30  ;;  %3884 = sbr.rel (%p4481_p1) target bundleno = 799 (0x31f), region = 36 }
 0x2e8   : > { %3877 = vst [vmem:[#allocation2 + $0x20] sm:$0xff] %v3857_v53  ;;  %v3858_v62 = vadd.f32 %v3810_v12, %v3538_v34 }
 0x2e9   : > { %3879 = vst [vmem:[#allocation2 + $0x70] sm:$0xff] %v3859_v47  ;;  %v3860_v0 = vadd.f32 %v3840_v7, %v3540_v43 }
 0x2ea   : > { %3878 = vst [vmem:[#allocation2 + $0x48] sm:$0xff] %v3858_v62 }
 0x2eb   : > { %3880 = vst [vmem:[#allocation2 + $0x90] sm:$0xff] %v3860_v0 }
 0x2ec   : > { %v3885_v11 = vld [vmem:[#allocation2] sm:$0xff]  ;;  %v3886_v42 = vld [vmem:[#allocation2 + $0x38] sm:$0xff]  ;;  %v3887_v45 = vld [vmem:[#allocation2 + $0x50] sm:$0xff]  ;;  %v4072_v61 = vlaneseq  ;;  %v5313_v56 = vmov 1966171168  }
 0x2ed   : > { %v3888_v28 = vld [vmem:[#allocation2 + $0x18] sm:$0xff]  ;;  %v3889_v40 = vld [vmem:[#allocation2 + $0x30] sm:$0xff]  ;;  %v3890_v1 = vld [vmem:[#allocation2 + $0x68] sm:$0xff]  ;;  %v3905_v17 = vrot.slane %v3885_v11, 4  ;;  %v3911_v14 = vrot.slane %v3886_v42, 4  ;;  %v3917_v18 = vrot.slane %v3887_v45, 4  ;;  %v7860_v2 = vunpack.c.l.s4 %v5313_v56 }
 0x2ee   : > { %v3891_v41 = vld [vmem:[#allocation2 + $0x78] sm:$0xff]  ;;  %v3892_v8 = vld [vmem:[#allocation2 + $0x80] sm:$0xff]  ;;  %v3923_v26 = vrot.slane %v3888_v28, 4  ;;  %v3929_v59 = vrot.slane %v3889_v40, 4  ;;  %v3935_v20 = vrot.slane %v3890_v1, 4  ;;  %v3893_v9 = vld [vmem:[#allocation2 + $0x8] sm:$0xff] }
 0x2ef   : > { %v3906_v22 = vadd.f32 %v3905_v17, %v3885_v11  ;;  %v3912_v63 = vadd.f32 %v3911_v14, %v3886_v42  ;;  %v3918_v55 = vadd.f32 %v3917_v18, %v3887_v45  ;;  %v3941_v3 = vrot.slane %v3891_v41, 4  ;;  %v3894_v37 = vld [vmem:[#allocation2 + $0x88] sm:$0xff]  ;;  %v3896_v4 = vld [vmem:[#allocation2 + $0x40] sm:$0xff]  ;;  %v3897_v54 = vld [vmem:[#allocation2 + $0x58] sm:$0xff] }
 0x2f0   : > { %v3924_v5 = vadd.f32 %v3923_v26, %v3888_v28  ;;  %v3930_v57 = vadd.f32 %v3929_v59, %v3889_v40  ;;  %v3936_v13 = vadd.f32 %v3935_v20, %v3890_v1  ;;  %v3947_v23 = vrot.slane %v3892_v8, 4  ;;  %v3895_v52 = vld [vmem:[#allocation2 + $0x28] sm:$0xff]  ;;  %v3898_v15 = vld [vmem:[#allocation2 + $0x10] sm:$0xff]  ;;  %v3899_v43 = vld [vmem:[#allocation2 + $0x98] sm:$0xff] }
 0x2f1   : > { %v3907_v60 = vrot.slane %v3906_v22, 2  ;;  %v3913_v36 = vrot.slane %v3912_v63, 2  ;;  %v3919_v32 = vrot.slane %v3918_v55, 2  ;;  %v3942_v16 = vadd.f32 %v3941_v3, %v3891_v41  ;;  %v3900_v11 = vld [vmem:[#allocation2 + $0x60] sm:$0xff] }
 0x2f2   : > { %v3925_v35 = vrot.slane %v3924_v5, 2  ;;  %v3931_v27 = vrot.slane %v3930_v57, 2  ;;  %v3937_v29 = vrot.slane %v3936_v13, 2  ;;  %v3948_v49 = vadd.f32 %v3947_v23, %v3892_v8 }
 0x2f3   : > { %v3908_v25 = vadd.f32 %v3907_v60, %v3906_v22  ;;  %v3914_v48 = vadd.f32 %v3913_v36, %v3912_v63  ;;  %v3920_v38 = vadd.f32 %v3919_v32, %v3918_v55  ;;  %v3943_v24 = vrot.slane %v3942_v16, 2 }
 0x2f4   : > { %v3926_v21 = vadd.f32 %v3925_v35, %v3924_v5  ;;  %v3932_v51 = vadd.f32 %v3931_v27, %v3930_v57  ;;  %v3938_v10 = vadd.f32 %v3937_v29, %v3936_v13  ;;  %v3949_v46 = vrot.slane %v3948_v49, 2 }
 0x2f5   : > { %v3909_v58 = vrot.slane %v3908_v25, 1  ;;  %v3915_v44 = vrot.slane %v3914_v48, 1  ;;  %v3921_v39 = vrot.slane %v3920_v38, 1  ;;  %v3944_v19 = vadd.f32 %v3943_v24, %v3942_v16 }
 0x2f6   : > { %v3927_v6 = vrot.slane %v3926_v21, 1  ;;  %v3933_v50 = vrot.slane %v3932_v51, 1  ;;  %v3939_v33 = vrot.slane %v3938_v10, 1  ;;  %v3950_v31 = vadd.f32 %v3949_v46, %v3948_v49  ;;  %v3902_v46 = vld [vmem:[#allocation2 + $0x48] sm:$0xff] }
 0x2f7   : > { %v7862_v34 = vadd.f32 %v3909_v58, %v3908_v25  ;;  %v7864_v30 = vadd.f32 %v3915_v44, %v3914_v48  ;;  %v7866_v53 = vadd.f32 %v3921_v39, %v3920_v38  ;;  %v3945_v12 = vrot.slane %v3944_v19, 1  ;;  %v3903_v58 = vld [vmem:[#allocation2 + $0x70] sm:$0xff] }
 0x2f8   : > { %v7868_v47 = vadd.f32 %v3927_v6, %v3926_v21  ;;  %v7870_v7 = vadd.f32 %v3933_v50, %v3932_v51  ;;  %v7872_v62 = vadd.f32 %v3939_v33, %v3938_v10  ;;  %v3951_v0 = vrot.slane %v3950_v31, 1  ;;  %v3901_v10 = vld [vmem:[#allocation2 + $0x20] sm:$0xff] }
 0x2f9   : > { %v7874_v42 = vadd.f32 %v3945_v12, %v3944_v19  ;;  %v3953_v45 = vrot.slane %v3893_v9, 4  ;;  %v3959_v28 = vrot.slane %v3894_v37, 4  ;;  %v3965_v40 = vrot.slane %v3895_v52, 4 }
 0x2fa   : > { %v7876_v1 = vadd.f32 %v3951_v0, %v3950_v31  ;;  %v3971_v17 = vrot.slane %v3896_v4, 4  ;;  %v3977_v14 = vrot.slane %v3897_v54, 4  ;;  %v3983_v18 = vrot.slane %v3898_v15, 4 }
 0x2fb   : > { %v3954_v41 = vadd.f32 %v3953_v45, %v3893_v9  ;;  %v3960_v8 = vadd.f32 %v3959_v28, %v3894_v37  ;;  %v3966_v26 = vadd.f32 %v3965_v40, %v3895_v52  ;;  %v3989_v59 = vrot.slane %v3899_v43, 4  ;;  %v3904_v37 = vld [vmem:[#allocation2 + $0x90] sm:$0xff] }
 0x2fc   : > { %v3972_v20 = vadd.f32 %v3971_v17, %v3896_v4  ;;  %v3978_v56 = vadd.f32 %v3977_v14, %v3897_v54  ;;  %v3984_v22 = vadd.f32 %v3983_v18, %v3898_v15  ;;  %v3995_v63 = vrot.slane %v3900_v11, 4 }
 0x2fd   : > { %v3955_v55 = vrot.slane %v3954_v41, 2  ;;  %v3961_v3 = vrot.slane %v3960_v8, 2  ;;  %v3967_v5 = vrot.slane %v3966_v26, 2  ;;  %v3990_v57 = vadd.f32 %v3989_v59, %v3899_v43 }
 0x2fe   : > { %v3973_v13 = vrot.slane %v3972_v20, 2  ;;  %v3979_v23 = vrot.slane %v3978_v56, 2  ;;  %v3985_v60 = vrot.slane %v3984_v22, 2  ;;  %v3996_v36 = vadd.f32 %v3995_v63, %v3900_v11 }
 0x2ff   : > { %v3956_v32 = vadd.f32 %v3955_v55, %v3954_v41  ;;  %v3962_v16 = vadd.f32 %v3961_v3, %v3960_v8  ;;  %v3968_v35 = vadd.f32 %v3967_v5, %v3966_v26  ;;  %v3991_v27 = vrot.slane %v3990_v57, 2 }
 0x300   : > { %v3974_v29 = vadd.f32 %v3973_v13, %v3972_v20  ;;  %v3980_v49 = vadd.f32 %v3979_v23, %v3978_v56  ;;  %v3986_v25 = vadd.f32 %v3985_v60, %v3984_v22  ;;  %v3997_v48 = vrot.slane %v3996_v36, 2 }
 0x301   : > { %v3957_v38 = vrot.slane %v3956_v32, 1  ;;  %v3963_v24 = vrot.slane %v3962_v16, 1  ;;  %v3969_v21 = vrot.slane %v3968_v35, 1  ;;  %v3992_v51 = vadd.f32 %v3991_v27, %v3990_v57 }
 0x302   : > { %v3975_v44 = vrot.slane %v3974_v29, 1  ;;  %v3981_v39 = vrot.slane %v3980_v49, 1  ;;  %v3987_v19 = vrot.slane %v3986_v25, 1  ;;  %v3998_v9 = vadd.f32 %v3997_v48, %v3996_v36 }
 0x303   : > { %v3958_v52 = vadd.f32 %v3957_v38, %v3956_v32  ;;  %v3964_v6 = vadd.f32 %v3963_v24, %v3962_v16  ;;  %v3970_v50 = vadd.f32 %v3969_v21, %v3968_v35  ;;  %v3993_v33 = vrot.slane %v3992_v51, 1 }
 0x304   : > { %v3976_v31 = vadd.f32 %v3975_v44, %v3974_v29  ;;  %v3982_v4 = vadd.f32 %v3981_v39, %v3980_v49  ;;  %v3988_v54 = vadd.f32 %v3987_v19, %v3986_v25  ;;  %v3999_v15 = vrot.slane %v3998_v9, 1 }
 0x305   : > { %v3994_v12 = vadd.f32 %v3993_v33, %v3992_v51  ;;  %v4001_v43 = vrot.slane %v3901_v10, 4  ;;  %v4007_v0 = vrot.slane %v3902_v46, 4  ;;  %v4013_v11 = vrot.slane %v3903_v58, 4 }
 0x306   : > { %v4000_v45 = vadd.f32 %v3999_v15, %v3998_v9  ;;  %v4019_v28 = vrot.slane %v3904_v37, 4  ;;  %v4025_v40 = vmul.f32 0.00390625, %v7862_v34  ;;  %v4026_v17 = vmul.f32 0.00390625, %v7864_v30 }
 0x307   : > { %v4002_v14 = vadd.f32 %v4001_v43, %v3901_v10  ;;  %v4008_v18 = vadd.f32 %v4007_v0, %v3902_v46  ;;  %v4014_v41 = vadd.f32 %v4013_v11, %v3903_v58  ;;  %v4027_v8 = vmul.f32 0.00390625, %v7866_v53 }
 0x308   : > { %v4020_v26 = vadd.f32 %v4019_v28, %v3904_v37  ;;  %v4028_v59 = vmul.f32 0.00390625, %v7868_v47  ;;  %v4029_v20 = vmul.f32 0.00390625, %v7870_v7  ;;  %v4030_v56 = vmul.f32 0.00390625, %v7872_v62 }
 0x309   : > { %v4003_v22 = vrot.slane %v4002_v14, 2  ;;  %v4009_v63 = vrot.slane %v4008_v18, 2  ;;  %v4015_v55 = vrot.slane %v4014_v41, 2  ;;  %v4031_v3 = vmul.f32 0.00390625, %v7874_v42 }
 0x30a   : > { %v4021_v34 = vrot.slane %v4020_v26, 2  ;;  %v4032_v30 = vmul.f32 0.00390625, %v7876_v1  ;;  %v4033_v5 = vmul.f32 0.00390625, %v3958_v52  ;;  %v4034_v57 = vmul.f32 0.00390625, %v3964_v6 }
 0x30b   : > { %v4004_v13 = vadd.f32 %v4003_v22, %v4002_v14  ;;  %v4010_v23 = vadd.f32 %v4009_v63, %v4008_v18  ;;  %v4016_v53 = vadd.f32 %v4015_v55, %v4014_v41  ;;  %v4035_v60 = vmul.f32 0.00390625, %v3970_v50 }
 0x30c   : > { %v4022_v36 = vadd.f32 %v4021_v34, %v4020_v26  ;;  %v4036_v47 = vmul.f32 0.00390625, %v3976_v31  ;;  %v4037_v32 = vmul.f32 0.00390625, %v3982_v4  ;;  %v4038_v7 = vmul.f32 0.00390625, %v3988_v54 }
 0x30d   : > { %v4005_v16 = vrot.slane %v4004_v13, 1  ;;  %v4011_v62 = vrot.slane %v4010_v23, 1  ;;  %v4017_v35 = vrot.slane %v4016_v53, 1  ;;  %v4039_v27 = vmul.f32 0.00390625, %v3994_v12 }
 0x30e   : > { %v4023_v29 = vrot.slane %v4022_v36, 1  ;;  %v4040_v49 = vmul.f32 0.00390625, %v4000_v45  ;;  %v4065_v42 = vcombine.low %v4025_v40, %v4026_v17  ;;  %v4066_v25 = vcombine.low %v4027_v8, %v4028_v59 }
 0x30f   : > { %v4006_v48 = vadd.f32 %v4005_v16, %v4004_v13  ;;  %v4012_v1 = vadd.f32 %v4011_v62, %v4010_v23  ;;  %v4018_v38 = vadd.f32 %v4017_v35, %v4016_v53  ;;  %v4067_v24 = vcombine.low %v4029_v20, %v4030_v56 }
 0x310   : > { %v4024_v21 = vadd.f32 %v4023_v29, %v4022_v36  ;;  %v4068_v51 = vcombine.low %v4031_v3, %v4032_v30  ;;  %v4071_v10 = vunpack.c.0.s8 %v7860_v2  ;;  %v4073_v46 = vshrl.u32 %v4072_v61, 7 }
 0x311   : > { %v4041_v58 = vmul.f32 0.00390625, %v4006_v48  ;;  %v4042_v44 = vmul.f32 0.00390625, %v4012_v1  ;;  %v4043_v39 = vmul.f32 0.00390625, %v4018_v38  ;;  %v4114_v19 = vcombine.low %v4033_v5, %v4034_v57 }
 0x312   : > { %v4044_v9 = vmul.f32 0.00390625, %v4024_v21  ;;  %v4074_v37 = vsub.s32 %v4071_v10, %v4073_v46  ;;  %v4115_v52 = vcombine.low %v4035_v60, %v4036_v47  ;;  %v4116_v6 = vcombine.low %v4037_v32, %v4038_v7 }
 0x313   : > { %v4117_v50 = vcombine.low %v4039_v27, %v4040_v49  ;;  %v4163_v33 = vcombine.low %v4041_v58, %v4042_v44  ;;  %vm4194_vm1 = vcmp.lt.s32.totalorder %v4072_v61, 512 }
 0x314   : > { %v4075_v31 = vrot.slane %v4065_v42, %v4074_v37  ;;  %v4082_v4 = vrot.slane %v4066_v25, %v4074_v37  ;;  %v4089_v54 = vrot.slane %v4067_v24, %v4074_v37  ;;  %v4096_v15 = vrot.slane %v4068_v51, %v4074_v37 }
 0x315   : > { %v4124_v12 = vrot.slane %v4114_v19, %v4074_v37  ;;  %v4131_v43 = vrot.slane %v4115_v52, %v4074_v37  ;;  %v4138_v0 = vrot.slane %v4116_v6, %v4074_v37  ;;  %v4145_v2 = vrot.slane %v4117_v50, %v4074_v37 }
 0x316   : > { %v4097_v11 = vcombine.low %v4075_v31, %v4082_v4  ;;  %v4098_v45 = vcombine.low %v4089_v54, %v4096_v15  ;;  %v4164_v28 = vcombine.low %v4043_v39, %v4044_v9  ;;  %v4171_v40 = vrot.slane %v4163_v33, %v4074_v37 }
 0x317   : > { %v4146_v17 = vcombine.low %v4124_v12, %v4131_v43  ;;  %v4147_v14 = vcombine.low %v4138_v0, %v4145_v2 }
 0x318   : > { %v4105_v18 = vrot.slane %v4097_v11, %v4074_v37  ;;  %v4112_v41 = vrot.slane %v4098_v45, %v4074_v37  ;;  %v4178_v8 = vrot.slane %v4164_v28, %v4074_v37 }
 0x319   : > { %v4154_v26 = vrot.slane %v4146_v17, %v4074_v37  ;;  %v4161_v59 = vrot.slane %v4147_v14, %v4074_v37 }
 0x31a   : > { %v4113_v20 = vcombine.low %v4105_v18, %v4112_v41  ;;  %v4179_v56 = vcombine.low %v4171_v40, %v4178_v8 }
 0x31b   : > { %v4162_v22 = vcombine.low %v4154_v26, %v4161_v59 }
 0x31c   : > { %v4186_v63 = vrot.slane %v4179_v56, %v4074_v37  ;;  %4190 = vst [vmem:[%s5410_s8] sm:$0xff] %v4113_v20 }
 0x31d   : > { %4191 = vst [vmem:[%s5410_s8 + $0x8] sm:$0xff] %v4162_v22 }
 0x31e   : > { %4196 = vst.msk [vmem:[%s5410_s8 + $0x10] sm:$0xf] %vm4194_vm1, %v4186_v63 }
 0x31f PF: > { %s4486_s12 = smul.u32 320, %s5297_s13  ;;  %s4214_s7 = sshll.u32 %s5410_s8, 4  ;;  %s4215_s7 = int_to_ptr.vmem [resolvable:$true] %s4214_s7 }
 0x320   : > { %s4198_s30 = scalar_lea.sflag [#allocation4], %s182_s26  ;;  %s5217_s3 = scalar_lea.vmem %s4215_s7, 320 }
 0x321   : > { %s4212_s29 = scalar_lea.hbm %s7941_s2, %s4486_s12  ;;  %p5218_p2 = scmp.ne.s32.totalorder %s4215_s7, %s5217_s3 }
 0x322   : > { %s5314_s4 = smov [#allocation3]  }
 0x323   : > { %p5219_p4 = pnand %p5218_p2, %p5379_p3  ;;  %s5221_s5 = sshll.u32 %s5314_s4, 4  ;;  %s5222_s5 = int_to_ptr.vmem [resolvable:$false] %s5221_s5 }
 0x324   : > { %s5223_s6 = scalar_lea.vmem %s5222_s5, 640  ;;  %p5224_p6 = scmp.lt.s32.totalorder %s4215_s7, %s5222_s5 }
 0x325   : > { %p5220_p5 = pneg %p5219_p4  ;;  %p5225_p7 = scmp.lt.s32.totalorder %s5223_s6, %s5217_s3 }
 0x327   : > { %p5226_p8 = por %p5225_p7, %p5224_p6 }
 0x329   : > { %p5227_p10 = pnand %p5226_p8, %p5220_p5 }
 0x32b   : > { %5230 = shalt.err (!%p5227_p10)
}
 0x32c   : > { %s5231_s13 = scalar_lea.hbm %s4212_s29, 320  ;;  %s5235_s17 = scalar_lea.hbm %s7941_s2, 640 }
 0x32d   : > { %p5232_p11 = scmp.ne.s32.totalorder %s4212_s29, %s5231_s13  ;;  %p5236_p0 = scmp.lt.s32.totalorder %s4212_s29, %s7941_s2 }
 0x32e   : > { %p5237_p1 = scmp.lt.s32.totalorder %s5235_s17, %s5231_s13 }
 0x32f   : > { %p5233_p12 = pnand %p5232_p11, %p5379_p3 }
 0x330   : > { %p5238_p2 = por %p5237_p1, %p5236_p0 }
 0x331   : > { %p5234_p13 = pneg %p5233_p12 }
 0x333   : > { %p5239_p4 = pnand %p5238_p2, %p5234_p13 }
 0x335   : > { %5242 = shalt.err (!%p5239_p4)
}
 0x336   : > { %4487 = dma.vmem_to_hbm [thread:$0]  (%p5379_p3), %s4215_s7, 320, %s4212_s29, %s4198_s30  }
 0x337 PF: > { %p4493_p5 = scmp.ge.s32.totalorder %s5309_s16, 2  ;;  %s4226_s24 = sand.u32 1, %s5281_s9  }
 0x338   : > { %s4227_s12 = scalar_lea.sflag [#allocation4], %s4226_s24 }
 0x339   : > { %p4490_p6 = pnand %p4493_p5, %p5389_p9 }
 0x33b   : > { %p4491_p7 = pneg %p4490_p6 }
 0x33d   : > { %5276 = dma.done.wait (%p4491_p7), %s4227_s12, 320  }
 0x33e   : > { %5278 = vsyncadd (%p4491_p7), %s4227_s12, 4294966976  ;;  %s15_s16 = sadd.s32 1, %s5309_s16   ;;  %s8880_s9 = smov %s5285_s10 }
 0x33f   : > { %p12_p8 = scmp.ge.s32.totalorder %s15_s16, 6   ;;  %s8881_s10 = smov %s5289_s11 }
 0x340   : > { %s8882_s11 = smov %s5397_s25  ;;  %s8883_s12 = smov %s5301_s14 }
 0x341   : > { %s8884_s13 = smov %s5305_s15  ;;  %s8885_s14 = smov %s8888_s19 }
 0x342   : > { %s8886_s15 = smov %s8892_s20  ;;  %14 = sbr.rel (!%p12_p8) target bundleno = 5 (0x5), region = 74 }
 0x347   :  { %4232 = vsyncpa [#allocation4], 1 }
 0x348   :  { %4234 = vsyncpa [#allocation4 + $0x1], 1 }

</bundles_post_ra>
